<compile_context>
chip_gen: v7x
topology: tpu7x:2x2x1
jax: 0.10.0
libtpu: 0.0.40
codegen_flags: <defaults>
</compile_context>

<pallas_src>
import math

import jax
import jax.numpy as jnp
from jax import lax
from jax.experimental import pallas as pl
from jax.experimental.pallas import tpu as pltpu


_NEG_BIG = -1e30  # finite "-inf"; diagonal is never masked so no NaN risk


def _layernorm_f32(z32, g, b, eps=1e-5):
    mu = jnp.mean(z32, axis=-1, keepdims=True)
    var = jnp.mean(jnp.square(z32 - mu), axis=-1, keepdims=True)
    return ((z32 - mu) * lax.rsqrt(var + eps) * g.astype(jnp.float32)
            + b.astype(jnp.float32))


def _gelu_tanh(z):
    c = math.sqrt(2.0 / math.pi)
    return 0.5 * z * (1.0 + jnp.tanh(c * (z + 0.044715 * z * z * z)))


def make_block_kernel(n_head, block_b, T, C):
    hd = C // n_head

    def kernel(x_ref,
               ln1g_ref, ln1b_ref, ln2g_ref, ln2b_ref,
               wattn_ref, battn_ref, wproj_ref, bproj_ref,
               wfc_ref, bfc_ref, wfp_ref, bfp_ref,
               o_ref):
        cdt = wattn_ref.dtype                       # MXU operand dtype (bf16 if x was f32)
        x32 = x_ref[...].reshape(block_b * T, C).astype(jnp.float32)   # (M, C)

        # ---------------- attention branch: x + attn(ln_1(x)) ----------------
        h = _layernorm_f32(x32, ln1g_ref[...], ln1b_ref[...]).astype(cdt)
        # softmax 1/sqrt(hd) scale is pre-folded into the q columns of w/b_attn.
        qkv = (jnp.dot(h, wattn_ref[...], preferred_element_type=jnp.float32)
               + battn_ref[...]).astype(cdt)        # (M, 3C), cast right after bias add

        def head_major(z):                          # (M, C) -> (Bb*H, T, hd)
            z = z.reshape(block_b, T, n_head, hd)
            z = jnp.swapaxes(z, 1, 2)               # (Bb, H, T, hd)
            return z.reshape(block_b * n_head, T, hd)

        q = head_major(qkv[:, :C])
        k = head_major(qkv[:, C:2 * C])
        v = head_major(qkv[:, 2 * C:])

        # All heads scored with one batched matmul, contracting hd directly.
        att = jnp.einsum('gtd,gsd->gts', q, k,
                         preferred_element_type=jnp.float32)    # (Bb*H, T, T) f32

        row = lax.broadcasted_iota(jnp.int32, (T, T), 0)
        col = lax.broadcasted_iota(jnp.int32, (T, T), 1)
        att = jnp.where(row >= col, att, _NEG_BIG)  # single select, broadcast over heads

        att = att - jnp.max(att, axis=-1, keepdims=True)
        p = jnp.exp(att)
        inv_den = pl.reciprocal(jnp.sum(p, axis=-1, keepdims=True), approx=True)
        probs = (p * inv_den).astype(cdt)

        y = jnp.einsum('gts,gsd->gtd', probs, v,
                       preferred_element_type=jnp.float32)       # (Bb*H, T, hd)
        y = y.astype(cdt).reshape(block_b, n_head, T, hd)
        y = jnp.swapaxes(y, 1, 2).reshape(block_b * T, C)        # back to token-major

        y = (jnp.dot(y, wproj_ref[...], preferred_element_type=jnp.float32)
             + bproj_ref[...])
        x1 = x32 + y                                             # residual in f32

        # ---------------- MLP branch: x1 + mlp(ln_2(x1)) ----------------
        h2 = _layernorm_f32(x1, ln2g_ref[...], ln2b_ref[...]).astype(cdt)
        f = (jnp.dot(h2, wfc_ref[...], preferred_element_type=jnp.float32)
             + bfc_ref[...])
        f = _gelu_tanh(f).astype(cdt)
        f = (jnp.dot(f, wfp_ref[...], preferred_element_type=jnp.float32)
             + bfp_ref[...])

        o_ref[...] = (x1 + f).reshape(block_b, T, C).astype(o_ref.dtype)

    return kernel


_PARAM_ORDER = ["ln1_g", "ln1_b", "ln2_g", "ln2_b",
                "w_attn", "b_attn", "w_proj", "b_proj",
                "w_fc", "b_fc", "w_fcproj", "b_fcproj"]
_WEIGHTS = {"w_attn", "w_proj", "w_fc", "w_fcproj"}   # MXU operands -> compute dtype


def _vmem_limit_bytes():
    """Generation-aware VMEM request with headroom (v7x: 64 MiB physical)."""
    try:
        cap = pltpu.get_tpu_info().vmem_capacity_bytes
    except Exception:
        return 48 * 1024 * 1024                     # safe on every generation
    return min(int(cap * 3 // 4), 100 * 1024 * 1024)


def _single_buffered_mode():
    """Explicit feature detection for pl.Buffered(1) (no broad except/fallback)."""
    if not hasattr(pl, "Buffered"):
        return None
    try:
        pl.BlockSpec((8, 128), lambda b: (0, 0), pipeline_mode=pl.Buffered(1))
    except TypeError:
        return None
    return pl.Buffered(1)


def _pick_batch_block(B, T, C, n_head, act_bytes, vmem_limit, weight_bytes):
    """Largest divisor of B whose per-step working set fits the budget,
    targeting M = Bb*T >= 256 rows per dense matmul."""
    budget = max(vmem_limit - 2 * weight_bytes, vmem_limit // 4)
    best = 1
    for bb in range(1, B + 1):
        if B % bb:
            continue
        toks = bb * T
        est = (bb * n_head * T * T * 4              # f32 attention scores
               + toks * 3 * C * (4 + act_bytes)     # qkv accum + compute-dtype copy
               + toks * 4 * C * 4                   # MLP hidden (f32)
               + 3 * toks * C * 4                   # residual / LN temporaries
               + 2 * 2 * toks * C * 4)              # double-buffered x / o tiles
        if est > budget:
            break
        best = bb
        if toks >= 256:
            break
    return best


def _make_block_call(B, T, C, n_head, block_b, out_dtype, arg_shapes,
                     vmem_limit, buffered_mode):
    kernel = make_block_kernel(n_head, block_b, T, C)

    def const_spec(shape):
        nd = len(shape)
        idx = lambda b, _nd=nd: (0,) * _nd
        if buffered_mode is not None:
            # Constant index_map -> nothing to pipeline; keep one VMEM copy.
            return pl.BlockSpec(shape, idx, pipeline_mode=buffered_mode)
        return pl.BlockSpec(shape, idx)

    in_specs = [pl.BlockSpec((block_b, T, C), lambda b: (b, 0, 0))]
    in_specs += [const_spec(arg_shapes[i]) for i in range(1, len(arg_shapes))]

    return pl.pallas_call(
        kernel,
        out_shape=jax.ShapeDtypeStruct((B, T, C), out_dtype),
        grid=(B // block_b,),
        in_specs=in_specs,
        out_specs=pl.BlockSpec((block_b, T, C), lambda b: (b, 0, 0)),
        compiler_params=pltpu.CompilerParams(
            dimension_semantics=("parallel",),      # batch blocks independent
            vmem_limit_bytes=vmem_limit,
        ),
    )


def gpt2_block(x, params, n_head, compute_dtype=None):
    B, T, C = x.shape
    assert C % n_head == 0
    hd = C // n_head

    # MXU operands in bf16 when the model arrives in f32 (f32 accumulation kept).
    if compute_dtype is None:
        compute_dtype = jnp.bfloat16 if x.dtype == jnp.float32 else x.dtype

    # Fold the 1/sqrt(hd) softmax scale into the q columns of w_attn / b_attn.
    scale = 1.0 / math.sqrt(hd)
    w_attn = params["w_attn"].astype(jnp.float32).at[:, :C].multiply(scale)
    b_attn = params["b_attn"].astype(jnp.float32).at[:, :C].multiply(scale)
    prepped = dict(params)
    prepped["w_attn"], prepped["b_attn"] = w_attn, b_attn

    args = []
    for name in _PARAM_ORDER:
        dt = compute_dtype if name in _WEIGHTS else jnp.float32
        args.append(prepped[name].astype(dt))

    vmem_limit = _vmem_limit_bytes()
    weight_bytes = sum(int(a.size) * a.dtype.itemsize for a in args)
    act_bytes = jnp.dtype(compute_dtype).itemsize
    block_b = _pick_batch_block(B, T, C, n_head, act_bytes, vmem_limit,
                                weight_bytes)

    arg_shapes = [tuple(x.shape)] + [tuple(a.shape) for a in args]
    call = _make_block_call(B, T, C, n_head, block_b, x.dtype, arg_shapes,
                            vmem_limit, _single_buffered_mode())
    return call(x, *args)


def block_reference(x, p, n_head):
    """Pure-JAX reference mirroring the PyTorch Block forward."""
    B, T, C = x.shape
    hd = C // n_head

    def ln(z, g, b):
        mu = z.mean(-1, keepdims=True)
        var = ((z - mu) ** 2).mean(-1, keepdims=True)
        return (z - mu) / jnp.sqrt(var + 1e-5) * g + b

    h = ln(x, p["ln1_g"][0], p["ln1_b"][0])
    qkv = h @ p["w_attn"] + p["b_attn"][0]
    q, k, v = jnp.split(qkv, 3, axis=-1)
    q = q.reshape(B, T, n_head, hd).transpose(0, 2, 1, 3)
    k = k.reshape(B, T, n_head, hd).transpose(0, 2, 1, 3)
    v = v.reshape(B, T, n_head, hd).transpose(0, 2, 1, 3)
    att = (q @ k.transpose(0, 1, 3, 2)) / math.sqrt(hd)
    mask = jnp.tril(jnp.ones((T, T), dtype=bool))
    att = jnp.where(mask, att, -jnp.inf)
    att = jax.nn.softmax(att, axis=-1)
    y = (att @ v).transpose(0, 2, 1, 3).reshape(B, T, C)
    y = y @ p["w_proj"] + p["b_proj"][0]
    x1 = x + y

    h2 = ln(x1, p["ln2_g"][0], p["ln2_b"][0])
    f = h2 @ p["w_fc"] + p["b_fc"][0]
    c = math.sqrt(2.0 / math.pi)
    f = 0.5 * f * (1.0 + jnp.tanh(c * (f + 0.044715 * f ** 3)))
    f = f @ p["w_fcproj"] + p["b_fcproj"][0]
    return x1 + f


if __name__ == "__main__":
    # Small but lane-dense demo config (C, 3C, 4C all multiples of 128).
    B, T, C, n_head = 2, 16, 128, 4

    key = jax.random.PRNGKey(0)
    keys = jax.random.split(key, 16)

    def nrm(k, shape, scale=0.02):
        return (scale * jax.random.normal(k, shape)).astype(jnp.float32)

    params = {
        "ln1_g": 1.0 + nrm(keys[0], (1, C)),
        "ln1_b": nrm(keys[1], (1, C)),
        "ln2_g": 1.0 + nrm(keys[2], (1, C)),
        "ln2_b": nrm(keys[3], (1, C)),
        "w_attn": nrm(keys[4], (C, 3 * C)),
        "b_attn": nrm(keys[5], (1, 3 * C)),
        "w_proj": nrm(keys[6], (C, C)),
        "b_proj": nrm(keys[7], (1, C)),
        "w_fc": nrm(keys[8], (C, 4 * C)),
        "b_fc": nrm(keys[9], (1, 4 * C)),
        "w_fcproj": nrm(keys[10], (4 * C, C)),
        "b_fcproj": nrm(keys[11], (1, C)),
    }
    x = jax.random.normal(keys[12], (B, T, C), dtype=jnp.float32)

    out = gpt2_block(x, params, n_head)
    out = jax.block_until_ready(out)

    ref = block_reference(x, params, n_head)
    assert out.shape == (B, T, C)
    # Tolerance accounts for bf16 MXU operands (f32 accumulation / residuals /
    # LN stats kept) and the approximate softmax reciprocal (EUP vrcp).
    assert jnp.allclose(out, ref, rtol=2e-2, atol=2e-2), "kernel != reference"

    print("KERNEL_OK")
</pallas_src>

<mosaic_0001>
module attributes {stable_mosaic.version = 11 : i64} {
  func.func @kernel(%arg0: i32, %arg1: memref<2x16x128xf32, #tpu.memory_space<vmem>>, %arg2: memref<1x128xf32, #tpu.memory_space<vmem>>, %arg3: memref<1x128xf32, #tpu.memory_space<vmem>>, %arg4: memref<1x128xf32, #tpu.memory_space<vmem>>, %arg5: memref<1x128xf32, #tpu.memory_space<vmem>>, %arg6: memref<128x384xbf16, #tpu.memory_space<vmem>>, %arg7: memref<1x384xf32, #tpu.memory_space<vmem>>, %arg8: memref<128x128xbf16, #tpu.memory_space<vmem>>, %arg9: memref<1x128xf32, #tpu.memory_space<vmem>>, %arg10: memref<128x512xbf16, #tpu.memory_space<vmem>>, %arg11: memref<1x512xf32, #tpu.memory_space<vmem>>, %arg12: memref<512x128xbf16, #tpu.memory_space<vmem>>, %arg13: memref<1x128xf32, #tpu.memory_space<vmem>>, %arg14: memref<2x16x128xf32, #tpu.memory_space<vmem>>) attributes {dimension_semantics = [#tpu.dimension_semantics<parallel>], iteration_bounds = array<i64: 1>, scalar_prefetch = 0 : i64, scratch_operands = 0 : i64, tpu.core_type = #tpu.core_type<tc>, window_params = [{transform_indices = @transform_0, window_bounds = array<i64: 2, 16, 128>}, {pipeline_mode = #tpu.pipeline_mode<synchronous>, transform_indices = @transform_1, window_bounds = array<i64: 1, 128>}, {pipeline_mode = #tpu.pipeline_mode<synchronous>, transform_indices = @transform_2, window_bounds = array<i64: 1, 128>}, {pipeline_mode = #tpu.pipeline_mode<synchronous>, transform_indices = @transform_3, window_bounds = array<i64: 1, 128>}, {pipeline_mode = #tpu.pipeline_mode<synchronous>, transform_indices = @transform_4, window_bounds = array<i64: 1, 128>}, {pipeline_mode = #tpu.pipeline_mode<synchronous>, transform_indices = @transform_5, window_bounds = array<i64: 128, 384>}, {pipeline_mode = #tpu.pipeline_mode<synchronous>, transform_indices = @transform_6, window_bounds = array<i64: 1, 384>}, {pipeline_mode = #tpu.pipeline_mode<synchronous>, transform_indices = @transform_7, window_bounds = array<i64: 128, 128>}, {pipeline_mode = #tpu.pipeline_mode<synchronous>, transform_indices = @transform_8, window_bounds = array<i64: 1, 128>}, {pipeline_mode = #tpu.pipeline_mode<synchronous>, transform_indices = @transform_9, window_bounds = array<i64: 128, 512>}, {pipeline_mode = #tpu.pipeline_mode<synchronous>, transform_indices = @transform_10, window_bounds = array<i64: 1, 512>}, {pipeline_mode = #tpu.pipeline_mode<synchronous>, transform_indices = @transform_11, window_bounds = array<i64: 512, 128>}, {pipeline_mode = #tpu.pipeline_mode<synchronous>, transform_indices = @transform_12, window_bounds = array<i64: 1, 128>}, {transform_indices = @transform_13, window_bounds = array<i64: 2, 16, 128>}]} {
    %c0 = arith.constant 0 : index
    %c0_0 = arith.constant 0 : index
    %c0_1 = arith.constant 0 : index
    %0 = vector.load %arg1[%c0, %c0_0, %c0_1] : memref<2x16x128xf32, #tpu.memory_space<vmem>>, vector<2x16x128xf32>
    %1 = vector.shape_cast %0 : vector<2x16x128xf32> to vector<32x128xf32>
    %c0_2 = arith.constant 0 : index
    %c0_3 = arith.constant 0 : index
    %2 = vector.load %arg2[%c0_2, %c0_3] : memref<1x128xf32, #tpu.memory_space<vmem>>, vector<1x128xf32>
    %c0_4 = arith.constant 0 : index
    %c0_5 = arith.constant 0 : index
    %3 = vector.load %arg3[%c0_4, %c0_5] : memref<1x128xf32, #tpu.memory_space<vmem>>, vector<1x128xf32>
    %cst = arith.constant dense<0.000000e+00> : vector<32xf32>
    %4 = vector.multi_reduction <add>, %1, %cst [1] : vector<32x128xf32> to vector<32xf32>
    %5 = vector.shape_cast %4 : vector<32xf32> to vector<32x1xf32>
    %cst_6 = arith.constant 1.280000e+02 : f32
    %6 = vector.broadcast %cst_6 : f32 to vector<32x1xf32>
    %7 = arith.divf %5, %6 : vector<32x1xf32>
    %8 = vector.broadcast %7 : vector<32x1xf32> to vector<32x128xf32>
    %9 = arith.subf %1, %8 : vector<32x128xf32>
    %10 = arith.mulf %9, %9 : vector<32x128xf32>
    %cst_7 = arith.constant dense<0.000000e+00> : vector<32xf32>
    %11 = vector.multi_reduction <add>, %10, %cst_7 [1] : vector<32x128xf32> to vector<32xf32>
    %12 = vector.shape_cast %11 : vector<32xf32> to vector<32x1xf32>
    %cst_8 = arith.constant 1.280000e+02 : f32
    %13 = vector.broadcast %cst_8 : f32 to vector<32x1xf32>
    %14 = arith.divf %12, %13 : vector<32x1xf32>
    %15 = vector.broadcast %7 : vector<32x1xf32> to vector<32x128xf32>
    %16 = arith.subf %1, %15 : vector<32x128xf32>
    %cst_9 = arith.constant 9.99999974E-6 : f32
    %17 = vector.broadcast %cst_9 : f32 to vector<32x1xf32>
    %18 = arith.addf %14, %17 : vector<32x1xf32>
    %19 = math.rsqrt %18 : vector<32x1xf32>
    %20 = vector.broadcast %19 : vector<32x1xf32> to vector<32x128xf32>
    %21 = arith.mulf %16, %20 : vector<32x128xf32>
    %22 = vector.broadcast %2 : vector<1x128xf32> to vector<32x128xf32>
    %23 = arith.mulf %21, %22 : vector<32x128xf32>
    %24 = vector.broadcast %3 : vector<1x128xf32> to vector<32x128xf32>
    %25 = arith.addf %23, %24 : vector<32x128xf32>
    %26 = arith.truncf %25 : vector<32x128xf32> to vector<32x128xbf16>
    %c0_10 = arith.constant 0 : index
    %c0_11 = arith.constant 0 : index
    %27 = vector.load %arg6[%c0_10, %c0_11] : memref<128x384xbf16, #tpu.memory_space<vmem>>, vector<128x384xbf16>
    %cst_12 = arith.constant dense<0.000000e+00> : vector<32x384xf32>
    %28 = tpu.matmul %26, %27, %cst_12 {dimension_numbers = #tpu.dot_dimension_numbers<[1], [0], [0], [1], [0, 0, 1, 1], [], []>} : vector<32x128xbf16>, vector<128x384xbf16>, vector<32x384xf32> -> vector<32x384xf32>
    %c0_13 = arith.constant 0 : index
    %c0_14 = arith.constant 0 : index
    %29 = vector.load %arg7[%c0_13, %c0_14] : memref<1x384xf32, #tpu.memory_space<vmem>>, vector<1x384xf32>
    %30 = vector.broadcast %29 : vector<1x384xf32> to vector<32x384xf32>
    %31 = arith.addf %28, %30 : vector<32x384xf32>
    %32 = arith.truncf %31 : vector<32x384xf32> to vector<32x384xbf16>
    %33 = vector.extract_strided_slice %32 {offsets = [0, 0], sizes = [32, 128], strides = [1, 1]} : vector<32x384xbf16> to vector<32x128xbf16>
    %34 = vector.shape_cast %33 : vector<32x128xbf16> to vector<2x16x4x32xbf16>
    %35 = tpu.transpose %34, [0, 2, 1, 3] : vector<2x16x4x32xbf16> -> vector<2x4x16x32xbf16>
    %36 = vector.shape_cast %35 : vector<2x4x16x32xbf16> to vector<8x16x32xbf16>
    %37 = vector.extract_strided_slice %32 {offsets = [0, 128], sizes = [32, 128], strides = [1, 1]} : vector<32x384xbf16> to vector<32x128xbf16>
    %38 = vector.shape_cast %37 : vector<32x128xbf16> to vector<2x16x4x32xbf16>
    %39 = tpu.transpose %38, [0, 2, 1, 3] : vector<2x16x4x32xbf16> -> vector<2x4x16x32xbf16>
    %40 = vector.shape_cast %39 : vector<2x4x16x32xbf16> to vector<8x16x32xbf16>
    %41 = vector.extract_strided_slice %32 {offsets = [0, 256], sizes = [32, 128], strides = [1, 1]} : vector<32x384xbf16> to vector<32x128xbf16>
    %42 = vector.shape_cast %41 : vector<32x128xbf16> to vector<2x16x4x32xbf16>
    %43 = tpu.transpose %42, [0, 2, 1, 3] : vector<2x16x4x32xbf16> -> vector<2x4x16x32xbf16>
    %44 = vector.shape_cast %43 : vector<2x4x16x32xbf16> to vector<8x16x32xbf16>
    "tpu.trace_start"() <{level = 10 : i32, message = "gtd,gsd->gts"}> : () -> ()
    %cst_15 = arith.constant dense<0.000000e+00> : vector<8x16x16xf32>
    %45 = tpu.matmul %36, %40, %cst_15 {dimension_numbers = #tpu.dot_dimension_numbers<[2], [2], [1], [1], [0, 0, 0, 1, 1, 1], [0], [0]>} : vector<8x16x32xbf16>, vector<8x16x32xbf16>, vector<8x16x16xf32> -> vector<8x16x16xf32>
    "tpu.trace_stop"() : () -> ()
    %46 = tpu.iota {dimensions = array<i32: 0>} : vector<16x16xi32>
    %47 = tpu.iota {dimensions = array<i32: 1>} : vector<16x16xi32>
    %48 = arith.cmpi sge, %46, %47 : vector<16x16xi32>
    %cst_16 = arith.constant -1.000000e+30 : f32
    %49 = vector.shape_cast %48 : vector<16x16xi1> to vector<1x16x16xi1>
    %50 = vector.broadcast %49 : vector<1x16x16xi1> to vector<8x16x16xi1>
    %51 = vector.broadcast %cst_16 : f32 to vector<8x16x16xf32>
    %52 = arith.select %50, %45, %51 : vector<8x16x16xi1>, vector<8x16x16xf32>
    %cst_17 = arith.constant dense<0xFF800000> : vector<8x16xf32>
    %53 = vector.multi_reduction <maximumf>, %52, %cst_17 [2] : vector<8x16x16xf32> to vector<8x16xf32>
    %54 = vector.shape_cast %53 : vector<8x16xf32> to vector<8x16x1xf32>
    %55 = vector.broadcast %54 : vector<8x16x1xf32> to vector<8x16x16xf32>
    %56 = arith.subf %52, %55 : vector<8x16x16xf32>
    %57 = math.exp %56 : vector<8x16x16xf32>
    %cst_18 = arith.constant dense<0.000000e+00> : vector<8x16xf32>
    %58 = vector.multi_reduction <add>, %57, %cst_18 [2] : vector<8x16x16xf32> to vector<8x16xf32>
    %59 = vector.shape_cast %58 : vector<8x16xf32> to vector<8x16x1xf32>
    %60 = tpu.reciprocal %59 {approx = true} : vector<8x16x1xf32> -> vector<8x16x1xf32>
    %61 = vector.broadcast %60 : vector<8x16x1xf32> to vector<8x16x16xf32>
    %62 = arith.mulf %57, %61 : vector<8x16x16xf32>
    %63 = arith.truncf %62 : vector<8x16x16xf32> to vector<8x16x16xbf16>
    "tpu.trace_start"() <{level = 10 : i32, message = "gts,gsd->gtd"}> : () -> ()
    %cst_19 = arith.constant dense<0.000000e+00> : vector<8x16x32xf32>
    %64 = tpu.matmul %63, %44, %cst_19 {dimension_numbers = #tpu.dot_dimension_numbers<[2], [1], [1], [2], [0, 0, 0, 1, 1, 2], [0], [0]>} : vector<8x16x16xbf16>, vector<8x16x32xbf16>, vector<8x16x32xf32> -> vector<8x16x32xf32>
    "tpu.trace_stop"() : () -> ()
    %65 = arith.truncf %64 : vector<8x16x32xf32> to vector<8x16x32xbf16>
    %66 = vector.shape_cast %65 : vector<8x16x32xbf16> to vector<2x4x16x32xbf16>
    %67 = tpu.transpose %66, [0, 2, 1, 3] : vector<2x4x16x32xbf16> -> vector<2x16x4x32xbf16>
    %68 = vector.shape_cast %67 : vector<2x16x4x32xbf16> to vector<32x128xbf16>
    %c0_20 = arith.constant 0 : index
    %c0_21 = arith.constant 0 : index
    %69 = vector.load %arg8[%c0_20, %c0_21] : memref<128x128xbf16, #tpu.memory_space<vmem>>, vector<128x128xbf16>
    %cst_22 = arith.constant dense<0.000000e+00> : vector<32x128xf32>
    %70 = tpu.matmul %68, %69, %cst_22 {dimension_numbers = #tpu.dot_dimension_numbers<[1], [0], [0], [1], [0, 0, 1, 1], [], []>} : vector<32x128xbf16>, vector<128x128xbf16>, vector<32x128xf32> -> vector<32x128xf32>
    %c0_23 = arith.constant 0 : index
    %c0_24 = arith.constant 0 : index
    %71 = vector.load %arg9[%c0_23, %c0_24] : memref<1x128xf32, #tpu.memory_space<vmem>>, vector<1x128xf32>
    %72 = vector.broadcast %71 : vector<1x128xf32> to vector<32x128xf32>
    %73 = arith.addf %70, %72 : vector<32x128xf32>
    %74 = arith.addf %1, %73 : vector<32x128xf32>
    %c0_25 = arith.constant 0 : index
    %c0_26 = arith.constant 0 : index
    %75 = vector.load %arg4[%c0_25, %c0_26] : memref<1x128xf32, #tpu.memory_space<vmem>>, vector<1x128xf32>
    %c0_27 = arith.constant 0 : index
    %c0_28 = arith.constant 0 : index
    %76 = vector.load %arg5[%c0_27, %c0_28] : memref<1x128xf32, #tpu.memory_space<vmem>>, vector<1x128xf32>
    %cst_29 = arith.constant dense<0.000000e+00> : vector<32xf32>
    %77 = vector.multi_reduction <add>, %74, %cst_29 [1] : vector<32x128xf32> to vector<32xf32>
    %78 = vector.shape_cast %77 : vector<32xf32> to vector<32x1xf32>
    %cst_30 = arith.constant 1.280000e+02 : f32
    %79 = vector.broadcast %cst_30 : f32 to vector<32x1xf32>
    %80 = arith.divf %78, %79 : vector<32x1xf32>
    %81 = vector.broadcast %80 : vector<32x1xf32> to vector<32x128xf32>
    %82 = arith.subf %74, %81 : vector<32x128xf32>
    %83 = arith.mulf %82, %82 : vector<32x128xf32>
    %cst_31 = arith.constant dense<0.000000e+00> : vector<32xf32>
    %84 = vector.multi_reduction <add>, %83, %cst_31 [1] : vector<32x128xf32> to vector<32xf32>
    %85 = vector.shape_cast %84 : vector<32xf32> to vector<32x1xf32>
    %cst_32 = arith.constant 1.280000e+02 : f32
    %86 = vector.broadcast %cst_32 : f32 to vector<32x1xf32>
    %87 = arith.divf %85, %86 : vector<32x1xf32>
    %88 = vector.broadcast %80 : vector<32x1xf32> to vector<32x128xf32>
    %89 = arith.subf %74, %88 : vector<32x128xf32>
    %cst_33 = arith.constant 9.99999974E-6 : f32
    %90 = vector.broadcast %cst_33 : f32 to vector<32x1xf32>
    %91 = arith.addf %87, %90 : vector<32x1xf32>
    %92 = math.rsqrt %91 : vector<32x1xf32>
    %93 = vector.broadcast %92 : vector<32x1xf32> to vector<32x128xf32>
    %94 = arith.mulf %89, %93 : vector<32x128xf32>
    %95 = vector.broadcast %75 : vector<1x128xf32> to vector<32x128xf32>
    %96 = arith.mulf %94, %95 : vector<32x128xf32>
    %97 = vector.broadcast %76 : vector<1x128xf32> to vector<32x128xf32>
    %98 = arith.addf %96, %97 : vector<32x128xf32>
    %99 = arith.truncf %98 : vector<32x128xf32> to vector<32x128xbf16>
    %c0_34 = arith.constant 0 : index
    %c0_35 = arith.constant 0 : index
    %100 = vector.load %arg10[%c0_34, %c0_35] : memref<128x512xbf16, #tpu.memory_space<vmem>>, vector<128x512xbf16>
    %cst_36 = arith.constant dense<0.000000e+00> : vector<32x512xf32>
    %101 = tpu.matmul %99, %100, %cst_36 {dimension_numbers = #tpu.dot_dimension_numbers<[1], [0], [0], [1], [0, 0, 1, 1], [], []>} : vector<32x128xbf16>, vector<128x512xbf16>, vector<32x512xf32> -> vector<32x512xf32>
    %c0_37 = arith.constant 0 : index
    %c0_38 = arith.constant 0 : index
    %102 = vector.load %arg11[%c0_37, %c0_38] : memref<1x512xf32, #tpu.memory_space<vmem>>, vector<1x512xf32>
    %103 = vector.broadcast %102 : vector<1x512xf32> to vector<32x512xf32>
    %104 = arith.addf %101, %103 : vector<32x512xf32>
    %cst_39 = arith.constant 5.000000e-01 : f32
    %105 = vector.broadcast %cst_39 : f32 to vector<32x512xf32>
    %106 = arith.mulf %105, %104 : vector<32x512xf32>
    %cst_40 = arith.constant 4.471500e-02 : f32
    %107 = vector.broadcast %cst_40 : f32 to vector<32x512xf32>
    %108 = arith.mulf %107, %104 : vector<32x512xf32>
    %109 = arith.mulf %108, %104 : vector<32x512xf32>
    %110 = arith.mulf %109, %104 : vector<32x512xf32>
    %111 = arith.addf %104, %110 : vector<32x512xf32>
    %cst_41 = arith.constant 0.797884583 : f32
    %112 = vector.broadcast %cst_41 : f32 to vector<32x512xf32>
    %113 = arith.mulf %112, %111 : vector<32x512xf32>
    %114 = math.tanh %113 : vector<32x512xf32>
    %cst_42 = arith.constant 1.000000e+00 : f32
    %115 = vector.broadcast %cst_42 : f32 to vector<32x512xf32>
    %116 = arith.addf %115, %114 : vector<32x512xf32>
    %117 = arith.mulf %106, %116 : vector<32x512xf32>
    %118 = arith.truncf %117 : vector<32x512xf32> to vector<32x512xbf16>
    %c0_43 = arith.constant 0 : index
    %c0_44 = arith.constant 0 : index
    %119 = vector.load %arg12[%c0_43, %c0_44] : memref<512x128xbf16, #tpu.memory_space<vmem>>, vector<512x128xbf16>
    %cst_45 = arith.constant dense<0.000000e+00> : vector<32x128xf32>
    %120 = tpu.matmul %118, %119, %cst_45 {dimension_numbers = #tpu.dot_dimension_numbers<[1], [0], [0], [1], [0, 0, 1, 1], [], []>} : vector<32x512xbf16>, vector<512x128xbf16>, vector<32x128xf32> -> vector<32x128xf32>
    %c0_46 = arith.constant 0 : index
    %c0_47 = arith.constant 0 : index
    %121 = vector.load %arg13[%c0_46, %c0_47] : memref<1x128xf32, #tpu.memory_space<vmem>>, vector<1x128xf32>
    %122 = vector.broadcast %121 : vector<1x128xf32> to vector<32x128xf32>
    %123 = arith.addf %120, %122 : vector<32x128xf32>
    %124 = arith.addf %74, %123 : vector<32x128xf32>
    %125 = vector.shape_cast %124 : vector<32x128xf32> to vector<2x16x128xf32>
    %c0_48 = arith.constant 0 : index
    %c0_49 = arith.constant 0 : index
    %c0_50 = arith.constant 0 : index
    %126 = vector.load %arg14[%c0_48, %c0_49, %c0_50] : memref<2x16x128xf32, #tpu.memory_space<vmem>>, vector<2x16x128xf32>
    tpu.vector_store %arg14[%c0_48, %c0_49, %c0_50], %125 {strides = array<i32>} : memref<2x16x128xf32, #tpu.memory_space<vmem>>, vector<2x16x128xf32>,
    return
  }
  func.func @transform_0(%arg0: i32) -> (i32, i32, i32) {
    %c0_i32 = arith.constant 0 : i32
    %c0_i32_0 = arith.constant 0 : i32
    %c0_i32_1 = arith.constant 0 : i32
    return %arg0, %c0_i32, %c0_i32_0 : i32, i32, i32
  }
  func.func @transform_1(%arg0: i32) -> (i32, i32) {
    %c0_i32 = arith.constant 0 : i32
    %c0_i32_0 = arith.constant 0 : i32
    %c0_i32_1 = arith.constant 0 : i32
    return %c0_i32, %c0_i32_0 : i32, i32
  }
  func.func @transform_2(%arg0: i32) -> (i32, i32) {
    %c0_i32 = arith.constant 0 : i32
    %c0_i32_0 = arith.constant 0 : i32
    %c0_i32_1 = arith.constant 0 : i32
    return %c0_i32, %c0_i32_0 : i32, i32
  }
  func.func @transform_3(%arg0: i32) -> (i32, i32) {
    %c0_i32 = arith.constant 0 : i32
    %c0_i32_0 = arith.constant 0 : i32
    %c0_i32_1 = arith.constant 0 : i32
    return %c0_i32, %c0_i32_0 : i32, i32
  }
  func.func @transform_4(%arg0: i32) -> (i32, i32) {
    %c0_i32 = arith.constant 0 : i32
    %c0_i32_0 = arith.constant 0 : i32
    %c0_i32_1 = arith.constant 0 : i32
    return %c0_i32, %c0_i32_0 : i32, i32
  }
  func.func @transform_5(%arg0: i32) -> (i32, i32) {
    %c0_i32 = arith.constant 0 : i32
    %c0_i32_0 = arith.constant 0 : i32
    %c0_i32_1 = arith.constant 0 : i32
    return %c0_i32, %c0_i32_0 : i32, i32
  }
  func.func @transform_6(%arg0: i32) -> (i32, i32) {
    %c0_i32 = arith.constant 0 : i32
    %c0_i32_0 = arith.constant 0 : i32
    %c0_i32_1 = arith.constant 0 : i32
    return %c0_i32, %c0_i32_0 : i32, i32
  }
  func.func @transform_7(%arg0: i32) -> (i32, i32) {
    %c0_i32 = arith.constant 0 : i32
    %c0_i32_0 = arith.constant 0 : i32
    %c0_i32_1 = arith.constant 0 : i32
    return %c0_i32, %c0_i32_0 : i32, i32
  }
  func.func @transform_8(%arg0: i32) -> (i32, i32) {
    %c0_i32 = arith.constant 0 : i32
    %c0_i32_0 = arith.constant 0 : i32
    %c0_i32_1 = arith.constant 0 : i32
    return %c0_i32, %c0_i32_0 : i32, i32
  }
  func.func @transform_9(%arg0: i32) -> (i32, i32) {
    %c0_i32 = arith.constant 0 : i32
    %c0_i32_0 = arith.constant 0 : i32
    %c0_i32_1 = arith.constant 0 : i32
    return %c0_i32, %c0_i32_0 : i32, i32
  }
  func.func @transform_10(%arg0: i32) -> (i32, i32) {
    %c0_i32 = arith.constant 0 : i32
    %c0_i32_0 = arith.constant 0 : i32
    %c0_i32_1 = arith.constant 0 : i32
    return %c0_i32, %c0_i32_0 : i32, i32
  }
  func.func @transform_11(%arg0: i32) -> (i32, i32) {
    %c0_i32 = arith.constant 0 : i32
    %c0_i32_0 = arith.constant 0 : i32
    %c0_i32_1 = arith.constant 0 : i32
    return %c0_i32, %c0_i32_0 : i32, i32
  }
  func.func @transform_12(%arg0: i32) -> (i32, i32) {
    %c0_i32 = arith.constant 0 : i32
    %c0_i32_0 = arith.constant 0 : i32
    %c0_i32_1 = arith.constant 0 : i32
    return %c0_i32, %c0_i32_0 : i32, i32
  }
  func.func @transform_13(%arg0: i32) -> (i32, i32, i32) {
    %c0_i32 = arith.constant 0 : i32
    %c0_i32_0 = arith.constant 0 : i32
    %c0_i32_1 = arith.constant 0 : i32
    return %arg0, %c0_i32, %c0_i32_0 : i32, i32, i32
  }
}

</mosaic_0001>

<bundles_post_ra>
// kernel: tpu_custom_call.1
= control target key start
LH: loop header
LB: loop body
LE: loop exit
PB: predicated region body
PF: predicated region fallthrough
CT: control target
= control target key end

     0   :  { %18 = vsyncpa [#allocation3], 0  ;;  %s6681_s0 = inlined_call_operand.hbm [shape: f32[2,16,128], index: 0, kind: input, shape index: {}]   ;;  %s6682_s1 = inlined_call_operand.hbm [shape: f32[1,128], index: 1, kind: input, shape index: {}]   ;;  %s6683_s2 = inlined_call_operand.hbm [shape: f32[1,128], index: 2, kind: input, shape index: {}]   ;;  %s6684_s3 = inlined_call_operand.vmem [shape: f32[1,128], index: 3, kind: input, shape index: {}]   ;;  %s6685_s4 = inlined_call_operand.vmem [shape: f32[1,128], index: 4, kind: input, shape index: {}]   ;;  %s6686_s5 = inlined_call_operand.hbm [shape: bf16[128,384], index: 5, kind: input, shape index: {}]   ;;  %s6687_s6 = inlined_call_operand.vmem [shape: f32[1,384], index: 6, kind: input, shape index: {}]   ;;  %s6688_s7 = inlined_call_operand.hbm [shape: bf16[128,128], index: 7, kind: input, shape index: {}]   ;;  %s6689_s8 = inlined_call_operand.vmem [shape: f32[1,128], index: 8, kind: input, shape index: {}]   ;;  %s6690_s9 = inlined_call_operand.hbm [shape: bf16[128,512], index: 9, kind: input, shape index: {}]   ;;  %s6691_s10 = inlined_call_operand.vmem [shape: f32[1,512], index: 10, kind: input, shape index: {}]   ;;  %s6692_s11 = inlined_call_operand.hbm [shape: bf16[512,128], index: 11, kind: input, shape index: {}]   ;;  %s6693_s12 = inlined_call_operand.vmem [shape: f32[1,128], index: 12, kind: input, shape index: {}]   ;;  %s6694_s13 = inlined_call_operand.hbm [shape: f32[2,16,128], index: 13, kind: output, shape index: {}]  }
   0x1   :  { %19 = vsyncpa [#allocation6], 0 }
   0x2   :  { %20 = vsyncpa [#allocation9], 0 }
   0x3   :  { %21 = vsyncpa [#allocation12], 0 }
   0x4   :  { %22 = vsyncpa [#allocation4], 0  ;;  %s5502_s25 = smov [#allocation5]   ;;  %s5503_s27 = smov [#allocation8]  }
   0x5   :  { %s41_s26 = sshll.u32 %s5502_s25, 4  ;;  %s64_s28 = sshll.u32 %s5503_s27, 4  ;;  %s42_s26 = int_to_ptr.vmem [resolvable:$true] %s41_s26  ;;  %s5595_s28 = int_to_ptr.vmem [resolvable:$true] %s64_s28 }
   0x6   :  { %s5316_s14 = scalar_lea.hbm %s6682_s1, 16 }
   0x7   :  { %p5317_p0 = scmp.ne.s32.totalorder %s6682_s1, %s5316_s14  ;;  %p5320_p1 = scmp.lt.u32.totalorder %s5316_s14, %s6682_s1 }
   0x9   :  { %p5322_p2 = pnand %p5320_p1, %p5317_p0 }
   0xb   :  { %5325 = shalt.err (!%p5322_p2)
}
   0xc   :  { %s5326_s19 = scalar_lea.vmem %s42_s26, 16  ;;  %s5330_s20 = scalar_lea.vmem %s42_s26, 32 }
   0xd   :  { %p5327_p3 = scmp.ne.s32.totalorder %s42_s26, %s5326_s19  ;;  %p5331_p4 = scmp.lt.s32.totalorder %s42_s26, %s42_s26 }
   0xe   :  { %p5332_p5 = scmp.lt.s32.totalorder %s5330_s20, %s5326_s19 }
  0x10   :  { %p5333_p6 = por %p5332_p5, %p5331_p4 }
  0x12   :  { %p5334_p7 = pnand %p5333_p6, %p5327_p3 }
  0x14   :  { %5337 = shalt.err (!%p5334_p7)
}
  0x15   :  { %44 = dma.hbm_to_vmem [thread:$0]  %s6682_s1, 16, %s42_s26, [#allocation6]  }
  0x16   :  { %s5338_s25 = scalar_lea.hbm %s6686_s5, 3072 }
  0x17   :  { %p5339_p8 = scmp.ne.s32.totalorder %s6686_s5, %s5338_s25  ;;  %p5342_p9 = scmp.lt.u32.totalorder %s5338_s25, %s6686_s5 }
  0x19   :  { %p5344_p10 = pnand %p5342_p9, %p5339_p8 }
  0x1b   :  { %5347 = shalt.err (!%p5344_p10)
}
  0x1c   :  { %s5348_s15 = scalar_lea.vmem %s5595_s28, 3072  ;;  %p5353_p12 = scmp.lt.s32.totalorder %s5595_s28, %s5595_s28 }
  0x1d   :  { %p5349_p11 = scmp.ne.s32.totalorder %s5595_s28, %s5348_s15  ;;  %p5354_p13 = scmp.lt.s32.totalorder %s5348_s15, %s5348_s15 }
  0x1f   :  { %p5355_p0 = por %p5354_p13, %p5353_p12 }
  0x21   :  { %p5356_p1 = pnand %p5355_p0, %p5349_p11 }
  0x23   :  { %5359 = shalt.err (!%p5356_p1)
}
  0x24   :  { %s5504_s1 = smov 192   ;;  %s5505_s26 = smov 12  }
  0x25   :  { %70 = dma.hbm_to_vmem [thread:$0]  %s6686_s5, 3072, %s5595_s28, [#allocation9], %s5504_s1, %s5504_s1, %s5505_s26  }
  0x26   :  { %s5506_s18 = smov [#allocation11]   ;;  %s5360_s22 = scalar_lea.hbm %s6690_s9, 4096 }
  0x27   :  { %s92_s19 = sshll.u32 %s5506_s18, 4  ;;  %p5361_p2 = scmp.ne.s32.totalorder %s6690_s9, %s5360_s22  ;;  %s93_s19 = int_to_ptr.vmem [resolvable:$true] %s92_s19 }
  0x28   :  { %p5364_p3 = scmp.lt.u32.totalorder %s5360_s22, %s6690_s9 }
  0x2a   :  { %p5366_p4 = pnand %p5364_p3, %p5361_p2 }
  0x2c   :  { %5369 = shalt.err (!%p5366_p4)
}
  0x2d   :  { %s5370_s29 = scalar_lea.vmem %s93_s19, 4096  ;;  %p5375_p6 = scmp.lt.s32.totalorder %s93_s19, %s93_s19 }
  0x2e   :  { %p5371_p5 = scmp.ne.s32.totalorder %s93_s19, %s5370_s29  ;;  %p5376_p7 = scmp.lt.s32.totalorder %s5370_s29, %s5370_s29 }
  0x30   :  { %p5377_p8 = por %p5376_p7, %p5375_p6 }
  0x32   :  { %p5378_p9 = pnand %p5377_p8, %p5371_p5 }
  0x34   :  { %5381 = shalt.err (!%p5378_p9)
}
  0x35   :  { %s5507_s5 = smov 256   ;;  %s5508_s28 = smov 16  }
  0x36   :  { %98 = dma.hbm_to_vmem [thread:$0]  %s6690_s9, 4096, %s93_s19, [#allocation12], %s5507_s5, %s5507_s5, %s5508_s28  }
  0x37   :  { %s5509_s15 = smov [#allocation2]   ;;  %s5382_s17 = scalar_lea.hbm %s6681_s0, 512 }
  0x38   :  { %s28_s1 = sshll.u32 %s5509_s15, 4  ;;  %p5383_p10 = scmp.ne.s32.totalorder %s6681_s0, %s5382_s17  ;;  %s29_s1 = int_to_ptr.vmem [resolvable:$true] %s28_s1 }
  0x39   :  { %p5386_p11 = scmp.lt.u32.totalorder %s5382_s17, %s6681_s0 }
  0x3b   :  { %p5388_p12 = pnand %p5386_p11, %p5383_p10 }
  0x3d   :  { %5391 = shalt.err (!%p5388_p12)
}
  0x3e   :  { %s5392_s23 = scalar_lea.vmem %s29_s1, 512  ;;  %p5397_p0 = scmp.lt.s32.totalorder %s29_s1, %s29_s1 }
  0x3f   :  { %p5393_p13 = scmp.ne.s32.totalorder %s29_s1, %s5392_s23  ;;  %p5398_p1 = scmp.lt.s32.totalorder %s5392_s23, %s5392_s23 }
  0x41   :  { %p5399_p2 = por %p5398_p1, %p5397_p0 }
  0x43   :  { %p5400_p3 = pnand %p5399_p2, %p5393_p13 }
  0x45   :  { %5403 = shalt.err (!%p5400_p3)
}
  0x46   :  { %s5510_s9 = smov 128   ;;  %s5511_s19 = smov 8  }
  0x47   :  { %34 = dma.hbm_to_vmem [thread:$0]  %s6681_s0, 512, %s29_s1, [#allocation3], %s5510_s9, %s5510_s9, %s5511_s19  }
  0x48   :  { %s5512_s27 = smov [#allocation7]   ;;  %s5513_s5 = smov [#allocation10]  }
  0x49   :  { %s51_s29 = sshll.u32 %s5512_s27, 4  ;;  %s78_s28 = sshll.u32 %s5513_s5, 4  ;;  %s52_s29 = int_to_ptr.vmem [resolvable:$true] %s51_s29  ;;  %s5653_s28 = int_to_ptr.vmem [resolvable:$true] %s78_s28 }
  0x4a   :  { %s5404_s15 = scalar_lea.hbm %s6683_s2, 16 }
  0x4b   :  { %p5405_p4 = scmp.ne.s32.totalorder %s6683_s2, %s5404_s15  ;;  %p5408_p5 = scmp.lt.u32.totalorder %s5404_s15, %s6683_s2 }
  0x4d   :  { %p5410_p6 = pnand %p5408_p5, %p5405_p4 }
  0x4f   :  { %5413 = shalt.err (!%p5410_p6)
}
  0x50   :  { %s5414_s0 = scalar_lea.vmem %s52_s29, 16  ;;  %s5418_s1 = scalar_lea.vmem %s52_s29, 32 }
  0x51   :  { %p5415_p7 = scmp.ne.s32.totalorder %s52_s29, %s5414_s0  ;;  %p5419_p8 = scmp.lt.s32.totalorder %s52_s29, %s52_s29 }
  0x52   :  { %p5420_p9 = scmp.lt.s32.totalorder %s5418_s1, %s5414_s0 }
  0x54   :  { %p5421_p10 = por %p5420_p9, %p5419_p8 }
  0x56   :  { %p5422_p11 = pnand %p5421_p10, %p5415_p7 }
  0x58   :  { %5425 = shalt.err (!%p5422_p11)
}
  0x59   :  { %54 = dma.hbm_to_vmem [thread:$0]  %s6683_s2, 16, %s52_s29, [#allocation6]  }
  0x5a   :  { %s5426_s24 = scalar_lea.hbm %s6688_s7, 1024 }
  0x5b   :  { %p5427_p12 = scmp.ne.s32.totalorder %s6688_s7, %s5426_s24  ;;  %p5430_p13 = scmp.lt.u32.totalorder %s5426_s24, %s6688_s7 }
  0x5d   :  { %p5432_p0 = pnand %p5430_p13, %p5427_p12 }
  0x5f   :  { %5435 = shalt.err (!%p5432_p0)
}
  0x60   :  { %s5436_s14 = scalar_lea.vmem %s5653_s28, 1024  ;;  %p5441_p2 = scmp.lt.s32.totalorder %s5653_s28, %s5653_s28 }
  0x61   :  { %p5437_p1 = scmp.ne.s32.totalorder %s5653_s28, %s5436_s14  ;;  %p5442_p3 = scmp.lt.s32.totalorder %s5436_s14, %s5436_s14 }
  0x63   :  { %p5443_p4 = por %p5442_p3, %p5441_p2 }
  0x65   :  { %p5444_p5 = pnand %p5443_p4, %p5437_p1 }
  0x67   :  { %5447 = shalt.err (!%p5444_p5)
}
  0x68   :  { %s5514_s2 = smov 64   ;;  %s5515_s29 = smov 4  }
  0x69   :  { %84 = dma.hbm_to_vmem [thread:$0]  %s6688_s7, 1024, %s5653_s28, [#allocation9], %s5514_s2, %s5514_s2, %s5515_s29  }
  0x6a   :  { %s5516_s16 = smov [#allocation13]   ;;  %s5448_s1 = scalar_lea.hbm %s6692_s11, 4096 }
  0x6b   :  { %s106_s17 = sshll.u32 %s5516_s16, 4  ;;  %p5449_p6 = scmp.ne.s32.totalorder %s6692_s11, %s5448_s1  ;;  %s107_s17 = int_to_ptr.vmem [resolvable:$true] %s106_s17 }
  0x6c   :  { %p5452_p7 = scmp.lt.u32.totalorder %s5448_s1, %s6692_s11 }
  0x6e   :  { %p5454_p8 = pnand %p5452_p7, %p5449_p6 }
  0x70   :  { %5457 = shalt.err (!%p5454_p8)
}
  0x71   :  { %s5458_s24 = scalar_lea.vmem %s107_s17, 4096  ;;  %p5463_p10 = scmp.lt.s32.totalorder %s107_s17, %s107_s17 }
  0x72   :  { %p5459_p9 = scmp.ne.s32.totalorder %s107_s17, %s5458_s24  ;;  %p5464_p11 = scmp.lt.s32.totalorder %s5458_s24, %s5458_s24 }
  0x74   :  { %p5465_p12 = por %p5464_p11, %p5463_p10 }
  0x76   :  { %p5466_p13 = pnand %p5465_p12, %p5459_p9 }
  0x78   :  { %5469 = shalt.err (!%p5466_p13)
}
  0x79   :  { %112 = dma.hbm_to_vmem [thread:$0]  %s6692_s11, 4096, %s107_s17, [#allocation12], %s5514_s2, %s5514_s2, %s5515_s29  }
  0x7a   :  { %5492 = dma.done.wait [#allocation3], 512  }
  0x7b   :  { %5493 = vsyncadd [#allocation3], 4294966784 }
  0x7c   :  { %5494 = dma.done.wait [#allocation6], 32  }
  0x7d   :  { %5495 = vsyncadd [#allocation6], 4294967264 }
  0x7e   :  { %5496 = dma.done.wait [#allocation9], 4096  }
  0x7f   :  { %5497 = vsyncadd [#allocation9], 4294963200 }
  0x80   :  { %5498 = dma.done.wait [#allocation12], 8192  }
  0x81   :  { %5499 = vsyncadd [#allocation12], 4294959104  ;;  %v137_v0 = vld [vmem:[#allocation2] sm:$0xff]  ;;  %v139_v1 = vld [vmem:[#allocation2 + $0x10] sm:$0xff]  ;;  %v5517_v39 = vmov 0   ;;  %s5519_s27 = smov 32  }
  0x82   :  { %v138_v2 = vld [vmem:[#allocation2 + $0x8] sm:$0xff]  ;;  %143 = vadd.xlane.f32.xlu0 %v137_v0  ;;  %147 = vadd.xlane.f32.xlu1 %v139_v1  ;;  %v140_v3 = vld [vmem:[#allocation2 + $0x18] sm:$0xff]  ;;  %v5082_v5 = vld [vmem:[#allocation8] ss:$12 sps:$4 sm:$0xff]   ;;  %vm5521_vm0 = vmmov 0   ;;  %vm2111_vm1 = vcmask 261120  }
  0x83   :  { %v5080_v4 = vld [vmem:[#allocation8 + $0x4] ss:$12 sps:$4 sm:$0xff]   ;;  %v5083_v6 = vld [vmem:[#allocation8 + $0x1c] ss:$12 sps:$4 sm:$0xff]   ;;  %v5087_v25 = vld [vmem:[#allocation8 + $0x34] ss:$12 sps:$4 sm:$0xff]   ;;  %419 = vmatprep.mubr.bf16.mxu0 %v5517_v39 }
  0x84   :  { %v5085_v7 = vld [vmem:[#allocation8 + $0x8] ss:$12 sps:$4 sm:$0xff]   ;;  %387 = vmatprep.subr.bf16.mxu0 %v5080_v4  ;;  %v5086_v24 = vld [vmem:[#allocation8 + $0x18] ss:$12 sps:$4 sm:$0xff]   ;;  %v5089_v26 = vld [vmem:[#allocation8 + $0x20] ss:$12 sps:$4 sm:$0xff]  }
  0x85   :  { %388 = vmatpush1.bf16.msra.mxu0 %v5082_v5  ;;  %4921 = vmatprep.subr.bf16.mxu1 %v5085_v7  ;;  %v5090_v27 = vld [vmem:[#allocation8 + $0x30] ss:$12 sps:$4 sm:$0xff]   ;;  %v5091_v28 = vld [vmem:[#allocation8 + $0x4c] ss:$12 sps:$4 sm:$0xff]   ;;  %v5094_v30 = vld [vmem:[#allocation8 + $0x48] ss:$12 sps:$4 sm:$0xff]  }
  0x86   :  { %145 = vadd.xlane.f32.xlu0 %v138_v2  ;;  %149 = vadd.xlane.f32.xlu1 %v140_v3  ;;  %v5093_v29 = vld [vmem:[#allocation8 + $0x38] ss:$12 sps:$4 sm:$0xff]   ;;  %v5097_v32 = vld [vmem:[#allocation8 + $0x50] ss:$12 sps:$4 sm:$0xff]   ;;  %v5098_v33 = vld [vmem:[#allocation8 + $0x60] ss:$12 sps:$4 sm:$0xff]  }
  0x87   :  { %389 = vmatprep.subr.bf16.mxu0 %v5083_v6  ;;  %4922 = vmatpush3.bf16.msra.mxu1 %v5085_v7  ;;  %v5095_v31 = vld [vmem:[#allocation8 + $0x64] ss:$12 sps:$4 sm:$0xff]   ;;  %v5099_v34 = vld [vmem:[#allocation8 + $0x7c] ss:$12 sps:$4 sm:$0xff]   ;;  %v5103_v37 = vld [vmem:[#allocation8 + $0x94] ss:$12 sps:$4 sm:$0xff]  }
  0x88   :  { %4923 = vmatprep.subr.bf16.mxu1 %v5089_v26  ;;  %v5101_v35 = vld [vmem:[#allocation8 + $0x68] ss:$12 sps:$4 sm:$0xff]   ;;  %v5102_v36 = vld [vmem:[#allocation8 + $0x78] ss:$12 sps:$4 sm:$0xff]   ;;  %v5105_v38 = vld [vmem:[#allocation8 + $0x80] ss:$12 sps:$4 sm:$0xff]  }
  0x89   :  { %390 = vmatpush1.bf16.msra.mxu0 %v5086_v24  ;;  %v5106_v40 = vld [vmem:[#allocation8 + $0x90] ss:$12 sps:$4 sm:$0xff]   ;;  %v5107_v41 = vld [vmem:[#allocation8 + $0xac] ss:$12 sps:$4 sm:$0xff]   ;;  %v5110_v43 = vld [vmem:[#allocation8 + $0xa8] ss:$12 sps:$4 sm:$0xff]  }
  0x8a   :  { %391 = vmatprep.subr.bf16.mxu0 %v5087_v25  ;;  %v5109_v42 = vld [vmem:[#allocation8 + $0x98] ss:$12 sps:$4 sm:$0xff]   ;;  %v5111_v44 = vld [vmem:[#allocation8 + $0xb0] ss:$12 sps:$4 sm:$0xff]   ;;  %vm2515_vm3 = vcmask 130048   ;;  %vm3598_vm5 = vcmask 523264  }
  0x8b   :  { %4924 = vmatpush3.bf16.msra.mxu1 %v5089_v26  ;;  %v4663_v59 = vld [vmem:[#allocation5] ss:$0 sm:$0xff]  ;;  %vm3603_vm6 = vcmask 785408  }
  0x8c   :  { %4925 = vmatprep.subr.bf16.mxu1 %v5093_v29 }
  0x8d   :  { %392 = vmatpush1.bf16.msra.mxu0 %v5090_v27 }
  0x8e   :  { %393 = vmatprep.subr.bf16.mxu0 %v5091_v28 }
  0x8f   :  { %4926 = vmatpush3.bf16.msra.mxu1 %v5093_v29 }
  0x90   :  { %4927 = vmatprep.subr.bf16.mxu1 %v5097_v32 }
  0x91   :  { %394 = vmatpush1.bf16.msra.mxu0 %v5094_v30 }
  0x92   :  { %395 = vmatprep.subr.bf16.mxu0 %v5095_v31 }
  0x93   :  { %4928 = vmatpush3.bf16.msra.mxu1 %v5097_v32 }
  0x94   :  { %4929 = vmatprep.subr.bf16.mxu1 %v5101_v35 }
  0x95   :  { %396 = vmatpush1.bf16.msra.mxu0 %v5098_v33 }
  0x96   :  { %397 = vmatprep.subr.bf16.mxu0 %v5099_v34 }
  0x97   :  { %4930 = vmatpush3.bf16.msra.mxu1 %v5101_v35 }
  0x98   :  { %4931 = vmatprep.subr.bf16.mxu1 %v5105_v38 }
  0x99   :  { %398 = vmatpush1.bf16.msra.mxu0 %v5102_v36 }
  0x9a   :  { %399 = vmatprep.subr.bf16.mxu0 %v5103_v37 }
  0x9b   :  { %4932 = vmatpush3.bf16.msra.mxu1 %v5105_v38 }
  0x9c   :  { %4933 = vmatprep.subr.bf16.mxu1 %v5109_v42 }
  0x9d   :  { %400 = vmatpush1.bf16.msra.mxu0 %v5106_v40 }
  0x9e   :  { %401 = vmatprep.subr.bf16.mxu0 %v5107_v41 }
  0x9f   :  { %4934 = vmatpush3.bf16.msra.mxu1 %v5109_v42 }
  0xa0   :  { %4935 = vmatprep.subr.bf16.mxu1 %v5111_v44 }
  0xa1   :  { %402 = vmatpush1.bf16.msra.mxu0 %v5110_v43 }
  0xa3   :  { %4936 = vmatpush3.bf16.msra.mxu1 %v5111_v44 }
 0x10f   :  { %v144_v8 = vpop.xlane.xlu0 %143  ;;  %v148_v9 = vpop.xlane.xlu1 %147 }
 0x110   :  { %v152_v10 = vmul.f32 0.0078125, %v144_v8  ;;  %v154_v11 = vmul.f32 0.0078125, %v148_v9 }
 0x112   :  { %v5700_v12 = vsub.f32 %v137_v0, %v152_v10  ;;  %v5702_v13 = vsub.f32 %v139_v1, %v154_v11  ;;  %v4664_v0 = vld [vmem:[#allocation7] ss:$0 sm:$0xff] }
 0x113   :  { %v146_v14 = vpop.xlane.xlu0 %145  ;;  %v150_v15 = vpop.xlane.xlu1 %149 }
 0x114   :  { %v153_v16 = vmul.f32 0.0078125, %v146_v14  ;;  %v160_v17 = vmul.f32 %v5700_v12, %v5700_v12  ;;  %v155_v18 = vmul.f32 0.0078125, %v150_v15  ;;  %v162_v21 = vmul.f32 %v5702_v13, %v5702_v13 }
 0x115   :  { %v244_v14 = vlaneseq }
 0x116   :  { %v5706_v19 = vsub.f32 %v138_v2, %v153_v16  ;;  %164 = vadd.xlane.f32.xlu0 %v160_v17  ;;  %v5708_v20 = vsub.f32 %v140_v3, %v155_v18  ;;  %v242_v16 = vld [vmem:[%s6687_s6] sm:$0x7]  ;;  %s5518_s6 = smov 96  }
 0x118   :  { %v161_v22 = vmul.f32 %v5706_v19, %v5706_v19  ;;  %v163_v23 = vmul.f32 %v5708_v20, %v5708_v20 }
 0x11a   :  { %168 = vadd.xlane.f32.xlu0 %v162_v21  ;;  %166 = vadd.xlane.f32.xlu1 %v161_v22 }
 0x11e   :  { %170 = vadd.xlane.f32.xlu1 %v163_v23 }
 0x1a3   :  { %v165_v45 = vpop.xlane.xlu0 %164 }
 0x1a4   :  { %v172_v46 = vmul.f32 0.0078125, %v165_v45 }
 0x1a6   :  { %v176_v47 = vadd.f32 1e-05, %v172_v46 }
 0x1a7   :  { %v167_v48 = vpop.xlane.xlu1 %166  ;;  %v169_v49 = vpop.xlane.xlu0 %168 }
 0x1a8   :  { %5200 = vrsqrt.f32 %v176_v47  ;;  %v173_v50 = vmul.f32 0.0078125, %v167_v48  ;;  %v174_v51 = vmul.f32 0.0078125, %v169_v49 }
 0x1aa   :  { %v177_v52 = vadd.f32 1e-05, %v173_v50  ;;  %v178_v53 = vadd.f32 1e-05, %v174_v51 }
 0x1ab   :  { %v171_v54 = vpop.xlane.xlu1 %170 }
 0x1ac   :  { %5202 = vrsqrt.f32 %v177_v52  ;;  %v175_v55 = vmul.f32 0.0078125, %v171_v54  ;;  %v5522_v54 = vmov 1983009808  }
 0x1ad   :  { %5204 = vrsqrt.f32 %v178_v53  ;;  %v5520_v53 = vmov 0.0  }
 0x1ae   :  { %v179_v56 = vadd.f32 1e-05, %v175_v55  ;;  %4941 = vmatprep.subr.bf16.mxu0 %v5520_v53  ;;  %4953 = vmatprep.subr.bf16.mxu1 %v5520_v53  ;;  %v549_v55 = vunpack.c.l.s4 %v5522_v54 }
 0x1b0   :  { %5206 = vrsqrt.f32 %v179_v56  ;;  %v5523_v56 = vmov 1934713408  }
 0x1b2   :  { %v5201_v57 = vpop.eup %5200 }
 0x1b3   :  { %v184_v58 = vmul.f32 %v5201_v57, %v5700_v12  ;;  %v580_v57 = vunpack.c.l.s4 %v5523_v56 }
 0x1b5   :  { %v194_v63 = vmul.f32 %v4663_v59, %v184_v58  ;;  %v550_v58 = vunpack.c.0.s8 %v549_v55 }
 0x1b6   :  { %v5203_v60 = vpop.eup %5202 }
 0x1b7   :  { %v5205_v61 = vpop.eup %5204  ;;  %v185_v62 = vmul.f32 %v5203_v60, %v5706_v19  ;;  %v204_v4 = vadd.f32 %v4664_v0, %v194_v63 }
 0x1b8   :  { %v186_v1 = vmul.f32 %v5205_v61, %v5702_v13  ;;  %v5723_v13 = vshrl.u32 %v244_v14, 7  ;;  %v5776_v61 = vpack.i.b16 %v5517_v39, %v5517_v39 }
 0x1b9   :  { %v195_v2 = vmul.f32 %v4663_v59, %v185_v62  ;;  %v581_v62 = vunpack.c.0.s8 %v580_v57 }
 0x1ba   :  { %v5207_v3 = vpop.eup %5206  ;;  %v196_v7 = vmul.f32 %v4663_v59, %v186_v1  ;;  %v246_v15 = vsub.s32 0, %v5723_v13  ;;  %v250_v17 = vsub.s32 1, %v5723_v13  ;;  %v254_v19 = vsub.s32 2, %v5723_v13 }
 0x1bb   :  { %v205_v5 = vadd.f32 %v4664_v0, %v195_v2  ;;  %v187_v6 = vmul.f32 %v5207_v3, %v5708_v20 }
 0x1bc   :  { %v206_v10 = vadd.f32 %v4664_v0, %v196_v7  ;;  %v247_v18 = vrot.slane %v242_v16, %v246_v15  ;;  %v251_v21 = vrot.slane %v242_v16, %v250_v17  ;;  %v255_v27 = vrot.slane %v242_v16, %v254_v19 }
 0x1bd   :  { %v208_v8 = vpack.c.bf16 %v205_v5, %v204_v4  ;;  %v197_v9 = vmul.f32 %v4663_v59, %v187_v6  ;;  %v5782_v5 = vsub.s32 %v581_v62, %v5723_v13 }
 0x1bf   :  { %420 = vmatmul.mubr.bf16.vlgmr.msra.gmra.mrb[0].mxu0 %v208_v8  ;;  %4937 = vmatprep.mubr.bf16.mxu1 %v208_v8  ;;  %v207_v11 = vadd.f32 %v4664_v0, %v197_v9  ;;  %v5779_v0 = vsub.s32 %v550_v58, %v5723_v13 }
 0x1c0   :  { %429 = vmatprep.mubr.bf16.mxu0 %v5517_v39 }
 0x1c1   :  { %v209_v12 = vpack.c.bf16 %v207_v11, %v206_v10 }
 0x1c3   :  { %4938 = vmatmul.mubr.bf16.vlgmr.msra.gmra.mrb[0].mxu1 %v209_v12 }
 0x1c4   :  { %4955 = vmatprep.mubr.msk.bf16.mxu1 %vm5521_vm0, %v5520_v53 }
 0x1c7   :  { %430 = vmatmul.mubr.bf16.gmra.mrb[4].mxu0 %v209_v12 }
 0x1c8   :  { %4943 = vmatprep.mubr.msk.bf16.mxu0 %vm5521_vm0, %v5520_v53 }
 0x292   :  { %v421_v20 = vpop.f32.mrb[0].mxu0 }
 0x293   :  { %v423_v22 = vpop.f32.mrb[1].mxu0  ;;  %v422_v24 = vadd.f32 %v421_v20, %v247_v18 }
 0x294   :  { %v425_v23 = vpop.f32.mrb[2].mxu0  ;;  %v424_v28 = vadd.f32 %v423_v22, %v251_v21 }
 0x295   :  { %v426_v25 = vadd.f32 %v425_v23, %v247_v18  ;;  %v427_v26 = vpop.f32.mrb[3].mxu0 }
 0x296   :  { %v428_v29 = vadd.f32 %v427_v26, %v251_v21  ;;  %v4939_v30 = vpop.f32.mrb[0].mxu1 }
 0x297   :  { %v5737_v31 = vpack.c.bf16 %v426_v25, %v422_v24  ;;  %v474_v32 = vpop.f32.mrb[1].mxu1  ;;  %v483_v35 = vadd.f32 %v4939_v30, %v255_v27 }
 0x298   :  { %v490_v33 = vpack.c.bf16 %v428_v29, %v424_v28  ;;  %v4940_v34 = vpop.f32.mrb[2].mxu1  ;;  %v475_v38 = vadd.f32 %v474_v32, %v255_v27 }
 0x299   :  { %v486_v36 = vadd.f32 %v4940_v34, %v255_v27  ;;  %v477_v37 = vpop.f32.mrb[3].mxu1 }
 0x29a   :  { %v478_v40 = vadd.f32 %v477_v37, %v255_v27  ;;  %1041 = vrot.lane.b32.xlu1 %v490_v33, %s5514_s2  ;;  %1037 = vrot.lane.b32.xlu0 %v490_v33, %s5518_s6  ;;  %v431_v41 = vpop.f32.mrb[4].mxu0  ;;  %v1053_v3 = vshrl.u32 %v490_v33, 16 }
 0x29b   :  { %v5741_v42 = vpack.c.bf16 %v486_v36, %v483_v35  ;;  %v433_v43 = vpop.f32.mrb[5].mxu0  ;;  %v432_v46 = vadd.f32 %v431_v41, %v247_v18 }
 0x29c   :  { %v5743_v44 = vpack.c.bf16 %v478_v40, %v475_v38  ;;  %v435_v45 = vpop.f32.mrb[6].mxu0  ;;  %v434_v49 = vadd.f32 %v433_v43, %v251_v21  ;;  %v513_v38 = vshrl.u32 %v5737_v31, 16 }
 0x29d   :  { %v436_v47 = vadd.f32 %v435_v45, %v247_v18  ;;  %v437_v48 = vpop.f32.mrb[7].mxu0 }
 0x29e   :  { %v438_v50 = vadd.f32 %v437_v48, %v251_v21  ;;  %1045 = vrot.lane.b32.xlu1 %v490_v33, %s5519_s27  ;;  %501 = vrot.lane.b32.xlu0 %v5737_v31, %s5514_s2 }
 0x29f   :  { %v5748_v51 = vpack.c.bf16 %v436_v47, %v432_v46 }
 0x2a0   :  { %v5750_v52 = vpack.c.bf16 %v438_v50, %v434_v49 }
 0x2a1   :  { %v535_v57 = vshrl.u32 %v5748_v51, 16 }
 0x2a2   :  { %497 = vrot.lane.b32.xlu1 %v5737_v31, %s5518_s6  ;;  %1039 = vrot.lane.b32.xlu0 %v5750_v52, %s5518_s6  ;;  %v1069_v56 = vshrl.u32 %v5750_v52, 16 }
 0x2a6   :  { %505 = vrot.lane.b32.xlu1 %v5737_v31, %s5519_s27  ;;  %1047 = vrot.lane.b32.xlu0 %v5750_v52, %s5519_s27 }
 0x2aa   :  { %1043 = vrot.lane.b32.xlu1 %v5750_v52, %s5514_s2  ;;  %503 = vrot.lane.b32.xlu0 %v5748_v51, %s5514_s2 }
 0x2ae   :  { %499 = vrot.lane.b32.xlu1 %v5748_v51, %s5518_s6 }
 0x2b2   :  { %507 = vrot.lane.b32.xlu1 %v5748_v51, %s5519_s27 }
 0x30c   :  { %v1042_v59 = vpop.permute.xlu1 %1041  ;;  %v1038_v60 = vpop.permute.xlu0 %1037 }
 0x30d   :  { %v1051_v63 = vpack.i.b16 %v1038_v60, %v490_v33  ;;  %v1054_v1 = vshrl.u32 %v1038_v60, 16  ;;  %v1061_v6 = vshrl.u32 %v1042_v59, 16 }
 0x30f   :  { %v1081_v7 = vcombine.high %v1051_v63, %v5776_v61  ;;  %v1055_v9 = vpack.i.b16 %v1054_v1, %v1053_v3  ;;  %v1088_v10 = vrot.slane %v1051_v63, %v5779_v0 }
 0x310   :  { %v1046_v2 = vpop.permute.xlu1 %1045  ;;  %v502_v22 = vpop.permute.xlu0 %501 }
 0x311   :  { %v1059_v4 = vpack.i.b16 %v1046_v2, %v1042_v59  ;;  %v1062_v8 = vshrl.u32 %v1046_v2, 16  ;;  %v1095_v24 = vrot.slane %v1081_v7, %v5779_v0  ;;  %v1147_v27 = vcombine.high %v1055_v9, %v5776_v61 }
 0x312   :  { %v1154_v30 = vrot.slane %v1055_v9, %v5779_v0  ;;  %v521_v55 = vshrl.u32 %v502_v22, 16 }
 0x313   :  { %v1096_v11 = vcombine.high %v1059_v4, %v5776_v61  ;;  %v1103_v12 = vrot.slane %v1059_v4, %v5779_v0  ;;  %v1063_v16 = vpack.i.b16 %v1062_v8, %v1061_v6  ;;  %v1161_v40 = vrot.slane %v1147_v27, %v5779_v0 }
 0x314   :  { %v498_v23 = vpop.permute.xlu1 %497  ;;  %v5800_v46 = vpop.permute.xlu0 %1039 }
 0x315   :  { %v1110_v18 = vrot.slane %v1096_v11, %v5779_v0  ;;  %v1111_v20 = vcombine.low %v1088_v10, %v1103_v12  ;;  %v1112_v21 = vcombine.high %v1088_v10, %v1103_v12  ;;  %v1162_v25 = vcombine.high %v1063_v16, %v5776_v61 }
 0x316   :  { %v1169_v26 = vrot.slane %v1063_v16, %v5779_v0  ;;  %v514_v34 = vshrl.u32 %v498_v23, 16  ;;  %v511_v45 = vpack.i.b16 %v498_v23, %v5737_v31  ;;  %v5818_v60 = vpack.i.b16 %v5800_v46, %v5750_v52 }
 0x317   :  { %v1119_v28 = vrot.slane %v1111_v20, %v5782_v5  ;;  %v1126_v29 = vrot.slane %v1112_v21, %v5782_v5  ;;  %v1127_v32 = vcombine.low %v1095_v24, %v1110_v18  ;;  %v1128_v33 = vcombine.high %v1095_v24, %v1110_v18 }
 0x318   :  { %v1176_v35 = vrot.slane %v1162_v25, %v5779_v0  ;;  %v1177_v36 = vcombine.low %v1154_v30, %v1169_v26  ;;  %v1178_v37 = vcombine.high %v1154_v30, %v1169_v26  ;;  %v506_v47 = vpop.permute.xlu1 %505  ;;  %v515_v50 = vpack.i.b16 %v514_v34, %v513_v38  ;;  %v1048_v25 = vpop.permute.xlu0 %1047 }
 0x319   :  { %v1345_v41 = vcombine.low %v1119_v28, %v1126_v29  ;;  %v4697_v43 = vcombine.high %v1119_v28, %v1126_v29  ;;  %v5803_v48 = vrot.slane %v1127_v32, %v5782_v5  ;;  %v5806_v49 = vrot.slane %v1128_v33, %v5782_v5 }
 0x31a   :  { %v1193_v54 = vcombine.low %v1161_v40, %v1176_v35  ;;  %v5811_v58 = vrot.slane %v1177_v36, %v5782_v5  ;;  %v5814_v31 = vrot.slane %v1178_v37, %v5782_v5  ;;  %v1194_v59 = vcombine.high %v1161_v40, %v1176_v35 }
 0x31b   :  { %v5821_v62 = vrot.slane %v1345_v41, %v5779_v0  ;;  %v5824_v63 = vrot.slane %v4697_v43, %v5779_v0  ;;  %v547_v1 = vcombine.high %v511_v45, %v5776_v61  ;;  %v519_v2 = vpack.i.b16 %v506_v47, %v502_v22 }
 0x31c   :  { %v1361_v3 = vcombine.low %v5803_v48, %v5806_v49  ;;  %v4698_v4 = vcombine.high %v5803_v48, %v5806_v49  ;;  %v613_v6 = vcombine.high %v515_v50, %v5776_v61  ;;  %v522_v7 = vshrl.u32 %v506_v47, 16  ;;  %v1044_v11 = vpop.permute.xlu1 %1043 }
 0x31d   :  { %v5833_v52 = vrot.slane %v1193_v54, %v5782_v5  ;;  %v554_v8 = vrot.slane %v511_v45, %v5779_v0  ;;  %v562_v9 = vcombine.high %v519_v2, %v5776_v61  ;;  %v569_v10 = vrot.slane %v519_v2, %v5779_v0 }
 0x31e   :  { %v5839_v12 = vrot.slane %v1194_v59, %v5782_v5  ;;  %v620_v16 = vrot.slane %v515_v50, %v5779_v0  ;;  %v1070_v18 = vshrl.u32 %v5800_v46, 16  ;;  %v523_v20 = vpack.i.b16 %v522_v7, %v521_v55 }
 0x31f   :  { %v561_v21 = vrot.slane %v547_v1, %v5779_v0  ;;  %v576_v22 = vrot.slane %v562_v9, %v5779_v0  ;;  %v577_v23 = vcombine.low %v554_v8, %v569_v10  ;;  %v578_v24 = vcombine.high %v554_v8, %v569_v10 }
 0x320   :  { %v627_v26 = vrot.slane %v613_v6, %v5779_v0  ;;  %v628_v27 = vcombine.high %v523_v20, %v5776_v61  ;;  %v635_v28 = vrot.slane %v523_v20, %v5779_v0  ;;  %v1075_v29 = vpack.i.b16 %v1048_v25, %v1044_v11 }
 0x321   :  { %v585_v30 = vrot.slane %v577_v23, %v5782_v5  ;;  %v592_v32 = vrot.slane %v578_v24, %v5782_v5  ;;  %v593_v33 = vcombine.low %v561_v21, %v576_v22  ;;  %v594_v34 = vcombine.high %v561_v21, %v576_v22 }
 0x322   :  { %v642_v35 = vrot.slane %v628_v27, %v5779_v0  ;;  %v643_v36 = vcombine.low %v620_v16, %v635_v28  ;;  %v644_v37 = vcombine.high %v620_v16, %v635_v28  ;;  %v1077_v38 = vshrl.u32 %v1044_v11, 16 }
 0x323   :  { %v601_v40 = vrot.slane %v593_v33, %v5782_v5  ;;  %v608_v41 = vrot.slane %v594_v34, %v5782_v5  ;;  %v811_v43 = vcombine.low %v585_v30, %v592_v32  ;;  %v4689_v45 = vcombine.high %v585_v30, %v592_v32  ;;  %v500_v30 = vpop.permute.xlu1 %499 }
 0x324   :  { %v651_v46 = vrot.slane %v643_v36, %v5782_v5  ;;  %v658_v47 = vrot.slane %v644_v37, %v5782_v5  ;;  %v659_v50 = vcombine.low %v627_v26, %v642_v35  ;;  %v660_v54 = vcombine.high %v627_v26, %v642_v35 }
 0x325   :  { %v827_v55 = vcombine.low %v601_v40, %v608_v41  ;;  %v4690_v59 = vcombine.high %v601_v40, %v608_v41  ;;  %v1228_v1 = vcombine.high %v1075_v29, %v5776_v61  ;;  %v1235_v2 = vrot.slane %v1075_v29, %v5779_v0 }
 0x326   :  { %v667_v6 = vrot.slane %v659_v50, %v5782_v5  ;;  %v674_v7 = vrot.slane %v660_v54, %v5782_v5  ;;  %v861_v8 = vcombine.low %v651_v46, %v658_v47  ;;  %v4691_v9 = vcombine.high %v651_v46, %v658_v47  ;;  %v504_v47 = vpop.permute.xlu0 %503 }
 0x327   :  { %v1071_v10 = vpack.i.b16 %v1070_v18, %v1069_v56  ;;  %v1213_v11 = vcombine.high %v5818_v60, %v5776_v61  ;;  %v1220_v16 = vrot.slane %v5818_v60, %v5779_v0  ;;  %v1078_v20 = vshrl.u32 %v1048_v25, 16 }
 0x328   :  { %v818_v21 = vrot.slane %v811_v43, %v5779_v0  ;;  %v826_v22 = vrot.slane %v4689_v45, %v5779_v0  ;;  %v877_v23 = vcombine.low %v667_v6, %v674_v7  ;;  %v4692_v24 = vcombine.high %v667_v6, %v674_v7 }
 0x329   :  { %v1079_v26 = vpack.i.b16 %v1078_v20, %v1077_v38  ;;  %v1242_v27 = vrot.slane %v1228_v1, %v5779_v0  ;;  %v1243_v28 = vcombine.low %v1220_v16, %v1235_v2  ;;  %v1244_v29 = vcombine.high %v1220_v16, %v1235_v2 }
 0x32a   :  { %v834_v56 = vrot.slane %v827_v55, %v5779_v0  ;;  %v842_v18 = vrot.slane %v4690_v59, %v5779_v0  ;;  %v868_v32 = vrot.slane %v861_v8, %v5779_v0  ;;  %v876_v60 = vrot.slane %v4691_v9, %v5779_v0  ;;  %v508_v8 = vpop.permute.xlu1 %507 }
 0x32b   :  { %v1395_v25 = vcombine.low %v5811_v58, %v5814_v31  ;;  %v1227_v33 = vrot.slane %v1213_v11, %v5779_v0  ;;  %v884_v34 = vrot.slane %v877_v23, %v5779_v0  ;;  %v892_v35 = vrot.slane %v4692_v24, %v5779_v0 }
 0x32c   :  { %v1279_v36 = vcombine.high %v1071_v10, %v5776_v61  ;;  %v843_v37 = vcombine.low %v818_v21, %v826_v22  ;;  %v1251_v38 = vrot.slane %v1243_v28, %v5782_v5  ;;  %v1258_v40 = vrot.slane %v1244_v29, %v5782_v5 }
 0x32d   :  { %v4699_v41 = vcombine.high %v5811_v58, %v5814_v31  ;;  %v1259_v43 = vcombine.low %v1227_v33, %v1242_v27  ;;  %v1260_v45 = vcombine.high %v1227_v33, %v1242_v27  ;;  %v1294_v46 = vcombine.high %v1079_v26, %v5776_v61 }
 0x32e   :  { %v1411_v50 = vcombine.low %v5833_v52, %v5839_v12  ;;  %v851_v54 = vcombine.low %v834_v56, %v842_v18  ;;  %v893_v55 = vcombine.low %v868_v32, %v876_v60  ;;  %v533_v59 = vpack.i.b16 %v500_v30, %v5748_v51 }
 0x32f   :  { %v4700_v1 = vcombine.high %v5833_v52, %v5839_v12  ;;  %v1286_v2 = vrot.slane %v1071_v10, %v5779_v0  ;;  %v901_v6 = vcombine.low %v884_v34, %v892_v35  ;;  %v1301_v7 = vrot.slane %v1079_v26, %v5779_v0 }
 0x330   :  { %v1293_v9 = vrot.slane %v1279_v36, %v5779_v0  ;;  %v5890_v11 = vrot.slane %v843_v37, %v5782_v5  ;;  %v1445_v16 = vcombine.low %v1251_v38, %v1258_v40  ;;  %v543_v20 = vshrl.u32 %v504_v47, 16 }
 0x331   :  { %v5893_v21 = vrot.slane %v1259_v43, %v5782_v5  ;;  %v5896_v22 = vrot.slane %v1260_v45, %v5782_v5  ;;  %v1308_v23 = vrot.slane %v1294_v46, %v5779_v0  ;;  %v536_v10 = vshrl.u32 %v500_v30, 16 }
 0x332   :  { %v5900_v24 = vrot.slane %v851_v54, %v5782_v5  ;;  %v5903_v26 = vrot.slane %v893_v55, %v5782_v5  ;;  %v679_v27 = vcombine.high %v533_v59, %v5776_v61  ;;  %v541_v28 = vpack.i.b16 %v508_v8, %v504_v47 }
 0x333   :  { %v5907_v29 = vrot.slane %v901_v6, %v5782_v5  ;;  %v1309_v56 = vcombine.low %v1286_v2, %v1301_v7  ;;  %v4701_v18 = vcombine.high %v1251_v38, %v1258_v40  ;;  %v537_v32 = vpack.i.b16 %v536_v10, %v535_v57 }
 0x334   :  { %v1310_v60 = vcombine.high %v1286_v2, %v1301_v7  ;;  %v5912_v30 = vrot.slane %v1445_v16, %v5779_v0  ;;  %v544_v33 = vshrl.u32 %v508_v8, 16  ;;  %v694_v34 = vcombine.high %v541_v28, %v5776_v61 }
 0x335   :  { %v1325_v35 = vcombine.low %v1293_v9, %v1308_v23  ;;  %v1461_v36 = vcombine.low %v5893_v21, %v5896_v22  ;;  %v686_v37 = vrot.slane %v533_v59, %v5779_v0  ;;  %v701_v43 = vrot.slane %v541_v28, %v5779_v0 }
 0x336   :  { %v693_v38 = vrot.slane %v679_v27, %v5779_v0  ;;  %v745_v51 = vcombine.high %v537_v32, %v5776_v61  ;;  %v545_v57 = vpack.i.b16 %v544_v33, %v543_v20  ;;  %v708_v40 = vrot.slane %v694_v34, %v5779_v0 }
 0x337   :  { %v709_v45 = vcombine.low %v686_v37, %v701_v43  ;;  %v710_v46 = vcombine.high %v686_v37, %v701_v43  ;;  %v1368_v47 = vrot.slane %v1361_v3, %v5779_v0  ;;  %v1376_v54 = vrot.slane %v4698_v4, %v5779_v0 }
 0x338   :  { %v725_v55 = vcombine.low %v693_v38, %v708_v40  ;;  %v726_v59 = vcombine.high %v693_v38, %v708_v40  ;;  %v760_v2 = vcombine.high %v545_v57, %v5776_v61  ;;  %v767_v6 = vrot.slane %v545_v57, %v5779_v0 }
 0x339   :  { %v1317_v7 = vrot.slane %v1309_v56, %v5782_v5  ;;  %v1324_v8 = vrot.slane %v1310_v60, %v5782_v5  ;;  %v1326_v16 = vcombine.high %v1293_v9, %v1308_v23  ;;  %v5935_v20 = vrot.slane %v4701_v18, %v5779_v0 }
 0x33a   :  { %v752_v3 = vrot.slane %v537_v32, %v5779_v0  ;;  %v759_v10 = vrot.slane %v745_v51, %v5779_v0  ;;  %v717_v48 = vrot.slane %v709_v45, %v5782_v5  ;;  %v774_v49 = vrot.slane %v760_v2, %v5779_v0 }
 0x33b   :  { %v724_v4 = vrot.slane %v710_v46, %v5782_v5  ;;  %v733_v27 = vrot.slane %v725_v55, %v5782_v5  ;;  %v740_v28 = vrot.slane %v726_v59, %v5782_v5  ;;  %v1385_v56 = vcombine.low %v1368_v47, %v1376_v54 }
 0x33c   :  { %v775_v60 = vcombine.low %v752_v3, %v767_v6  ;;  %v776_v9 = vcombine.high %v752_v3, %v767_v6  ;;  %v791_v23 = vcombine.low %v759_v10, %v774_v49  ;;  %v792_v18 = vcombine.high %v759_v10, %v774_v49 }
 0x33d   :  { %v1333_v33 = vrot.slane %v1325_v35, %v5782_v5  ;;  %v1340_v32 = vrot.slane %v1326_v16, %v5782_v5  ;;  %v4702_v34 = vcombine.high %v5893_v21, %v5896_v22  ;;  %v1495_v37 = vcombine.low %v1317_v7, %v1324_v8 }
 0x33e   :  { %v799_v43 = vrot.slane %v791_v23, %v5782_v5  ;;  %v806_v38 = vrot.slane %v792_v18, %v5782_v5  ;;  %v1377_v51 = vcombine.low %v5821_v62, %v5824_v63  ;;  %v1402_v57 = vrot.slane %v1395_v25, %v5779_v0 }
 0x33f   :  { %v911_v40 = vcombine.low %v717_v48, %v724_v4  ;;  %v4693_v35 = vcombine.high %v717_v48, %v724_v4  ;;  %v927_v45 = vcombine.low %v733_v27, %v740_v28  ;;  %v1392_v46 = vrot.slane %v1385_v56, %v5782_v5 }
 0x340   :  { %v783_v47 = vrot.slane %v775_v60, %v5782_v5  ;;  %v790_v54 = vrot.slane %v776_v9, %v5782_v5  ;;  %v1410_v55 = vrot.slane %v4699_v41, %v5779_v0  ;;  %v1418_v62 = vrot.slane %v1411_v50, %v5779_v0 }
 0x341   :  { %v4703_v63 = vcombine.high %v1317_v7, %v1324_v8  ;;  %v1511_v25 = vcombine.low %v1333_v33, %v1340_v32  ;;  %v977_v59 = vcombine.low %v799_v43, %v806_v38  ;;  %v4696_v2 = vcombine.high %v799_v43, %v806_v38 }
 0x342   :  { %v4704_v6 = vcombine.high %v1333_v33, %v1340_v32  ;;  %v1384_v16 = vrot.slane %v1377_v51, %v5782_v5  ;;  %v1426_v3 = vrot.slane %v4700_v1, %v5779_v0  ;;  %v1427_v58 = vcombine.low %v1402_v57, %v1410_v55 }
 0x343   :  { %v918_v31 = vrot.slane %v911_v40, %v5779_v0  ;;  %v926_v41 = vrot.slane %v4693_v35, %v5779_v0  ;;  %v934_v50 = vrot.slane %v927_v45, %v5779_v0  ;;  %v4694_v7 = vcombine.high %v733_v27, %v740_v28 }
 0x344   :  { %v961_v8 = vcombine.low %v783_v47, %v790_v54  ;;  %v4695_v10 = vcombine.high %v783_v47, %v790_v54  ;;  %v1393_v48 = vcombine.low %v1384_v16, %v1392_v46  ;;  %v1435_v49 = vcombine.low %v1418_v62, %v1426_v3 }
 0x345   :  { %v984_v4 = vrot.slane %v977_v59, %v5779_v0  ;;  %v992_v56 = vrot.slane %v4696_v2, %v5779_v0  ;;  %v1468_v52 = vrot.slane %v1461_v36, %v5779_v0  ;;  %v1476_v12 = vrot.slane %v4702_v34, %v5779_v0 }
 0x346   :  { %v1434_v1 = vrot.slane %v1427_v58, %v5782_v5  ;;  %v1442_v60 = vrot.slane %v1435_v49, %v5782_v5  ;;  %v1477_v27 = vcombine.low %v5912_v30, %v5935_v20  ;;  %v1502_v28 = vrot.slane %v1495_v37, %v5779_v0 }
 0x347   :  { %v1485_v9 = vcombine.low %v1468_v52, %v1476_v12  ;;  %v1510_v23 = vrot.slane %v4703_v63, %v5779_v0  ;;  %v1518_v18 = vrot.slane %v1511_v25, %v5779_v0  ;;  %v1526_v33 = vrot.slane %v4704_v6, %v5779_v0 }
 0x348   :  { %v942_v21 = vrot.slane %v4694_v7, %v5779_v0  ;;  %v1443_v22 = vcombine.low %v1434_v1, %v1442_v60  ;;  %v1394_v36 = vcombine.high %v1384_v16, %v1392_v46  ;;  %v1444_v32 = vcombine.high %v1434_v1, %v1442_v60 }
 0x349   :  { %v968_v34 = vrot.slane %v961_v8, %v5779_v0  ;;  %v1492_v43 = vrot.slane %v1485_v9, %v5782_v5  ;;  %v1527_v38 = vcombine.low %v1502_v28, %v1510_v23  ;;  %v1535_v30 = vcombine.low %v1518_v18, %v1526_v33 }
 0x34a   :  { %v976_v20 = vrot.slane %v4695_v10, %v5779_v0  ;;  %v1547_v37 = vpack.i.b16 %v1443_v22, %v1393_v48  ;;  %v1553_v51 = vpack.i.b16 %v1444_v32, %v1394_v36  ;;  %v909_v57 = vcombine.low %v5903_v26, %v5907_v29 }
 0x34b   :  { %v1001_v40 = vcombine.low %v984_v4, %v992_v56  ;;  %v1484_v35 = vrot.slane %v1477_v27, %v5782_v5  ;;  %v1534_v45 = vrot.slane %v1527_v38, %v5782_v5  ;;  %v1542_v46 = vrot.slane %v1535_v30, %v5782_v5 }
 0x34c   :  { %v2116_v47 = vsel %vm2111_vm1, %v1547_v37, 0  ;;  %v2210_v54 = vsel %vm2111_vm1, %v1553_v51, 0  ;;  %v910_v55 = vcombine.high %v5903_v26, %v5907_v29  ;;  %v1549_v62 = vshrl.u32 %v1443_v22, 16 }
 0x34d   :  { %v859_v63 = vcombine.low %v5890_v11, %v5900_v24  ;;  %4942 = vmatpush3.bf16.xpose.msra.mxu0 %v2116_v47  ;;  %4954 = vmatpush3.bf16.xpose.msra.mxu1 %v2210_v54  ;;  %v1493_v25 = vcombine.low %v1484_v35, %v1492_v43  ;;  %v1543_v59 = vcombine.low %v1534_v45, %v1542_v46  ;;  %v1548_v3 = vshrl.u32 %v1393_v48, 16 }
 0x34e   :  { %v951_v2 = vcombine.low %v934_v50, %v942_v21  ;;  %v993_v6 = vcombine.low %v968_v34, %v976_v20  ;;  %4947 = vmatprep.subr.bf16.mxu0 %v5520_v53  ;;  %v860_v16 = vcombine.high %v5890_v11, %v5900_v24  ;;  %4965 = vmatprep.subr.bf16.mxu1 %v5520_v53  ;;  %v1555_v24 = vshrl.u32 %v1444_v32, 16 }
 0x34f   :  { %v943_v58 = vcombine.low %v918_v31, %v926_v41  ;;  %v1559_v26 = vpack.i.b16 %v1543_v59, %v1493_v25  ;;  %v1013_v29 = vpack.i.b16 %v909_v57, %v859_v63  ;;  %v1550_v8 = vpack.i.b16 %v1549_v62, %v1548_v3 }
 0x350   :  { %v1019_v7 = vpack.i.b16 %v910_v55, %v860_v16  ;;  %v1008_v10 = vrot.slane %v1001_v40, %v5782_v5  ;;  %v958_v50 = vrot.slane %v951_v2, %v5782_v5  ;;  %v1000_v4 = vrot.slane %v993_v6, %v5782_v5 }
 0x351   :  { %v2304_v49 = vsel %vm2111_vm1, %v1559_v26, 0  ;;  %v950_v56 = vrot.slane %v943_v58, %v5782_v5  ;;  %v2163_v11 = vsel %vm2111_vm1, %v1550_v8, 0  ;;  %v1544_v41 = vcombine.high %v1534_v45, %v1542_v46 }
 0x352   :  { %v1009_v31 = vcombine.low %v1000_v4, %v1008_v10  ;;  %v1015_v48 = vshrl.u32 %v909_v57, 16  ;;  %v1554_v52 = vshrl.u32 %v1394_v36, 16  ;;  %v1494_v1 = vcombine.high %v1484_v35, %v1492_v43 }
 0x353   :  { %v959_v12 = vcombine.low %v950_v56, %v958_v50  ;;  %v1014_v60 = vshrl.u32 %v859_v63, 16  ;;  %v1561_v21 = vshrl.u32 %v1543_v59, 16  ;;  %v1021_v22 = vshrl.u32 %v910_v55, 16 }
 0x354   :  { %4944 = vmatmul.mubr.msk.bf16.vlgmr.msra.gmra.mrb[8].mxu0 %vm2111_vm1, %v1013_v29  ;;  %4956 = vmatmul.mubr.msk.bf16.vlgmr.msra.gmra.mrb[4].mxu1 %vm2111_vm1, %v1019_v7  ;;  %v1556_v27 = vpack.i.b16 %v1555_v24, %v1554_v52  ;;  %v1565_v9 = vpack.i.b16 %v1544_v41, %v1494_v1  ;;  %v1560_v36 = vshrl.u32 %v1493_v25, 16  ;;  %v1010_v32 = vcombine.high %v1000_v4, %v1008_v10 }
 0x355   :  { %4948 = vmatpush3.bf16.xpose.msra.mxu0 %v2163_v11  ;;  %4966 = vmatpush3.bf16.xpose.msra.mxu1 %v2304_v49  ;;  %v1025_v28 = vpack.i.b16 %v1009_v31, %v959_v12  ;;  %v1016_v23 = vpack.i.b16 %v1015_v48, %v1014_v60  ;;  %v1020_v34 = vshrl.u32 %v860_v16, 16  ;;  %v960_v38 = vcombine.high %v950_v56, %v958_v50 }
 0x356   :  { %4949 = vmatprep.mubr.msk.bf16.mxu0 %vm5521_vm0, %v5520_v53  ;;  %4959 = vmatprep.subr.bf16.mxu0 %v5520_v53  ;;  %v2257_v18 = vsel %vm2111_vm1, %v1556_v27, 0  ;;  %v2398_v33 = vsel %vm2111_vm1, %v1565_v9, 0  ;;  %v1562_v43 = vpack.i.b16 %v1561_v21, %v1560_v36  ;;  %v1567_v51 = vshrl.u32 %v1544_v41, 16 }
 0x357   :  { %4967 = vmatprep.mubr.msk.bf16.mxu1 %vm5521_vm0, %v5520_v53  ;;  %4977 = vmatprep.subr.bf16.mxu1 %v5520_v53  ;;  %v1022_v30 = vpack.i.b16 %v1021_v22, %v1020_v34  ;;  %v1031_v20 = vpack.i.b16 %v1010_v32, %v960_v38  ;;  %v1027_v57 = vshrl.u32 %v1009_v31, 16  ;;  %v1566_v40 = vshrl.u32 %v1494_v1, 16 }
 0x358   :  { %v2351_v37 = vsel %vm2111_vm1, %v1562_v43, 0  ;;  %v1026_v35 = vshrl.u32 %v959_v12, 16  ;;  %v1033_v54 = vshrl.u32 %v1010_v32, 16  ;;  %v1032_v55 = vshrl.u32 %v960_v38, 16 }
 0x359   :  { %v1568_v45 = vpack.i.b16 %v1567_v51, %v1566_v40  ;;  %v2492_v63 = vand.u32 127, %v244_v14  ;;  %v2490_v25 = vadd.s32 8, %v5723_v13 }
 0x35a   :  { %v1028_v46 = vpack.i.b16 %v1027_v57, %v1026_v35  ;;  %v1034_v62 = vpack.i.b16 %v1033_v54, %v1032_v55 }
 0x35b   :  { %v2445_v47 = vsel %vm2111_vm1, %v1568_v45, 0  ;;  %vm6052_vm2 = vcmp.ge.s32.totalorder %v5723_v13, %v2492_v63  ;;  %vm6056_vm4 = vcmp.ge.s32.totalorder %v2490_v25, %v2492_v63 }
 0x35c   :  { %4950 = vmatmul.mubr.msk.bf16.vlgmr.msra.gmra.mrb[12].mxu0 %vm2111_vm1, %v1016_v23  ;;  %4968 = vmatmul.mubr.msk.bf16.vlgmr.msra.gmra.mrb[8].mxu1 %vm2111_vm1, %v1025_v28 }
 0x35d   :  { %4960 = vmatpush3.bf16.xpose.msra.mxu0 %v2257_v18  ;;  %4978 = vmatpush3.bf16.xpose.msra.mxu1 %v2398_v33 }
 0x35e   :  { %4961 = vmatprep.mubr.msk.bf16.mxu0 %vm5521_vm0, %v5520_v53  ;;  %4971 = vmatprep.subr.bf16.mxu0 %v5520_v53 }
 0x35f   :  { %4979 = vmatprep.mubr.msk.bf16.mxu1 %vm5521_vm0, %v5520_v53  ;;  %4989 = vmatprep.subr.bf16.mxu1 %v5520_v53 }
 0x364   :  { %4962 = vmatmul.mubr.msk.bf16.vlgmr.msra.gmra.mrb[16].mxu0 %vm2111_vm1, %v1022_v30  ;;  %4980 = vmatmul.mubr.msk.bf16.vlgmr.msra.gmra.mrb[12].mxu1 %vm2111_vm1, %v1031_v20 }
 0x365   :  { %4972 = vmatpush3.bf16.xpose.msra.mxu0 %v2351_v37  ;;  %4973 = vmatprep.mubr.msk.bf16.mxu0 %vm5521_vm0, %v5520_v53 }
 0x366   :  { %4983 = vmatprep.subr.bf16.mxu0 %v5520_v53  ;;  %4991 = vmatprep.mubr.msk.bf16.mxu1 %vm5521_vm0, %v5520_v53 }
 0x36c   :  { %4974 = vmatmul.mubr.msk.bf16.vlgmr.msra.gmra.mrb[20].mxu0 %vm2111_vm1, %v1028_v46 }
 0x36d   :  { %4984 = vmatpush3.bf16.xpose.msra.mxu0 %v2445_v47  ;;  %4985 = vmatprep.mubr.msk.bf16.mxu0 %vm5521_vm0, %v5520_v53 }
 0x36e   :  { %4995 = vmatprep.subr.bf16.mxu0 %v5520_v53 }
 0x374   :  { %4986 = vmatmul.mubr.msk.bf16.vlgmr.msra.gmra.mrb[24].mxu0 %vm2111_vm1, %v1034_v62 }
 0x375   :  { %4997 = vmatprep.mubr.msk.bf16.mxu0 %vm5521_vm0, %v5520_v53 }
 0x427   :  { %v2152_v2 = vpop.f32.mrb[8].mxu0  ;;  %v2246_v6 = vpop.f32.mrb[4].mxu1 }
 0x428   :  { %v6062_v3 = vsel %vm6052_vm2, %v2152_v2, -1e+30  ;;  %v4945_v58 = vpop.f32.mrb[9].mxu0  ;;  %v4957_v14 = vpop.f32.mrb[5].mxu1  ;;  %v6068_v8 = vsel %vm6052_vm2, %v2246_v6, -1e+30 }
 0x429   :  { %v2155_v26 = vpop.f32.mrb[10].mxu0  ;;  %v2249_v29 = vpop.f32.mrb[6].mxu1  ;;  %v2516_v7 = vsel %vm2515_vm3, %v6062_v3, -inf  ;;  %v2528_v11 = vsel %vm2515_vm3, %v6068_v8, -inf }
 0x42a   :  { %v6072_v10 = vsel %vm6056_vm4, %v2155_v26, -1e+30  ;;  %v4958_v49 = vpop.f32.mrb[7].mxu1  ;;  %2517 = vmax.xlane.f32.xlu0 %v2516_v7  ;;  %v4946_v50 = vpop.f32.mrb[11].mxu0  ;;  %v6078_v56 = vsel %vm6056_vm4, %v2249_v29, -1e+30 }
 0x42b   :  { %v2519_v4 = vsel %vm2515_vm3, %v6072_v10, -inf  ;;  %v2531_v31 = vsel %vm2515_vm3, %v6078_v56, -inf }
 0x42c   :  { %2520 = vmax.xlane.f32.xlu1 %v2519_v4 }
 0x42e   :  { %2529 = vmax.xlane.f32.xlu0 %v2528_v11 }
 0x42f   :  { %v2199_v24 = vpop.f32.mrb[12].mxu0  ;;  %v2340_v41 = vpop.f32.mrb[8].mxu1 }
 0x430   :  { %v6086_v48 = vsel %vm6052_vm2, %v2199_v24, -1e+30  ;;  %2532 = vmax.xlane.f32.xlu1 %v2531_v31  ;;  %v4951_v52 = vpop.f32.mrb[13].mxu0  ;;  %v6090_v12 = vsel %vm6052_vm2, %v2340_v41, -1e+30  ;;  %v4969_v1 = vpop.f32.mrb[9].mxu1 }
 0x431   :  { %v2202_v60 = vpop.f32.mrb[14].mxu0  ;;  %v2522_v27 = vsel %vm2515_vm3, %v6086_v48, -inf  ;;  %v2343_v28 = vpop.f32.mrb[10].mxu1  ;;  %v2540_v33 = vsel %vm2515_vm3, %v6090_v12, -inf }
 0x432   :  { %2523 = vmax.xlane.f32.xlu0 %v2522_v27  ;;  %v4952_v9 = vpop.f32.mrb[15].mxu0  ;;  %v6096_v23 = vsel %vm6056_vm4, %v2343_v28, -1e+30  ;;  %v4970_v18 = vpop.f32.mrb[11].mxu1  ;;  %v6104_v22 = vsel %vm6056_vm4, %v2202_v60, -1e+30 }
 0x433   :  { %v2543_v21 = vsel %vm2515_vm3, %v6096_v23, -inf  ;;  %v2525_v20 = vsel %vm2515_vm3, %v6104_v22, -inf }
 0x434   :  { %2544 = vmax.xlane.f32.xlu1 %v2543_v21 }
 0x436   :  { %2541 = vmax.xlane.f32.xlu0 %v2540_v33 }
 0x437   :  { %v2293_v36 = vpop.f32.mrb[16].mxu0  ;;  %v2434_v32 = vpop.f32.mrb[12].mxu1 }
 0x438   :  { %v4963_v34 = vpop.f32.mrb[17].mxu0  ;;  %v4981_v43 = vpop.f32.mrb[13].mxu1  ;;  %v6108_v38 = vsel %vm6052_vm2, %v2293_v36, -1e+30  ;;  %v6128_v54 = vsel %vm6052_vm2, %v2434_v32, -1e+30 }
 0x439   :  { %v2296_v30 = vpop.f32.mrb[18].mxu0  ;;  %v2437_v37 = vpop.f32.mrb[14].mxu1  ;;  %v2534_v46 = vsel %vm2515_vm3, %v6108_v38, -inf  ;;  %v2552_v25 = vsel %vm2515_vm3, %v6128_v54, -inf }
 0x43a   :  { %v6114_v51 = vsel %vm6056_vm4, %v2296_v30, -1e+30  ;;  %v4964_v57 = vpop.f32.mrb[19].mxu0  ;;  %2526 = vmax.xlane.f32.xlu0 %v2525_v20  ;;  %v6118_v40 = vsel %vm6056_vm4, %v2437_v37, -1e+30  ;;  %v4982_v35 = vpop.f32.mrb[15].mxu1 }
 0x43b   :  { %v2537_v45 = vsel %vm2515_vm3, %v6114_v51, -inf  ;;  %v2555_v47 = vsel %vm2515_vm3, %v6118_v40, -inf }
 0x43c   :  { %2538 = vmax.xlane.f32.xlu1 %v2537_v45 }
 0x43e   :  { %2535 = vmax.xlane.f32.xlu0 %v2534_v46 }
 0x43f   :  { %v2387_v55 = vpop.f32.mrb[20].mxu0 }
 0x440   :  { %v4975_v62 = vpop.f32.mrb[21].mxu0  ;;  %2556 = vmax.xlane.f32.xlu1 %v2555_v47  ;;  %v6134_v2 = vsel %vm6052_vm2, %v2387_v55, -1e+30 }
 0x441   :  { %v2390_v63 = vpop.f32.mrb[22].mxu0  ;;  %v2546_v26 = vsel %vm2515_vm3, %v6134_v2, -inf }
 0x442   :  { %v6138_v6 = vsel %vm6056_vm4, %v2390_v63, -1e+30  ;;  %v4976_v58 = vpop.f32.mrb[23].mxu0  ;;  %2553 = vmax.xlane.f32.xlu0 %v2552_v25 }
 0x443   :  { %v2549_v14 = vsel %vm2515_vm3, %v6138_v6, -inf }
 0x444   :  { %2550 = vmax.xlane.f32.xlu1 %v2549_v14 }
 0x446   :  { %2547 = vmax.xlane.f32.xlu0 %v2546_v26 }
 0x447   :  { %v2481_v29 = vpop.f32.mrb[24].mxu0 }
 0x448   :  { %v6146_v7 = vsel %vm6052_vm2, %v2481_v29, -1e+30  ;;  %v4987_v49 = vpop.f32.mrb[25].mxu0 }
 0x449   :  { %v2484_v50 = vpop.f32.mrb[26].mxu0  ;;  %v2558_v4 = vsel %vm2515_vm3, %v6146_v7, -inf }
 0x44a   :  { %v6152_v11 = vsel %vm6056_vm4, %v2484_v50, -1e+30  ;;  %v4988_v24 = vpop.f32.mrb[27].mxu0  ;;  %2559 = vmax.xlane.f32.xlu0 %v2558_v4 }
 0x44b   :  { %v2561_v59 = vsel %vm2515_vm3, %v6152_v11, -inf }
 0x455   :  { %1575 = vrot.lane.b32.xlu1 %v5743_v44, %s5514_s2 }
 0x459   :  { %1579 = vrot.lane.b32.xlu1 %v5743_v44, %s5519_s27 }
 0x460   :  { %1571 = vrot.lane.b32.xlu0 %v5743_v44, %s5518_s6 }
 0x47d   :  { %2562 = vmax.xlane.f32.xlu1 %v2561_v59 }
 0x48e   :  { %1573 = vrot.lane.b32.xlu1 %v5741_v42, %s5518_s6 }
 0x4b7   :  { %v2518_v16 = vpop.xlane.xlu0 %2517 }
 0x4b8   :  { %v2564_v31 = vsub.f32 %v6062_v3, %v2518_v16 }
 0x4b9   :  { %v2521_v41 = vpop.xlane.xlu1 %2520 }
 0x4ba   :  { %v2580_v52 = vmul.f32 1.442695, %v2564_v31  ;;  %v2565_v1 = vsub.f32 %v6072_v10, %v2521_v41 }
 0x4bb   :  { %v2530_v60 = vpop.xlane.xlu0 %2529 }
 0x4bc   :  { %5208 = vpow2.f32 %v2580_v52  ;;  %v2582_v27 = vmul.f32 1.442695, %v2565_v1  ;;  %v2568_v28 = vsub.f32 %v6068_v8, %v2530_v60  ;;  %v1587_v1 = vshrl.u32 %v5743_v44, 16 }
 0x4bd   :  { %v2533_v9 = vpop.xlane.xlu1 %2532 }
 0x4be   :  { %5210 = vpow2.f32 %v2582_v27  ;;  %v2588_v18 = vmul.f32 1.442695, %v2568_v28  ;;  %v2569_v33 = vsub.f32 %v6078_v56, %v2533_v9 }
 0x4bf   :  { %v2524_v21 = vpop.xlane.xlu0 %2523 }
 0x4c0   :  { %5212 = vpow2.f32 %v2588_v18  ;;  %v2590_v36 = vmul.f32 1.442695, %v2569_v33  ;;  %v2566_v32 = vsub.f32 %v6086_v48, %v2524_v21 }
 0x4c1   :  { %v6171_v10 = vpop.xlane.xlu1 %2544 }
 0x4c2   :  { %5214 = vpow2.f32 %v2590_v36  ;;  %v2584_v3 = vmul.f32 1.442695, %v2566_v32 }
 0x4c3   :  { %v6169_v34 = vpop.xlane.xlu0 %2541 }
 0x4c4   :  { %5216 = vpow2.f32 %v2584_v3 }
 0x4c6   :  { %v6173_v43 = vpop.eup %5208 }
 0x4c7   :  { %v2527_v8 = vpop.xlane.xlu0 %2526  ;;  %v2612_v30 = vsel %vm2515_vm3, %v6173_v43, 0.0 }
 0x4c8   :  { %v6177_v20 = vpop.eup %5210  ;;  %v2567_v56 = vsub.f32 %v6104_v22, %v2527_v8  ;;  %2613 = vadd.xlane.f32.xlu1 %v2612_v30 }
 0x4c9   :  { %v6180_v37 = vpop.xlane.xlu1 %2538  ;;  %v2615_v48 = vsel %vm2515_vm3, %v6177_v20, 0.0 }
 0x4ca   :  { %v6184_v57 = vpop.eup %5212  ;;  %v2586_v35 = vmul.f32 1.442695, %v2567_v56  ;;  %2616 = vadd.xlane.f32.xlu0 %v2615_v48 }
 0x4cb   :  { %v6186_v45 = vpop.xlane.xlu0 %2535  ;;  %v2624_v46 = vsel %vm2515_vm3, %v6184_v57, 0.0 }
 0x4cc   :  { %v6190_v47 = vpop.eup %5214  ;;  %5218 = vpow2.f32 %v2586_v35  ;;  %2625 = vadd.xlane.f32.xlu1 %v2624_v46 }
 0x4cd   :  { %v6192_v22 = vpop.xlane.xlu1 %2556  ;;  %v2627_v55 = vsel %vm2515_vm3, %v6190_v47, 0.0 }
 0x4ce   :  { %v6196_v62 = vpop.eup %5216  ;;  %2628 = vadd.xlane.f32.xlu0 %v2627_v55 }
 0x4cf   :  { %v6198_v63 = vpop.xlane.xlu0 %2553  ;;  %v2618_v58 = vsel %vm2515_vm3, %v6196_v62, 0.0 }
 0x4d1   :  { %v6200_v25 = vpop.xlane.xlu1 %2550 }
 0x4d2   :  { %2619 = vadd.xlane.f32.xlu0 %v2618_v58 }
 0x4d3   :  { %v6204_v14 = vpop.xlane.xlu0 %2547 }
 0x4d5   :  { %v1576_v26 = vpop.permute.xlu1 %1575 }
 0x4d6   :  { %v6206_v29 = vpop.eup %5218  ;;  %v1595_v24 = vshrl.u32 %v1576_v26, 16 }
 0x4d7   :  { %v6208_v49 = vpop.xlane.xlu0 %2559  ;;  %v2621_v50 = vsel %vm2515_vm3, %v6206_v29, 0.0 }
 0x4d8   :  { %2622 = vadd.xlane.f32.xlu0 %v2621_v50 }
 0x4d9   :  { %v1580_v4 = vpop.permute.xlu1 %1579 }
 0x4da   :  { %v1593_v59 = vpack.i.b16 %v1580_v4, %v1576_v26  ;;  %v1596_v16 = vshrl.u32 %v1580_v4, 16 }
 0x4db   :  { %v1572_v31 = vpop.permute.xlu0 %1571 }
 0x4dc   :  { %v1597_v41 = vpack.i.b16 %v1596_v16, %v1595_v24  ;;  %v1630_v52 = vcombine.high %v1593_v59, %v5776_v61  ;;  %v1585_v60 = vpack.i.b16 %v1572_v31, %v5743_v44  ;;  %v1588_v27 = vshrl.u32 %v1572_v31, 16 }
 0x4dd   :  { %1581 = vrot.lane.b32.xlu1 %v5741_v42, %s5519_s27  ;;  %v1637_v28 = vrot.slane %v1593_v59, %v5779_v0 }
 0x4de   :  { %v1589_v9 = vpack.i.b16 %v1588_v27, %v1587_v1  ;;  %v1615_v18 = vcombine.high %v1585_v60, %v5776_v61  ;;  %v1622_v33 = vrot.slane %v1585_v60, %v5779_v0  ;;  %v1644_v21 = vrot.slane %v1630_v52, %v5779_v0 }
 0x4df   :  { %v1696_v36 = vcombine.high %v1597_v41, %v5776_v61  ;;  %v1703_v30 = vrot.slane %v1597_v41, %v5779_v0 }
 0x4e0   :  { %v1629_v32 = vrot.slane %v1615_v18, %v5779_v0  ;;  %v1645_v3 = vcombine.low %v1622_v33, %v1637_v28  ;;  %v1646_v8 = vcombine.high %v1622_v33, %v1637_v28  ;;  %v1681_v44 = vcombine.high %v1589_v9, %v5776_v61 }
 0x4e1   :  { %v1688_v56 = vrot.slane %v1589_v9, %v5779_v0  ;;  %v1710_v58 = vrot.slane %v1696_v36, %v5779_v0 }
 0x4e2   :  { %v1653_v48 = vrot.slane %v1645_v3, %v5782_v5  ;;  %v1660_v35 = vrot.slane %v1646_v8, %v5782_v5  ;;  %v1661_v46 = vcombine.low %v1629_v32, %v1644_v21  ;;  %v1662_v55 = vcombine.high %v1629_v32, %v1644_v21 }
 0x4e3   :  { %v1695_v26 = vrot.slane %v1681_v44, %v5779_v0  ;;  %v1711_v50 = vcombine.low %v1688_v56, %v1703_v30  ;;  %v1712_v4 = vcombine.high %v1688_v56, %v1703_v30 }
 0x4e4   :  { %v1669_v24 = vrot.slane %v1661_v46, %v5782_v5  ;;  %v1676_v59 = vrot.slane %v1662_v55, %v5782_v5  ;;  %v1879_v16 = vcombine.low %v1653_v48, %v1660_v35  ;;  %v4705_v31 = vcombine.high %v1653_v48, %v1660_v35 }
 0x4e5   :  { %v1719_v41 = vrot.slane %v1711_v50, %v5782_v5  ;;  %v1726_v52 = vrot.slane %v1712_v4, %v5782_v5  ;;  %v1727_v1 = vcombine.low %v1695_v26, %v1710_v58  ;;  %v1728_v60 = vcombine.high %v1695_v26, %v1710_v58 }
 0x4e6   :  { %v1886_v27 = vrot.slane %v1879_v16, %v5779_v0  ;;  %v1894_v28 = vrot.slane %v4705_v31, %v5779_v0  ;;  %v1895_v9 = vcombine.low %v1669_v24, %v1676_v59  ;;  %v4706_v18 = vcombine.high %v1669_v24, %v1676_v59 }
 0x4e7   :  { %v1735_v33 = vrot.slane %v1727_v1, %v5782_v5  ;;  %v1742_v21 = vrot.slane %v1728_v60, %v5782_v5  ;;  %v1929_v36 = vcombine.low %v1719_v41, %v1726_v52  ;;  %v4707_v32 = vcombine.high %v1719_v41, %v1726_v52 }
 0x4e8   :  { %v1902_v3 = vrot.slane %v1895_v9, %v5779_v0  ;;  %v1910_v8 = vrot.slane %v4706_v18, %v5779_v0  ;;  %v1911_v44 = vcombine.low %v1886_v27, %v1894_v28  ;;  %v2570_v46 = vsub.f32 %v6108_v38, %v6186_v45 }
 0x4e9   :  { %v1936_v30 = vrot.slane %v1929_v36, %v5779_v0  ;;  %v1944_v56 = vrot.slane %v4707_v32, %v5779_v0  ;;  %v1945_v48 = vcombine.low %v1735_v33, %v1742_v21  ;;  %v4708_v35 = vcombine.high %v1735_v33, %v1742_v21 }
 0x4ea   :  { %v1919_v55 = vcombine.low %v1902_v3, %v1910_v8  ;;  %v1918_v4 = vrot.slane %v1911_v44, %v5782_v5  ;;  %v2572_v59 = vsub.f32 %v6090_v12, %v6169_v34  ;;  %v2592_v31 = vmul.f32 1.442695, %v2570_v46 }
 0x4eb   :  { %v1952_v58 = vrot.slane %v1945_v48, %v5779_v0  ;;  %v1960_v26 = vrot.slane %v4708_v35, %v5779_v0  ;;  %v1961_v50 = vcombine.low %v1936_v30, %v1944_v56  ;;  %v2575_v12 = vsub.f32 %v6138_v6, %v6200_v25 }
 0x4ec   :  { %v1926_v24 = vrot.slane %v1919_v55, %v5782_v5  ;;  %v2596_v1 = vmul.f32 1.442695, %v2572_v59  ;;  %5220 = vpow2.f32 %v2592_v31  ;;  %v2571_v36 = vsub.f32 %v6114_v51, %v6180_v37 }
 0x4ed   :  { %v1969_v16 = vcombine.low %v1952_v58, %v1960_v26  ;;  %v1968_v45 = vrot.slane %v1961_v50, %v5782_v5  ;;  %v2577_v6 = vsub.f32 %v6118_v40, %v6192_v22  ;;  %v2602_v25 = vmul.f32 1.442695, %v2575_v12 }
 0x4ee   :  { %1577 = vrot.lane.b32.xlu0 %v5741_v42, %s5514_s2  ;;  %v1927_v41 = vcombine.low %v1918_v4, %v1926_v24  ;;  %v6252_v38 = vcombine.high %v1918_v4, %v1926_v24  ;;  %5222 = vpow2.f32 %v2596_v1  ;;  %v2594_v8 = vmul.f32 1.442695, %v2571_v36 }
 0x4ef   :  { %v1976_v52 = vrot.slane %v1969_v16, %v5782_v5  ;;  %v2573_v44 = vsub.f32 %v6096_v23, %v6171_v10  ;;  %v2606_v30 = vmul.f32 1.442695, %v2577_v6  ;;  %5224 = vpow2.f32 %v2602_v25 }
 0x4f0   :  { %v2083_v34 = vshrl.u32 %v1927_v41, 16  ;;  %v2091_v28 = vshrl.u32 %v6252_v38, 16  ;;  %5226 = vpow2.f32 %v2594_v8  ;;  %v2574_v40 = vsub.f32 %v6134_v2, %v6204_v14 }
 0x4f1   :  { %v1977_v60 = vcombine.low %v1968_v45, %v1976_v52  ;;  %v6256_v27 = vcombine.high %v1968_v45, %v1976_v52  ;;  %v2598_v37 = vmul.f32 1.442695, %v2573_v44  ;;  %5228 = vpow2.f32 %v2606_v30 }
 0x4f2   :  { %v2576_v23 = vsub.f32 %v6128_v54, %v6198_v63  ;;  %v2600_v10 = vmul.f32 1.442695, %v2574_v40  ;;  %v2578_v2 = vsub.f32 %v6146_v7, %v6208_v49  ;;  %v1603_v8 = vshrl.u32 %v5741_v42, 16 }
 0x4f3   :  { %v2081_v9 = vpack.i.b16 %v1977_v60, %v1927_v41  ;;  %v2084_v18 = vshrl.u32 %v1977_v60, 16  ;;  %v2089_v33 = vpack.i.b16 %v6256_v27, %v6252_v38  ;;  %v2092_v21 = vshrl.u32 %v6256_v27, 16 }
 0x4f4   :  { %5230 = vpow2.f32 %v2598_v37  ;;  %v2604_v14 = vmul.f32 1.442695, %v2576_v23  ;;  %v2608_v54 = vmul.f32 1.442695, %v2578_v2 }
 0x4f5   :  { %4990 = vmatpush3.bf16.msra.mxu1 %v2081_v9  ;;  %v2085_v32 = vpack.i.b16 %v2084_v18, %v2083_v34  ;;  %v6266_v3 = vpack.i.b16 %v2092_v21, %v2091_v28  ;;  %5232 = vpow2.f32 %v2600_v10 }
 0x4f6   :  { %5001 = vmatprep.subr.bf16.mxu1 %v5520_v53  ;;  %v6274_v51 = vpop.eup %5220  ;;  %5234 = vpow2.f32 %v2604_v14 }
 0x4f7   :  { %4996 = vmatpush3.bf16.msra.mxu0 %v2085_v32  ;;  %v2630_v22 = vsel %vm2515_vm3, %v6274_v51, 0.0  ;;  %5236 = vpow2.f32 %v2608_v54 }
 0x4f8   :  { %5007 = vmatprep.subr.bf16.mxu0 %v5520_v53  ;;  %v6280_v56 = vpop.eup %5222 }
 0x4f9   :  { %v2636_v48 = vsel %vm2515_vm3, %v6280_v56, 0.0  ;;  %v6286_v35 = vpop.eup %5224 }
 0x4fa   :  { %v6290_v46 = vpop.eup %5226  ;;  %v2645_v55 = vsel %vm2515_vm3, %v6286_v35, 0.0 }
 0x4fb   :  { %v6294_v58 = vpop.eup %5228  ;;  %v2633_v50 = vsel %vm2515_vm3, %v6290_v46, 0.0 }
 0x4fc   :  { %v2651_v7 = vsel %vm2515_vm3, %v6294_v58, 0.0 }
 0x4fe   :  { %v6301_v49 = vpop.eup %5230 }
 0x4ff   :  { %v2639_v24 = vsel %vm2515_vm3, %v6301_v49, 0.0  ;;  %v6305_v59 = vpop.eup %5232 }
 0x500   :  { %v6309_v16 = vpop.eup %5234 }
 0x501   :  { %2631 = vadd.xlane.f32.xlu1 %v2630_v22  ;;  %v6311_v31 = vpop.eup %5236  ;;  %v2648_v41 = vsel %vm2515_vm3, %v6309_v16, 0.0 }
 0x502   :  { %v2654_v1 = vsel %vm2515_vm3, %v6311_v31, 0.0 }
 0x505   :  { %2637 = vadd.xlane.f32.xlu1 %v2636_v48 }
 0x509   :  { %2646 = vadd.xlane.f32.xlu1 %v2645_v55 }
 0x50a   :  { %v2563_v63 = vpop.xlane.xlu1 %2562 }
 0x50b   :  { %v2579_v26 = vsub.f32 %v6152_v11, %v2563_v63  ;;  %v2642_v11 = vsel %vm2515_vm3, %v6305_v59, 0.0 }
 0x50d   :  { %v2610_v4 = vmul.f32 1.442695, %v2579_v26  ;;  %2634 = vadd.xlane.f32.xlu0 %v2633_v50  ;;  %2652 = vadd.xlane.f32.xlu1 %v2651_v7 }
 0x50e   :  { %v1574_v60 = vpop.permute.xlu1 %1573 }
 0x50f   :  { %5238 = vpow2.f32 %v2610_v4  ;;  %v1604_v32 = vshrl.u32 %v1574_v60, 16  ;;  %v1601_v44 = vpack.i.b16 %v1574_v60, %v5741_v42 }
 0x511   :  { %2640 = vadd.xlane.f32.xlu0 %v2639_v24  ;;  %v1605_v22 = vpack.i.b16 %v1604_v32, %v1603_v8  ;;  %v1754_v38 = vrot.slane %v1601_v44, %v5779_v0 }
 0x513   :  { %v1813_v55 = vcombine.high %v1605_v22, %v5776_v61 }
 0x515   :  { %2643 = vadd.xlane.f32.xlu0 %v2642_v11 }
 0x519   :  { %v6315_v45 = vpop.eup %5238  ;;  %2649 = vadd.xlane.f32.xlu0 %v2648_v41  ;;  %v1820_v41 = vrot.slane %v1605_v22, %v5779_v0 }
 0x51a   :  { %v2657_v52 = vsel %vm2515_vm3, %v6315_v45, 0.0 }
 0x51b   :  { %2658 = vadd.xlane.f32.xlu1 %v2657_v52 }
 0x51d   :  { %2655 = vadd.xlane.f32.xlu0 %v2654_v1 }
 0x555   :  { %v2614_v12 = vpop.xlane.xlu1 %2613 }
 0x556   :  { %5240 = vrcp.f32 %v2614_v12 }
 0x557   :  { %v2617_v34 = vpop.xlane.xlu0 %2616 }
 0x558   :  { %5242 = vrcp.f32 %v2617_v34 }
 0x559   :  { %v2626_v28 = vpop.xlane.xlu1 %2625 }
 0x55b   :  { %v2629_v9 = vpop.xlane.xlu0 %2628 }
 0x55c   :  { %5244 = vrcp.f32 %v2629_v9 }
 0x55d   :  { %5246 = vrcp.f32 %v2626_v28  ;;  %v1582_v23 = vpop.permute.xlu1 %1581 }
 0x55e   :  { %v1612_v48 = vshrl.u32 %v1582_v23, 16 }
 0x55f   :  { %v2620_v18 = vpop.xlane.xlu0 %2619 }
 0x560   :  { %v5241_v21 = vpop.eup %5240  ;;  %5248 = vrcp.f32 %v2620_v18 }
 0x561   :  { %v2676_v6 = vmul.f32 %v5241_v21, %v6173_v43  ;;  %v1747_v43 = vcombine.high %v1601_v44, %v5776_v61 }
 0x562   :  { %v5243_v36 = vpop.eup %5242 }
 0x563   :  { %v2677_v25 = vmul.f32 %v5243_v36, %v6177_v20 }
 0x565   :  { %v2623_v30 = vpop.xlane.xlu0 %2622  ;;  %v2692_v37 = vpack.c.bf16 %v2677_v25, %v2676_v6 }
 0x566   :  { %v5245_v40 = vpop.eup %5244  ;;  %5250 = vrcp.f32 %v2623_v30 }
 0x567   :  { %4992 = vmatmul.mubr.msk.bf16.vlgmr.msra.gmra.mrb[16].mxu1 %vm2515_vm3, %v2692_v37  ;;  %v5247_v10 = vpop.eup %5246  ;;  %v2681_v42 = vmul.f32 %v5245_v40, %v6190_v47  ;;  %v1761_v47 = vrot.slane %v1747_v43, %v5779_v0 }
 0x568   :  { %5002 = vmatpush3.bf16.msra.mxu1 %v2089_v33  ;;  %5003 = vmatprep.mubr.msk.bf16.mxu1 %vm5521_vm0, %v5520_v53  ;;  %v2680_v54 = vmul.f32 %v5247_v10, %v6184_v57  ;;  %v1827_v57 = vrot.slane %v1813_v55, %v5779_v0 }
 0x569   :  { %v1578_v20 = vpop.permute.xlu0 %1577  ;;  %5013 = vmatprep.subr.bf16.mxu1 %v5520_v53 }
 0x56a   :  { %v1609_v2 = vpack.i.b16 %v1582_v23, %v1578_v20  ;;  %v1611_v14 = vshrl.u32 %v1578_v20, 16  ;;  %v5249_v63 = vpop.eup %5248  ;;  %v2694_v50 = vpack.c.bf16 %v2681_v42, %v2680_v54 }
 0x56b   :  { %v2678_v52 = vmul.f32 %v5249_v63, %v6196_v62 }
 0x56c   :  { %v1613_v27 = vpack.i.b16 %v1612_v48, %v1611_v14  ;;  %v1762_v33 = vcombine.high %v1609_v2, %v5776_v61  ;;  %v1769_v26 = vrot.slane %v1609_v2, %v5779_v0 }
 0x56e   :  { %v1776_v7 = vrot.slane %v1762_v33, %v5779_v0  ;;  %v1777_v4 = vcombine.low %v1754_v38, %v1769_v26  ;;  %v1778_v24 = vcombine.high %v1754_v38, %v1769_v26  ;;  %v1828_v11 = vcombine.high %v1613_v27, %v5776_v61 }
 0x56f   :  { %v1835_v1 = vrot.slane %v1613_v27, %v5779_v0  ;;  %5004 = vmatmul.mubr.msk.bf16.vlgmr.msra.gmra.mrb[20].mxu1 %vm2515_vm3, %v2694_v50 }
 0x570   :  { %v5251_v60 = vpop.eup %5250  ;;  %v1785_v12 = vrot.slane %v1777_v4, %v5782_v5  ;;  %v1792_v34 = vrot.slane %v1778_v24, %v5782_v5  ;;  %v1793_v28 = vcombine.low %v1761_v47, %v1776_v7  ;;  %v1794_v9 = vcombine.high %v1761_v47, %v1776_v7  ;;  %5015 = vmatprep.mubr.msk.bf16.mxu1 %vm5521_vm0, %v5520_v53 }
 0x571   :  { %v2679_v18 = vmul.f32 %v5251_v60, %v6206_v29  ;;  %v1842_v21 = vrot.slane %v1828_v11, %v5779_v0  ;;  %v1843_v36 = vcombine.low %v1820_v41, %v1835_v1  ;;  %v1844_v62 = vcombine.high %v1820_v41, %v1835_v1 }
 0x572   :  { %v1801_v32 = vrot.slane %v1793_v28, %v5782_v5  ;;  %v1808_v6 = vrot.slane %v1794_v9, %v5782_v5  ;;  %v1979_v25 = vcombine.low %v1785_v12, %v1792_v34  ;;  %v4709_v8 = vcombine.high %v1785_v12, %v1792_v34 }
 0x573   :  { %v1851_v44 = vrot.slane %v1843_v36, %v5782_v5  ;;  %v1858_v30 = vrot.slane %v1844_v62, %v5782_v5  ;;  %v1859_v37 = vcombine.low %v1827_v57, %v1842_v21  ;;  %v1860_v40 = vcombine.high %v1827_v57, %v1842_v21 }
 0x574   :  { %v1986_v22 = vrot.slane %v1979_v25, %v5779_v0  ;;  %v1994_v29 = vrot.slane %v4709_v8, %v5779_v0  ;;  %v1995_v23 = vcombine.low %v1801_v32, %v1808_v6  ;;  %v4710_v10 = vcombine.high %v1801_v32, %v1808_v6 }
 0x575   :  { %v1867_v43 = vrot.slane %v1859_v37, %v5782_v5  ;;  %v1874_v42 = vrot.slane %v1860_v40, %v5782_v5  ;;  %v2029_v20 = vcombine.low %v1851_v44, %v1858_v30  ;;  %v4711_v48 = vcombine.high %v1851_v44, %v1858_v30 }
 0x576   :  { %v2002_v2 = vrot.slane %v1995_v23, %v5779_v0  ;;  %v2010_v14 = vrot.slane %v4710_v10, %v5779_v0  ;;  %v2693_v55 = vpack.c.bf16 %v2679_v18, %v2678_v52  ;;  %v2011_v33 = vcombine.low %v1986_v22, %v1994_v29 }
 0x577   :  { %v2036_v54 = vrot.slane %v2029_v20, %v5779_v0  ;;  %v2044_v63 = vrot.slane %v4711_v48, %v5779_v0  ;;  %v2045_v38 = vcombine.low %v1867_v43, %v1874_v42  ;;  %v4712_v27 = vcombine.high %v1867_v43, %v1874_v42 }
 0x578   :  { %4998 = vmatmul.mubr.msk.bf16.vlgmr.msra.gmra.mrb[28].mxu0 %vm2515_vm3, %v2693_v55  ;;  %v2019_v26 = vcombine.low %v2002_v2, %v2010_v14  ;;  %v2018_v11 = vrot.slane %v2011_v33, %v5782_v5 }
 0x579   :  { %5008 = vmatpush3.bf16.msra.mxu0 %v6266_v3  ;;  %v2052_v47 = vrot.slane %v2045_v38, %v5779_v0  ;;  %v2060_v50 = vrot.slane %v4712_v27, %v5779_v0  ;;  %v2061_v7 = vcombine.low %v2036_v54, %v2044_v63  ;;  %5009 = vmatprep.mubr.msk.bf16.mxu0 %vm5521_vm0, %v5520_v53 }
 0x57a   :  { %5019 = vmatprep.subr.bf16.mxu0 %v5520_v53  ;;  %v2026_v4 = vrot.slane %v2019_v26, %v5782_v5 }
 0x57b   :  { %v2069_v24 = vcombine.low %v2052_v47, %v2060_v50  ;;  %v2068_v41 = vrot.slane %v2061_v7, %v5782_v5 }
 0x57c   :  { %v2027_v3 = vcombine.low %v2018_v11, %v2026_v4 }
 0x57d   :  { %v2076_v57 = vrot.slane %v2069_v24, %v5782_v5 }
 0x57e   :  { %v2099_v37 = vshrl.u32 %v2027_v3, 16 }
 0x57f   :  { %v2077_v52 = vcombine.low %v2068_v41, %v2076_v57  ;;  %v2078_v29 = vcombine.high %v2068_v41, %v2076_v57 }
 0x581   :  { %v2097_v1 = vpack.i.b16 %v2077_v52, %v2027_v3  ;;  %v2100_v6 = vshrl.u32 %v2077_v52, 16  ;;  %v2108_v14 = vshrl.u32 %v2078_v29, 16 }
 0x583   :  { %5014 = vmatpush3.bf16.msra.mxu1 %v2097_v1  ;;  %v2101_v43 = vpack.i.b16 %v2100_v6, %v2099_v37 }
 0x584   :  { %5025 = vmatprep.subr.bf16.mxu1 %v5520_v53 }
 0x58e   :  { %v2632_v60 = vpop.xlane.xlu1 %2631 }
 0x58f   :  { %5252 = vrcp.f32 %v2632_v60 }
 0x592   :  { %v2638_v12 = vpop.xlane.xlu1 %2637 }
 0x596   :  { %v2647_v28 = vpop.xlane.xlu1 %2646 }
 0x599   :  { %v5253_v36 = vpop.eup %5252 }
 0x59a   :  { %v2635_v34 = vpop.xlane.xlu0 %2634  ;;  %v2653_v18 = vpop.xlane.xlu1 %2652  ;;  %v2682_v8 = vmul.f32 %v5253_v36, %v6274_v51  ;;  %v2028_v51 = vcombine.high %v2018_v11, %v2026_v4 }
 0x59b   :  { %5254 = vrcp.f32 %v2635_v34 }
 0x59c   :  { %5256 = vrcp.f32 %v2638_v12  ;;  %v2105_v2 = vpack.i.b16 %v2078_v29, %v2028_v51  ;;  %v2107_v63 = vshrl.u32 %v2028_v51, 16 }
 0x59e   :  { %v2641_v9 = vpop.xlane.xlu0 %2640  ;;  %v2109_v26 = vpack.i.b16 %v2108_v14, %v2107_v63 }
 0x59f   :  { %5258 = vrcp.f32 %v2641_v9 }
 0x5a0   :  { %5260 = vrcp.f32 %v2647_v28 }
 0x5a2   :  { %v2644_v21 = vpop.xlane.xlu0 %2643 }
 0x5a3   :  { %5262 = vrcp.f32 %v2644_v21 }
 0x5a4   :  { %5264 = vrcp.f32 %v2653_v18 }
 0x5a5   :  { %v5255_v62 = vpop.eup %5254 }
 0x5a6   :  { %v2650_v32 = vpop.xlane.xlu0 %2649  ;;  %v5257_v25 = vpop.eup %5256  ;;  %v2683_v44 = vmul.f32 %v5255_v62, %v6290_v46 }
 0x5a7   :  { %5266 = vrcp.f32 %v2650_v32  ;;  %v2684_v23 = vmul.f32 %v5257_v25, %v6280_v56 }
 0x5a8   :  { %v2659_v30 = vpop.xlane.xlu1 %2658  ;;  %v2695_v22 = vpack.c.bf16 %v2683_v44, %v2682_v8 }
 0x5a9   :  { %v5259_v40 = vpop.eup %5258  ;;  %5268 = vrcp.f32 %v2659_v30 }
 0x5aa   :  { %v2685_v10 = vmul.f32 %v5259_v40, %v6301_v49  ;;  %v2656_v42 = vpop.xlane.xlu0 %2655  ;;  %v5261_v20 = vpop.eup %5260  ;;  %5010 = vmatmul.mubr.msk.bf16.vlgmr.msra.gmra.mrb[32].mxu0 %vm2515_vm3, %v2695_v22 }
 0x5ab   :  { %5270 = vrcp.f32 %v2656_v42  ;;  %5020 = vmatpush3.bf16.msra.mxu0 %v2101_v43  ;;  %5021 = vmatprep.mubr.msk.bf16.mxu0 %vm5521_vm0, %v5520_v53  ;;  %v2687_v56 = vmul.f32 %v5261_v20, %v6286_v35 }
 0x5ac   :  { %v2696_v46 = vpack.c.bf16 %v2685_v10, %v2684_v23  ;;  %5031 = vmatprep.subr.bf16.mxu0 %v5520_v53 }
 0x5ad   :  { %v5263_v48 = vpop.eup %5262 }
 0x5ae   :  { %v2686_v49 = vmul.f32 %v5263_v48, %v6305_v59  ;;  %5016 = vmatmul.mubr.msk.bf16.vlgmr.msra.gmra.mrb[24].mxu1 %vm2515_vm3, %v2696_v46  ;;  %v5265_v55 = vpop.eup %5264 }
 0x5af   :  { %5026 = vmatpush3.bf16.msra.mxu1 %v2105_v2  ;;  %5027 = vmatprep.mubr.msk.bf16.mxu1 %vm5521_vm0, %v5520_v53  ;;  %v2689_v27 = vmul.f32 %v5265_v55, %v6294_v58  ;;  %v5112_v58 = vld [vmem:[#allocation10] sm:$0xff]  }
 0x5b0   :  { %v2697_v54 = vpack.c.bf16 %v2687_v56, %v2686_v49  ;;  %5037 = vmatprep.subr.bf16.mxu1 %v5112_v58 }
 0x5b1   :  { %v5267_v38 = vpop.eup %5266 }
 0x5b2   :  { %v2688_v33 = vmul.f32 %v5267_v38, %v6309_v16  ;;  %5022 = vmatmul.mubr.msk.bf16.vlgmr.msra.gmra.mrb[36].mxu0 %vm2515_vm3, %v2697_v54  ;;  %v5113_v16 = vld [vmem:[#allocation10 + $0x8] sm:$0xff]  }
 0x5b3   :  { %v5269_v47 = vpop.eup %5268  ;;  %5032 = vmatpush3.bf16.msra.mxu0 %v2109_v26  ;;  %5033 = vmatprep.mubr.msk.bf16.mxu0 %vm5521_vm0, %v5520_v53 }
 0x5b4   :  { %v2698_v35 = vpack.c.bf16 %v2689_v27, %v2688_v33  ;;  %v2691_v50 = vmul.f32 %v5269_v47, %v6315_v45 }
 0x5b5   :  { %v5271_v59 = vpop.eup %5270 }
 0x5b6   :  { %v2690_v7 = vmul.f32 %v5271_v59, %v6311_v31  ;;  %5028 = vmatmul.mubr.msk.bf16.vlgmr.msra.gmra.mrb[28].mxu1 %vm2515_vm3, %v2698_v35 }
 0x5b7   :  { %5038 = vmatpush3.bf16.msra.mxu1 %v5112_v58 }
 0x5b8   :  { %v2699_v4 = vpack.c.bf16 %v2691_v50, %v2690_v7  ;;  %5039 = vmatprep.subr.bf16.mxu1 %v5113_v16 }
 0x5ba   :  { %5034 = vmatmul.mubr.msk.bf16.vlgmr.msra.gmra.mrb[40].mxu0 %vm2515_vm3, %v2699_v4 }
 0x5bb   :  { %4048 = vmatprep.mubr.bf16.mxu0 %v5517_v39  ;;  %5040 = vmatpush3.bf16.msra.mxu1 %v5113_v16 }
 0x63a   :  { %v2737_v24 = vpop.f32.mrb[16].mxu1 }
 0x63b   :  { %v4993_v11 = vpop.f32.mrb[17].mxu1 }
 0x63c   :  { %v2740_v53 = vpop.f32.mrb[18].mxu1 }
 0x63d   :  { %v3052_v41 = vpack.c.bf16 %v2740_v53, %v2737_v24  ;;  %v4994_v57 = vpop.f32.mrb[19].mxu1 }
 0x63f   :  { %v3064_v18 = vshrl.u32 %v3052_v41, 16 }
 0x642   :  { %v2825_v45 = vpop.f32.mrb[20].mxu1 }
 0x643   :  { %v5005_v31 = vpop.f32.mrb[21].mxu1 }
 0x644   :  { %v2828_v3 = vpop.f32.mrb[22].mxu1 }
 0x645   :  { %v3054_v52 = vpack.c.bf16 %v2828_v3, %v2825_v45  ;;  %v5006_v1 = vpop.f32.mrb[23].mxu1 }
 0x647   :  { %v3072_v22 = vshrl.u32 %v3054_v52, 16 }
 0x64b   :  { %v2781_v60 = vpop.f32.mrb[28].mxu0 }
 0x64c   :  { %v4999_v12 = vpop.f32.mrb[29].mxu0 }
 0x64d   :  { %v2784_v34 = vpop.f32.mrb[30].mxu0 }
 0x64e   :  { %v3053_v28 = vpack.c.bf16 %v2784_v34, %v2781_v60  ;;  %v5000_v9 = vpop.f32.mrb[31].mxu0 }
 0x650   :  { %v3062_v21 = vpack.i.b16 %v3053_v28, %v3052_v41  ;;  %v3065_v36 = vshrl.u32 %v3053_v28, 16 }
 0x652   :  { %v3066_v62 = vpack.i.b16 %v3065_v36, %v3064_v18  ;;  %v3092_v37 = vcombine.high %v3062_v21, %v5776_v61  ;;  %v3099_v51 = vrot.slane %v3062_v21, %v5779_v0 }
 0x654   :  { %v3158_v43 = vcombine.high %v3066_v62, %v5776_v61  ;;  %v3106_v56 = vrot.slane %v3092_v37, %v5779_v0  ;;  %v3165_v27 = vrot.slane %v3066_v62, %v5779_v0 }
 0x656   :  { %v3172_v33 = vrot.slane %v3158_v43, %v5779_v0 }
 0x67d   :  { %v2869_v32 = vpop.f32.mrb[32].mxu0 }
 0x67e   :  { %v5011_v6 = vpop.f32.mrb[33].mxu0 }
 0x67f   :  { %v2872_v25 = vpop.f32.mrb[34].mxu0 }
 0x680   :  { %v3055_v8 = vpack.c.bf16 %v2872_v25, %v2869_v32  ;;  %v5012_v44 = vpop.f32.mrb[35].mxu0 }
 0x681   :  { %v2913_v30 = vpop.f32.mrb[24].mxu1 }
 0x682   :  { %v5017_v40 = vpop.f32.mrb[25].mxu1  ;;  %v3070_v29 = vpack.i.b16 %v3055_v8, %v3054_v52  ;;  %v3073_v23 = vshrl.u32 %v3055_v8, 16 }
 0x683   :  { %v2916_v10 = vpop.f32.mrb[26].mxu1 }
 0x684   :  { %v3056_v42 = vpack.c.bf16 %v2916_v10, %v2913_v30  ;;  %v5018_v20 = vpop.f32.mrb[27].mxu1  ;;  %v3074_v46 = vpack.i.b16 %v3073_v23, %v3072_v22  ;;  %v3107_v48 = vcombine.high %v3070_v29, %v5776_v61  ;;  %v3114_v2 = vrot.slane %v3070_v29, %v5779_v0 }
 0x685   :  { %v2957_v49 = vpop.f32.mrb[36].mxu0 }
 0x686   :  { %v3121_v14 = vrot.slane %v3107_v48, %v5779_v0  ;;  %v3122_v55 = vcombine.low %v3099_v51, %v3114_v2  ;;  %v3123_v54 = vcombine.high %v3099_v51, %v3114_v2  ;;  %v3173_v63 = vcombine.high %v3074_v46, %v5776_v61  ;;  %v5023_v38 = vpop.f32.mrb[37].mxu0 }
 0x687   :  { %v3180_v26 = vrot.slane %v3074_v46, %v5779_v0  ;;  %v3080_v47 = vshrl.u32 %v3056_v42, 16  ;;  %v2960_v35 = vpop.f32.mrb[38].mxu0 }
 0x688   :  { %v3130_v59 = vrot.slane %v3122_v55, %v5782_v5  ;;  %v3137_v50 = vrot.slane %v3123_v54, %v5782_v5  ;;  %v3138_v7 = vcombine.low %v3106_v56, %v3121_v14  ;;  %v3139_v4 = vcombine.high %v3106_v56, %v3121_v14  ;;  %v5024_v58 = vpop.f32.mrb[39].mxu0 }
 0x689   :  { %v3001_v16 = vpop.f32.mrb[28].mxu1  ;;  %v3187_v24 = vrot.slane %v3173_v63, %v5779_v0  ;;  %v3188_v11 = vcombine.low %v3165_v27, %v3180_v26  ;;  %v3189_v53 = vcombine.high %v3165_v27, %v3180_v26  ;;  %v3057_v41 = vpack.c.bf16 %v2960_v35, %v2957_v49  ;;  %v5114_v27 = vld [vmem:[#allocation10 + $0x10] sm:$0xff]  }
 0x68a   :  { %v5029_v57 = vpop.f32.mrb[29].mxu1  ;;  %v3146_v45 = vrot.slane %v3138_v7, %v5782_v5  ;;  %v3153_v31 = vrot.slane %v3139_v4, %v5782_v5  ;;  %v3356_v3 = vcombine.low %v3130_v59, %v3137_v50  ;;  %v4729_v52 = vcombine.high %v3130_v59, %v3137_v50  ;;  %5041 = vmatprep.subr.bf16.mxu1 %v5114_v27 }
 0x68b   :  { %v3004_v1 = vpop.f32.mrb[30].mxu1  ;;  %v3196_v60 = vrot.slane %v3188_v11, %v5782_v5  ;;  %v3203_v12 = vrot.slane %v3189_v53, %v5782_v5  ;;  %v3204_v34 = vcombine.low %v3172_v33, %v3187_v24  ;;  %v3205_v28 = vcombine.high %v3172_v33, %v3187_v24  ;;  %5042 = vmatpush3.bf16.msra.mxu1 %v5114_v27  ;;  %v5115_v53 = vld [vmem:[#allocation10 + $0x18] sm:$0xff]  }
 0x68c   :  { %v5030_v9 = vpop.f32.mrb[31].mxu1  ;;  %v3078_v18 = vpack.i.b16 %v3057_v41, %v3056_v42  ;;  %v3081_v21 = vshrl.u32 %v3057_v41, 16  ;;  %v3058_v36 = vpack.c.bf16 %v3004_v1, %v3001_v16  ;;  %v3363_v62 = vrot.slane %v3356_v3, %v5779_v0  ;;  %5043 = vmatprep.subr.bf16.mxu1 %v5115_v53 }
 0x68d   :  { %v3045_v32 = vpop.f32.mrb[40].mxu0  ;;  %v3371_v6 = vrot.slane %v4729_v52, %v5779_v0  ;;  %v3372_v25 = vcombine.low %v3146_v45, %v3153_v31  ;;  %v3212_v8 = vrot.slane %v3204_v34, %v5782_v5  ;;  %v3219_v44 = vrot.slane %v3205_v28, %v5782_v5 }
 0x68e   :  { %v3082_v30 = vpack.i.b16 %v3081_v21, %v3080_v47  ;;  %v3224_v37 = vcombine.high %v3078_v18, %v5776_v61  ;;  %v5035_v40 = vpop.f32.mrb[41].mxu0  ;;  %v4730_v23 = vcombine.high %v3146_v45, %v3153_v31  ;;  %v3406_v43 = vcombine.low %v3196_v60, %v3203_v12 }
 0x68f   :  { %v3048_v22 = vpop.f32.mrb[42].mxu0  ;;  %v3379_v29 = vrot.slane %v3372_v25, %v5779_v0  ;;  %v3388_v10 = vcombine.low %v3363_v62, %v3371_v6  ;;  %v3231_v42 = vrot.slane %v3078_v18, %v5779_v0  ;;  %v3088_v51 = vshrl.u32 %v3058_v36, 16  ;;  %5044 = vmatpush3.bf16.msra.mxu1 %v5115_v53 }
 0x690   :  { %v3238_v20 = vrot.slane %v3224_v37, %v5779_v0  ;;  %v3059_v46 = vpack.c.bf16 %v3048_v22, %v3045_v32  ;;  %v5036_v48 = vpop.f32.mrb[43].mxu0  ;;  %v3290_v2 = vcombine.high %v3082_v30, %v5776_v61  ;;  %v3387_v56 = vrot.slane %v4730_v23, %v5779_v0 }
 0x691   :  { %v3413_v49 = vrot.slane %v3406_v43, %v5779_v0  ;;  %v4731_v14 = vcombine.high %v3196_v60, %v3203_v12  ;;  %v3297_v55 = vrot.slane %v3082_v30, %v5779_v0  ;;  %v3422_v38 = vcombine.low %v3212_v8, %v3219_v44 }
 0x692   :  { %v3086_v54 = vpack.i.b16 %v3059_v46, %v3058_v36  ;;  %v3089_v63 = vshrl.u32 %v3059_v46, 16  ;;  %v3395_v33 = vrot.slane %v3388_v10, %v5782_v5  ;;  %v3396_v26 = vcombine.low %v3379_v29, %v3387_v56 }
 0x693   :  { %v3421_v47 = vrot.slane %v4731_v14, %v5779_v0  ;;  %v4732_v35 = vcombine.high %v3212_v8, %v3219_v44  ;;  %v3429_v4 = vrot.slane %v3422_v38, %v5779_v0  ;;  %v3304_v58 = vrot.slane %v3290_v2, %v5779_v0  ;;  %v5116_v8 = vld [vmem:[#allocation10 + $0x20] sm:$0xff]   ;;  %v5117_v44 = vld [vmem:[#allocation10 + $0x28] sm:$0xff]  }
 0x694   :  { %v3090_v59 = vpack.i.b16 %v3089_v63, %v3088_v51  ;;  %v3239_v50 = vcombine.high %v3086_v54, %v5776_v61  ;;  %v3246_v7 = vrot.slane %v3086_v54, %v5779_v0  ;;  %v3403_v16 = vrot.slane %v3396_v26, %v5782_v5  ;;  %5045 = vmatprep.subr.bf16.mxu1 %v5116_v8 }
 0x695   :  { %v3437_v24 = vrot.slane %v4732_v35, %v5779_v0  ;;  %v3438_v11 = vcombine.low %v3413_v49, %v3421_v47  ;;  %5046 = vmatpush3.bf16.msra.mxu1 %v5116_v8  ;;  %v5118_v47 = vld [vmem:[#allocation10 + $0x30] sm:$0xff]  }
 0x696   :  { %v3253_v41 = vrot.slane %v3239_v50, %v5779_v0  ;;  %v3254_v57 = vcombine.low %v3231_v42, %v3246_v7  ;;  %v3255_v45 = vcombine.high %v3231_v42, %v3246_v7  ;;  %v3305_v31 = vcombine.high %v3090_v59, %v5776_v61  ;;  %5047 = vmatprep.subr.bf16.mxu1 %v5117_v44 }
 0x697   :  { %v3312_v3 = vrot.slane %v3090_v59, %v5779_v0  ;;  %v3405_v52 = vcombine.high %v3395_v33, %v3403_v16  ;;  %v3445_v1 = vrot.slane %v3438_v11, %v5782_v5  ;;  %v3446_v60 = vcombine.low %v3429_v4, %v3437_v24 }
 0x698   :  { %v3262_v12 = vrot.slane %v3254_v57, %v5782_v5  ;;  %v3269_v34 = vrot.slane %v3255_v45, %v5782_v5  ;;  %v3270_v28 = vcombine.low %v3238_v20, %v3253_v41  ;;  %v3271_v9 = vcombine.high %v3238_v20, %v3253_v41  ;;  %v5119_v45 = vld [vmem:[#allocation10 + $0x38] sm:$0xff]  }
 0x699   :  { %v3319_v18 = vrot.slane %v3305_v31, %v5779_v0  ;;  %v3320_v21 = vcombine.low %v3297_v55, %v3312_v3  ;;  %v3321_v36 = vcombine.high %v3297_v55, %v3312_v3  ;;  %v3453_v62 = vrot.slane %v3446_v60, %v5782_v5  ;;  %5048 = vmatpush3.bf16.msra.mxu1 %v5117_v44 }
 0x69a   :  { %v3278_v61 = vrot.slane %v3270_v28, %v5782_v5  ;;  %v3285_v32 = vrot.slane %v3271_v9, %v5782_v5  ;;  %v3456_v6 = vcombine.low %v3262_v12, %v3269_v34  ;;  %v4733_v25 = vcombine.high %v3262_v12, %v3269_v34  ;;  %5049 = vmatprep.subr.bf16.mxu1 %v5118_v47 }
 0x69b   :  { %v3328_v30 = vrot.slane %v3320_v21, %v5782_v5  ;;  %v3335_v37 = vrot.slane %v3321_v36, %v5782_v5  ;;  %v3336_v40 = vcombine.low %v3304_v58, %v3319_v18  ;;  %v3337_v22 = vcombine.high %v3304_v58, %v3319_v18 }
 0x69c   :  { %v6450_v29 = vcombine.low %v3445_v1, %v3453_v62  ;;  %v3455_v23 = vcombine.high %v3445_v1, %v3453_v62  ;;  %v3565_v10 = vshrl.u32 %v3405_v52, 16  ;;  %v6452_v43 = vcombine.low %v3395_v33, %v3403_v16 }
 0x69d   :  { %v3344_v42 = vrot.slane %v3336_v40, %v5782_v5  ;;  %v3351_v20 = vrot.slane %v3337_v22, %v5782_v5  ;;  %v3463_v51 = vrot.slane %v3456_v6, %v5779_v0  ;;  %v3471_v46 = vrot.slane %v4733_v25, %v5779_v0  ;;  %5050 = vmatpush3.bf16.msra.mxu1 %v5118_v47  ;;  %v5122_v47 = vld [vmem:[#allocation11 + $0x4] ss:$16 sps:$4 sm:$0xff]  }
 0x69e   :  { %v3564_v48 = vpack.i.b16 %v3455_v23, %v3405_v52  ;;  %v3566_v2 = vshrl.u32 %v3455_v23, 16  ;;  %v3559_v56 = vshrl.u32 %v6452_v43, 16  ;;  %v3560_v49 = vshrl.u32 %v6450_v29, 16  ;;  %5051 = vmatprep.subr.bf16.mxu1 %v5119_v45  ;;  %4016 = vmatprep.subr.bf16.mxu0 %v5122_v47 }
 0x69f   :  { %v3472_v14 = vcombine.low %v3278_v61, %v3285_v32  ;;  %v4734_v55 = vcombine.high %v3278_v61, %v3285_v32  ;;  %v3488_v54 = vcombine.low %v3463_v51, %v3471_v46  ;;  %v3506_v63 = vcombine.low %v3328_v30, %v3335_v37 }
 0x6a0   :  { %3584 = vrot.lane.b32.xlu1 %v3564_v48, %s5514_s2  ;;  %v3561_v38 = vpack.i.b16 %v3560_v49, %v3559_v56  ;;  %v3567_v27 = vpack.i.b16 %v3566_v2, %v3565_v10  ;;  %v4735_v33 = vcombine.high %v3328_v30, %v3335_v37  ;;  %v3522_v26 = vcombine.low %v3344_v42, %v3351_v20  ;;  %v4737_v10 = vld [vmem:[%s6689_s8] ss:$0 sm:$0xff] }
 0x6a1   :  { %v3479_v35 = vrot.slane %v3472_v14, %v5779_v0  ;;  %v3487_v59 = vrot.slane %v4734_v55, %v5779_v0  ;;  %v3513_v50 = vrot.slane %v3506_v63, %v5779_v0  ;;  %v4736_v58 = vcombine.high %v3344_v42, %v3351_v20  ;;  %5052 = vmatpush3.bf16.msra.mxu1 %v5119_v45  ;;  %v5312_v2 = vld [vmem:[#allocation2] sm:$0xff]  ;;  %v5313_v14 = vld [vmem:[#allocation2 + $0x8] sm:$0xff] }
 0x6a2   :  { %3580 = vrot.lane.b32.xlu0 %v3561_v38, %s5519_s27  ;;  %v3521_v7 = vrot.slane %v4735_v33, %v5779_v0  ;;  %v3529_v4 = vrot.slane %v3522_v26, %v5779_v0  ;;  %v3558_v16 = vpack.i.b16 %v6450_v29, %v6452_v43  ;;  %v3495_v41 = vrot.slane %v3488_v54, %v5782_v5  ;;  %v5314_v54 = vld [vmem:[#allocation2 + $0x10] sm:$0xff] }
 0x6a3   :  { %v3496_v24 = vcombine.low %v3479_v35, %v3487_v59  ;;  %v3537_v11 = vrot.slane %v4736_v58, %v5779_v0  ;;  %v5120_v26 = vld [vmem:[#allocation11] ss:$16 sps:$4 sm:$0xff]   ;;  %v5123_v35 = vld [vmem:[#allocation11 + $0x8] ss:$16 sps:$4 sm:$0xff]   ;;  %v5125_v59 = vld [vmem:[#allocation11 + $0xc] ss:$16 sps:$4 sm:$0xff]  }
 0x6a4   :  { %v3538_v53 = vcombine.low %v3513_v50, %v3521_v7  ;;  %v5128_v50 = vld [vmem:[#allocation11 + $0x24] ss:$16 sps:$4 sm:$0xff]   ;;  %v5131_v7 = vld [vmem:[#allocation11 + $0x2c] ss:$16 sps:$4 sm:$0xff]   ;;  %4069 = vmatprep.subr.bf16.mxu1 %v5125_v59  ;;  %4017 = vmatpush1.bf16.msra.mxu0 %v5120_v26  ;;  %v5129_v58 = vld [vmem:[#allocation11 + $0x28] ss:$16 sps:$4 sm:$0xff]  }
 0x6a5   :  { %v3503_v57 = vrot.slane %v3496_v24, %v5782_v5  ;;  %v3546_v31 = vcombine.low %v3529_v4, %v3537_v11  ;;  %v5126_v4 = vld [vmem:[#allocation11 + $0x20] ss:$16 sps:$4 sm:$0xff]   ;;  %4018 = vmatprep.subr.bf16.mxu0 %v5128_v50 }
 0x6a6   :  { %3588 = vrot.lane.b32.xlu0 %v3567_v27, %s5518_s6  ;;  %v3545_v1 = vrot.slane %v3538_v53, %v5782_v5  ;;  %v5315_v27 = vld [vmem:[#allocation2 + $0x18] sm:$0xff] }
 0x6a7   :  { %v3505_v3 = vcombine.high %v3495_v41, %v3503_v57  ;;  %v3504_v52 = vcombine.low %v3495_v41, %v3503_v57  ;;  %v3553_v60 = vrot.slane %v3546_v31, %v5782_v5 }
 0x6a8   :  { %4019 = vmatpush1.bf16.msra.mxu0 %v5126_v4  ;;  %v4746_v4 = vld [vmem:[%s6684_s3] ss:$0 sm:$0xff] }
 0x6a9   :  { %v3554_v12 = vcombine.low %v3545_v1, %v3553_v60  ;;  %v3555_v0 = vcombine.high %v3545_v1, %v3553_v60  ;;  %v3577_v34 = vshrl.u32 %v3505_v3, 16  ;;  %v3571_v28 = vshrl.u32 %v3504_v52, 16 }
 0x6ab   :  { %v3576_v9 = vpack.i.b16 %v3555_v0, %v3505_v3  ;;  %v3578_v18 = vshrl.u32 %v3555_v0, 16  ;;  %v3572_v21 = vshrl.u32 %v3554_v12, 16  ;;  %v3570_v36 = vpack.i.b16 %v3554_v12, %v3504_v52 }
 0x6ad   :  { %3586 = vrot.lane.b32.xlu1 %v3576_v9, %s5514_s2  ;;  %v3573_v62 = vpack.i.b16 %v3572_v21, %v3571_v28  ;;  %v3579_v61 = vpack.i.b16 %v3578_v18, %v3577_v34  ;;  %v5134_v9 = vld [vmem:[#allocation11 + $0x44] ss:$16 sps:$4 sm:$0xff]   ;;  %v5137_v18 = vld [vmem:[#allocation11 + $0x4c] ss:$16 sps:$4 sm:$0xff]   ;;  %v5132_v21 = vld [vmem:[#allocation11 + $0x40] ss:$16 sps:$4 sm:$0xff]  }
 0x6ae   :  { %4020 = vmatprep.subr.bf16.mxu0 %v5134_v9 }
 0x6af   :  { %4021 = vmatpush1.bf16.msra.mxu0 %v5132_v21 }
 0x6b1   :  { %3582 = vrot.lane.b32.xlu1 %v3573_v62, %s5519_s27  ;;  %v5140_v62 = vld [vmem:[#allocation11 + $0x64] ss:$16 sps:$4 sm:$0xff]  }
 0x6b2   :  { %4022 = vmatprep.subr.bf16.mxu0 %v5140_v62  ;;  %v5169_v62 = vld [vmem:[#allocation13 + $0xc0] sm:$0xff]  }
 0x6b5   :  { %3590 = vrot.lane.b32.xlu1 %v3579_v61, %s5518_s6  ;;  %v5143_v61 = vld [vmem:[#allocation11 + $0x6c] ss:$16 sps:$4 sm:$0xff]  }
 0x712   :  { %v3585_v6 = vpop.permute.xlu1 %3584 }
 0x714   :  { %v3581_v32 = vpop.permute.xlu0 %3580 }
 0x715   :  { %v3594_v5 = vsel %vm2111_vm1, %v3558_v16, %v3581_v32  ;;  %v5138_v32 = vld [vmem:[#allocation11 + $0x60] ss:$16 sps:$4 sm:$0xff]  }
 0x716   :  { %v3600_v8 = vsel %vm3598_vm5, %v3594_v5, %v3585_v6  ;;  %v5141_v5 = vld [vmem:[#allocation11 + $0x68] ss:$16 sps:$4 sm:$0xff]   ;;  %4023 = vmatpush1.bf16.msra.mxu0 %v5138_v32  ;;  %v5146_v6 = vld [vmem:[#allocation11 + $0x84] ss:$16 sps:$4 sm:$0xff]  }
 0x717   :  { %4024 = vmatprep.subr.bf16.mxu0 %v5146_v6  ;;  %v5173_v32 = vld [vmem:[#allocation13 + $0xc8] sm:$0xff]  }
 0x718   :  { %v3589_v25 = vpop.permute.xlu0 %3588  ;;  %v5175_v6 = vld [vmem:[#allocation13 + $0x88] sm:$0xff]  }
 0x719   :  { %v3605_v44 = vsel %vm3603_vm6, %v3600_v8, %v3589_v25  ;;  %v5149_v25 = vld [vmem:[#allocation11 + $0x8c] ss:$16 sps:$4 sm:$0xff]   ;;  %v5144_v8 = vld [vmem:[#allocation11 + $0x80] ss:$16 sps:$4 sm:$0xff]  }
 0x71a   :  { %5053 = vmatprep.mubr.bf16.mxu1 %v3605_v44  ;;  %v5147_v44 = vld [vmem:[#allocation11 + $0x88] ss:$16 sps:$4 sm:$0xff]   ;;  %4025 = vmatpush1.bf16.msra.mxu0 %v5144_v8  ;;  %v5178_v8 = vld [vmem:[#allocation13 + $0x10] sm:$0xff]  }
 0x71f   :  { %v3587_v30 = vpop.permute.xlu1 %3586 }
 0x723   :  { %v3583_v37 = vpop.permute.xlu1 %3582 }
 0x724   :  { %v3597_v40 = vsel %vm2111_vm1, %v3570_v36, %v3583_v37  ;;  %v5135_v36 = vld [vmem:[#allocation11 + $0x48] ss:$16 sps:$4 sm:$0xff]   ;;  %v5152_v37 = vld [vmem:[#allocation11 + $0xa4] ss:$16 sps:$4 sm:$0xff]  }
 0x725   :  { %v3602_v29 = vsel %vm3598_vm5, %v3597_v40, %v3587_v30  ;;  %v5150_v30 = vld [vmem:[#allocation11 + $0xa0] ss:$16 sps:$4 sm:$0xff]   ;;  %v5153_v40 = vld [vmem:[#allocation11 + $0xa8] ss:$16 sps:$4 sm:$0xff]   ;;  %4026 = vmatprep.subr.bf16.mxu0 %v5152_v37 }
 0x726   :  { %4027 = vmatpush1.bf16.msra.mxu0 %v5150_v30  ;;  %v5180_v30 = vld [vmem:[#allocation13 + $0x58] sm:$0xff]  }
 0x727   :  { %v3591_v22 = vpop.permute.xlu1 %3590  ;;  %v5181_v37 = vld [vmem:[#allocation13 + $0xd8] sm:$0xff]  }
 0x728   :  { %v3608_v23 = vsel %vm3603_vm6, %v3602_v29, %v3591_v22  ;;  %v5155_v22 = vld [vmem:[#allocation11 + $0xac] ss:$16 sps:$4 sm:$0xff]   ;;  %v5158_v29 = vld [vmem:[#allocation11 + $0xc4] ss:$16 sps:$4 sm:$0xff]  }
 0x729   :  { %5054 = vmatmul.mubr.bf16.vlgmr.msra.gmra.mrb[32].mxu1 %v3608_v23  ;;  %v5161_v23 = vld [vmem:[#allocation11 + $0xcc] ss:$16 sps:$4 sm:$0xff]   ;;  %4028 = vmatprep.subr.bf16.mxu0 %v5158_v29  ;;  %v5184_v29 = vld [vmem:[#allocation13 + $0x60] sm:$0xff]  }
 0x72a   :  { %4101 = vmatprep.mubr.bf16.mxu1 %v5517_v39  ;;  %4070 = vmatpush1.bf16.msra.mxu1 %v5123_v35 }
 0x72b   :  { %4071 = vmatprep.subr.bf16.mxu1 %v5131_v7 }
 0x72e   :  { %4072 = vmatpush1.bf16.msra.mxu1 %v5129_v58 }
 0x72f   :  { %4073 = vmatprep.subr.bf16.mxu1 %v5137_v18 }
 0x732   :  { %4074 = vmatpush1.bf16.msra.mxu1 %v5135_v36  ;;  %v5168_v36 = vld [vmem:[#allocation13 + $0x40] sm:$0xff]  }
 0x733   :  { %4075 = vmatprep.subr.bf16.mxu1 %v5143_v61  ;;  %v5171_v61 = vld [vmem:[#allocation13 + $0x80] sm:$0xff]  }
 0x736   :  { %4076 = vmatpush1.bf16.msra.mxu1 %v5141_v5  ;;  %v5174_v5 = vld [vmem:[#allocation13 + $0x8] sm:$0xff]  }
 0x737   :  { %4077 = vmatprep.subr.bf16.mxu1 %v5149_v25  ;;  %v5177_v25 = vld [vmem:[#allocation13 + $0xd0] sm:$0xff]  }
 0x73a   :  { %4078 = vmatpush1.bf16.msra.mxu1 %v5147_v44  ;;  %v5179_v44 = vld [vmem:[#allocation13 + $0x90] sm:$0xff]  }
 0x73b   :  { %4079 = vmatprep.subr.bf16.mxu1 %v5155_v22  ;;  %v5183_v22 = vld [vmem:[#allocation13 + $0x98] sm:$0xff]  }
 0x73e   :  { %4080 = vmatpush1.bf16.msra.mxu1 %v5153_v40  ;;  %v5182_v40 = vld [vmem:[#allocation13 + $0x18] sm:$0xff]  }
 0x73f   :  { %4081 = vmatprep.subr.bf16.mxu1 %v5161_v23  ;;  %v5185_v23 = vld [vmem:[#allocation13 + $0xe0] sm:$0xff]  }
 0x7fc   :  { %v5055_v43 = vpop.f32.mrb[32].mxu1 }
 0x7fd   :  { %v3715_v42 = vpop.f32.mrb[33].mxu1  ;;  %v3724_v48 = vadd.f32 %v5055_v43, %v4737_v10  ;;  %v5159_v43 = vld [vmem:[#allocation11 + $0xc8] ss:$16 sps:$4 sm:$0xff]  }
 0x7fe   :  { %v3716_v20 = vadd.f32 %v4737_v10, %v3715_v42  ;;  %v5056_v51 = vpop.f32.mrb[34].mxu1  ;;  %v5164_v42 = vld [vmem:[#allocation11 + $0xe4] ss:$16 sps:$4 sm:$0xff]   ;;  %4082 = vmatpush1.bf16.msra.mxu1 %v5159_v43 }
 0x7ff   :  { %v3718_v46 = vpop.f32.mrb[35].mxu1  ;;  %v6489_v63 = vadd.f32 %v5314_v54, %v3724_v48  ;;  %v3727_v38 = vadd.f32 %v5056_v51, %v4737_v10  ;;  %v5162_v51 = vld [vmem:[#allocation11 + $0xe0] ss:$16 sps:$4 sm:$0xff]  }
 0x800   :  { %v6484_v56 = vadd.f32 %v5312_v2, %v3716_v20  ;;  %v3719_v49 = vadd.f32 %v4737_v10, %v3718_v46  ;;  %v5156_v10 = vld [vmem:[#allocation11 + $0xc0] ss:$16 sps:$4 sm:$0xff]   ;;  %v5167_v20 = vld [vmem:[#allocation11 + $0xec] ss:$16 sps:$4 sm:$0xff]   ;;  %v5165_v46 = vld [vmem:[#allocation11 + $0xe8] ss:$16 sps:$4 sm:$0xff]  }
 0x801   :  { %v6493_v33 = vadd.f32 %v5315_v27, %v3727_v38  ;;  %4029 = vmatpush1.bf16.msra.mxu0 %v5156_v10  ;;  %4083 = vmatprep.subr.bf16.mxu1 %v5167_v20  ;;  %v5186_v10 = vld [vmem:[#allocation13 + $0x20] sm:$0xff]   ;;  %v5189_v20 = vld [vmem:[#allocation13 + $0xe8] sm:$0xff]  }
 0x802   :  { %v6486_v55 = vadd.f32 %v5313_v14, %v3719_v49  ;;  %3736 = vadd.xlane.f32.xlu0 %v6484_v56  ;;  %4030 = vmatprep.subr.bf16.mxu0 %v5164_v42  ;;  %v5187_v43 = vld [vmem:[#allocation13 + $0xa0] sm:$0xff]   ;;  %v5188_v42 = vld [vmem:[#allocation13 + $0x68] sm:$0xff]  }
 0x803   :  { %4084 = vmatpush1.bf16.msra.mxu1 %v5165_v46  ;;  %v5191_v46 = vld [vmem:[#allocation13 + $0xa8] sm:$0xff]  }
 0x804   :  { %3738 = vadd.xlane.f32.xlu1 %v6486_v55  ;;  %4893 = vmatprep.subr.bf16.mxu1 %v5169_v62 }
 0x805   :  { %4031 = vmatpush1.bf16.msra.mxu0 %v5162_v51  ;;  %v5190_v51 = vld [vmem:[#allocation13 + $0x28] sm:$0xff]  }
 0x806   :  { %3740 = vadd.xlane.f32.xlu0 %v6489_v63  ;;  %4865 = vmatprep.subr.bf16.mxu0 %v5168_v36 }
 0x80a   :  { %3742 = vadd.xlane.f32.xlu0 %v6493_v33 }
 0x88f   :  { %v3737_v16 = vpop.xlane.xlu0 %3736 }
 0x890   :  { %v3744_v24 = vmul.f32 0.0078125, %v3737_v16 }
 0x891   :  { %v3739_v11 = vpop.xlane.xlu1 %3738 }
 0x892   :  { %v6497_v53 = vsub.f32 %v6484_v56, %v3744_v24  ;;  %v3745_v41 = vmul.f32 0.0078125, %v3739_v11 }
 0x893   :  { %v3741_v57 = vpop.xlane.xlu0 %3740 }
 0x894   :  { %v6500_v45 = vsub.f32 %v6486_v55, %v3745_v41  ;;  %v3746_v31 = vmul.f32 0.0078125, %v3741_v57  ;;  %v3752_v3 = vmul.f32 %v6497_v53, %v6497_v53  ;;  %v4747_v57 = vld [vmem:[%s6685_s4] ss:$0 sm:$0xff] }
 0x896   :  { %v6505_v52 = vsub.f32 %v6489_v63, %v3746_v31  ;;  %3756 = vadd.xlane.f32.xlu0 %v3752_v3  ;;  %v3753_v1 = vmul.f32 %v6500_v45, %v6500_v45 }
 0x897   :  { %v3743_v60 = vpop.xlane.xlu0 %3742 }
 0x898   :  { %v3747_v12 = vmul.f32 0.0078125, %v3743_v60  ;;  %3758 = vadd.xlane.f32.xlu1 %v3753_v1  ;;  %v3754_v0 = vmul.f32 %v6505_v52, %v6505_v52 }
 0x89a   :  { %v6512_v34 = vsub.f32 %v6493_v33, %v3747_v12  ;;  %3760 = vadd.xlane.f32.xlu0 %v3754_v0 }
 0x89c   :  { %v3755_v28 = vmul.f32 %v6512_v34, %v6512_v34 }
 0x89e   :  { %3762 = vadd.xlane.f32.xlu1 %v3755_v28 }
 0x923   :  { %v3757_v48 = vpop.xlane.xlu0 %3756 }
 0x924   :  { %v3764_v2 = vmul.f32 0.0078125, %v3757_v48  ;;  %v5192_v48 = vld [vmem:[#allocation13 + $0x70] sm:$0xff]  }
 0x925   :  { %v3759_v49 = vpop.xlane.xlu1 %3758 }
 0x926   :  { %v3768_v14 = vadd.f32 1e-05, %v3764_v2  ;;  %v3765_v54 = vmul.f32 0.0078125, %v3759_v49  ;;  %v5193_v2 = vld [vmem:[#allocation13 + $0xf0] sm:$0xff]  }
 0x927   :  { %v3761_v38 = vpop.xlane.xlu0 %3760  ;;  %v5194_v49 = vld [vmem:[#allocation13 + $0x30] sm:$0xff]  }
 0x928   :  { %5272 = vrsqrt.f32 %v3768_v14  ;;  %v3769_v27 = vadd.f32 1e-05, %v3765_v54  ;;  %v3766_v26 = vmul.f32 0.0078125, %v3761_v38  ;;  %v5195_v14 = vld [vmem:[#allocation13 + $0xb0] sm:$0xff]   ;;  %v5196_v54 = vld [vmem:[#allocation13 + $0x78] sm:$0xff]  }
 0x929   :  { %v5197_v38 = vld [vmem:[#allocation13 + $0xf8] sm:$0xff]  }
 0x92a   :  { %5274 = vrsqrt.f32 %v3769_v27  ;;  %v3770_v47 = vadd.f32 1e-05, %v3766_v26  ;;  %v5198_v27 = vld [vmem:[#allocation13 + $0x38] sm:$0xff]  }
 0x92b   :  { %v3763_v35 = vpop.xlane.xlu1 %3762  ;;  %v5199_v26 = vld [vmem:[#allocation13 + $0xb8] sm:$0xff]  }
 0x92c   :  { %5276 = vrsqrt.f32 %v3770_v47  ;;  %v3767_v59 = vmul.f32 0.0078125, %v3763_v35  ;;  %v3834_v47 = vld [vmem:[%s6691_s10] sm:$0xf] }
 0x92d   :  { %v6533_v35 = vrot.slane %v3834_v47, %v246_v15 }
 0x92e   :  { %v3771_v50 = vadd.f32 1e-05, %v3767_v59  ;;  %v6537_v59 = vrot.slane %v3834_v47, %v254_v19 }
 0x930   :  { %5278 = vrsqrt.f32 %v3771_v50  ;;  %v3850_v50 = vsub.s32 3, %v5723_v13 }
 0x932   :  { %v5273_v7 = vpop.eup %5272  ;;  %v6546_v15 = vrot.slane %v3834_v47, %v3850_v50 }
 0x933   :  { %v3776_v58 = vmul.f32 %v5273_v7, %v6497_v53 }
 0x934   :  { %v5275_v16 = vpop.eup %5274 }
 0x935   :  { %v3777_v24 = vmul.f32 %v5275_v16, %v6500_v45  ;;  %v3786_v11 = vmul.f32 %v4746_v4, %v3776_v58  ;;  %v6542_v58 = vrot.slane %v3834_v47, %v250_v17 }
 0x936   :  { %v5277_v41 = vpop.eup %5276 }
 0x937   :  { %v3787_v31 = vmul.f32 %v4746_v4, %v3777_v24  ;;  %v3796_v3 = vadd.f32 %v4747_v57, %v3786_v11  ;;  %v3778_v60 = vmul.f32 %v5277_v41, %v6505_v52  ;;  %v5170_v52 = vld [vmem:[#allocation13] sm:$0xff]  }
 0x939   :  { %v3797_v1 = vadd.f32 %v4747_v57, %v3787_v31  ;;  %v3788_v53 = vmul.f32 %v4746_v4, %v3778_v60 }
 0x93a   :  { %v5279_v12 = vpop.eup %5278 }
 0x93b   :  { %v3800_v0 = vpack.c.bf16 %v3797_v1, %v3796_v3  ;;  %v3779_v28 = vmul.f32 %v5279_v12, %v6512_v34  ;;  %v3798_v18 = vadd.f32 %v4747_v57, %v3788_v53  ;;  %v5172_v34 = vld [vmem:[#allocation13 + $0x48] sm:$0xff]  }
 0x93d   :  { %4049 = vmatmul.mubr.bf16.vlgmr.msra.gmra.mrb[44].mxu0 %v3800_v0  ;;  %4102 = vmatmul.mubr.bf16.vlgmr.msra.gmra.mrb[36].mxu1 %v3800_v0  ;;  %v3789_v9 = vmul.f32 %v4746_v4, %v3779_v28 }
 0x93e   :  { %4058 = vmatprep.mubr.bf16.mxu0 %v5517_v39  ;;  %4111 = vmatprep.mubr.bf16.mxu1 %v5517_v39  ;;  %v5176_v39 = vld [vmem:[#allocation13 + $0x50] sm:$0xff]  }
 0x93f   :  { %v3799_v45 = vadd.f32 %v4747_v57, %v3789_v9  ;;  %4866 = vmatpush3.bf16.msra.mxu0 %v5170_v52  ;;  %4894 = vmatpush3.bf16.msra.mxu1 %v5171_v61 }
 0x940   :  { %4867 = vmatprep.subr.bf16.mxu0 %v5172_v34  ;;  %4895 = vmatprep.subr.bf16.mxu1 %v5173_v32 }
 0x941   :  { %v3801_v21 = vpack.c.bf16 %v3799_v45, %v3798_v18 }
 0x943   :  { %4868 = vmatpush3.bf16.msra.mxu0 %v5174_v5  ;;  %4896 = vmatpush3.bf16.msra.mxu1 %v5175_v6 }
 0x944   :  { %4869 = vmatprep.subr.bf16.mxu0 %v5176_v39  ;;  %4897 = vmatprep.subr.bf16.mxu1 %v5177_v25 }
 0x945   :  { %4059 = vmatmul.mubr.bf16.gmra.mrb[48].mxu0 %v3801_v21  ;;  %4112 = vmatmul.mubr.bf16.gmra.mrb[40].mxu1 %v3801_v21 }
 0x947   :  { %4870 = vmatpush3.bf16.msra.mxu0 %v5178_v8  ;;  %4898 = vmatpush3.bf16.msra.mxu1 %v5179_v44 }
 0x948   :  { %4871 = vmatprep.subr.bf16.mxu0 %v5180_v30  ;;  %4899 = vmatprep.subr.bf16.mxu1 %v5181_v37 }
 0x94b   :  { %4872 = vmatpush3.bf16.msra.mxu0 %v5182_v40  ;;  %4900 = vmatpush3.bf16.msra.mxu1 %v5183_v22 }
 0x94c   :  { %4873 = vmatprep.subr.bf16.mxu0 %v5184_v29  ;;  %4901 = vmatprep.subr.bf16.mxu1 %v5185_v23 }
 0x94f   :  { %4874 = vmatpush3.bf16.msra.mxu0 %v5186_v10  ;;  %4902 = vmatpush3.bf16.msra.mxu1 %v5187_v43 }
 0x950   :  { %4875 = vmatprep.subr.bf16.mxu0 %v5188_v42  ;;  %4903 = vmatprep.subr.bf16.mxu1 %v5189_v20 }
 0x953   :  { %4876 = vmatpush3.bf16.msra.mxu0 %v5190_v51  ;;  %4904 = vmatpush3.bf16.msra.mxu1 %v5191_v46 }
 0x954   :  { %4877 = vmatprep.subr.bf16.mxu0 %v5192_v48  ;;  %4905 = vmatprep.subr.bf16.mxu1 %v5193_v2 }
 0x957   :  { %4878 = vmatpush3.bf16.msra.mxu0 %v5194_v49  ;;  %4906 = vmatpush3.bf16.msra.mxu1 %v5195_v14 }
 0x958   :  { %4879 = vmatprep.subr.bf16.mxu0 %v5196_v54  ;;  %4907 = vmatprep.subr.bf16.mxu1 %v5197_v38 }
 0x95b   :  { %4880 = vmatpush3.bf16.msra.mxu0 %v5198_v27  ;;  %4908 = vmatpush3.bf16.msra.mxu1 %v5199_v26 }
 0xa10   :  { %v4050_v7 = vpop.f32.mrb[44].mxu0  ;;  %v4103_v4 = vpop.f32.mrb[36].mxu1 }
 0xa11   :  { %v4051_v16 = vadd.f32 %v4050_v7, %v6533_v35  ;;  %v4104_v24 = vadd.f32 %v4103_v4, %v6537_v59  ;;  %v4052_v11 = vpop.f32.mrb[45].mxu0  ;;  %v4105_v41 = vpop.f32.mrb[37].mxu1 }
 0xa12   :  { %v4054_v57 = vpop.f32.mrb[46].mxu0  ;;  %v4107_v31 = vpop.f32.mrb[38].mxu1  ;;  %v6549_v1 = vadd.f32 %v4052_v11, %v6542_v58  ;;  %v6559_v9 = vadd.f32 %v4105_v41, %v6546_v15 }
 0xa13   :  { %v4138_v19 = vmul.f32 0.044715, %v4051_v16  ;;  %v4140_v3 = vmul.f32 0.044715, %v4104_v24  ;;  %v4055_v60 = vadd.f32 %v4054_v57, %v6533_v35  ;;  %v6553_v13 = vadd.f32 %v4107_v31, %v6537_v59  ;;  %v4056_v17 = vpop.f32.mrb[47].mxu0  ;;  %v4109_v12 = vpop.f32.mrb[39].mxu1 }
 0xa14   :  { %v6556_v53 = vadd.f32 %v4056_v17, %v6542_v58  ;;  %v6562_v18 = vadd.f32 %v4109_v12, %v6546_v15  ;;  %v6564_v21 = vmul.f32 0.5, %v4051_v16  ;;  %v4139_v61 = vmul.f32 0.044715, %v6549_v1 }
 0xa15   :  { %v4154_v0 = vmul.f32 %v4138_v19, %v4051_v16  ;;  %v4156_v28 = vmul.f32 %v4140_v3, %v4104_v24  ;;  %v4142_v45 = vmul.f32 0.044715, %v4055_v60  ;;  %v4144_v52 = vmul.f32 0.044715, %v6553_v13 }
 0xa16   :  { %v4143_v32 = vmul.f32 0.044715, %v6556_v53  ;;  %v6569_v25 = vmul.f32 0.5, %v4104_v24  ;;  %v4141_v40 = vmul.f32 0.044715, %v6559_v9  ;;  %v4155_v2 = vmul.f32 %v4139_v61, %v6549_v1 }
 0xa17   :  { %v4170_v36 = vmul.f32 %v4154_v0, %v4051_v16  ;;  %v4172_v62 = vmul.f32 %v4156_v28, %v4104_v24  ;;  %v4158_v34 = vmul.f32 %v4142_v45, %v4055_v60  ;;  %v4160_v44 = vmul.f32 %v4144_v52, %v6553_v13 }
 0xa18   :  { %v4060_v5 = vpop.f32.mrb[48].mxu0  ;;  %v4113_v6 = vpop.f32.mrb[40].mxu1  ;;  %v4145_v29 = vmul.f32 0.044715, %v6562_v18  ;;  %v4159_v14 = vmul.f32 %v4143_v32, %v6556_v53  ;;  %v4157_v47 = vmul.f32 %v4141_v40, %v6559_v9  ;;  %v4171_v41 = vmul.f32 %v4155_v2, %v6549_v1 }
 0xa19   :  { %v4186_v39 = vadd.f32 %v4170_v36, %v4051_v16  ;;  %v4188_v8 = vadd.f32 %v4172_v62, %v4104_v24  ;;  %v4062_v30 = vpop.f32.mrb[49].mxu0  ;;  %v4115_v37 = vpop.f32.mrb[41].mxu1  ;;  %v4174_v22 = vmul.f32 %v4158_v34, %v4055_v60  ;;  %v6575_v23 = vadd.f32 %v4060_v5, %v6533_v35 }
 0xa1a   :  { %v4064_v10 = vpop.f32.mrb[50].mxu0  ;;  %v4117_v43 = vpop.f32.mrb[42].mxu1  ;;  %v4176_v51 = vmul.f32 %v4160_v44, %v6553_v13  ;;  %v6581_v54 = vadd.f32 %v4113_v6, %v6537_v59  ;;  %v6586_v26 = vadd.f32 %v4062_v30, %v6542_v58  ;;  %v4161_v7 = vmul.f32 %v4145_v29, %v6562_v18 }
 0xa1b   :  { %v4202_v42 = vmul.f32 0.7978846, %v4186_v39  ;;  %v4204_v20 = vmul.f32 0.7978846, %v4188_v8  ;;  %v4066_v46 = vpop.f32.mrb[51].mxu0  ;;  %v4119_v48 = vpop.f32.mrb[43].mxu1  ;;  %v4190_v49 = vadd.f32 %v4174_v22, %v4055_v60  ;;  %v6592_v24 = vadd.f32 %v4115_v37, %v6546_v15 }
 0xa1c   :  { %v4192_v38 = vadd.f32 %v4176_v51, %v6553_v13  ;;  %v4146_v27 = vmul.f32 0.044715, %v6575_v23  ;;  %v4147_v16 = vmul.f32 0.044715, %v6586_v26  ;;  %v6595_v11 = vadd.f32 %v4064_v10, %v6533_v35 }
 0xa1d   :  { %5280 = vtanh.f32 %v4202_v42  ;;  %v4206_v50 = vmul.f32 0.7978846, %v4190_v49  ;;  %v4175_v57 = vmul.f32 %v4159_v14, %v6556_v53  ;;  %v6600_v31 = vadd.f32 %v4117_v43, %v6537_v59 }
 0xa1e   :  { %5282 = vtanh.f32 %v4204_v20  ;;  %v4208_v4 = vmul.f32 0.7978846, %v4192_v38  ;;  %v4162_v19 = vmul.f32 %v4146_v27, %v6575_v23  ;;  %v4148_v3 = vmul.f32 0.044715, %v6581_v54 }
 0xa1f   :  { %5284 = vtanh.f32 %v4206_v50  ;;  %v4149_v17 = vmul.f32 0.044715, %v6592_v24  ;;  %v4126_v12 = vmul.f32 0.5, %v4055_v60  ;;  %v4163_v0 = vmul.f32 %v4147_v16, %v6586_v26 }
 0xa20   :  { %5286 = vtanh.f32 %v4208_v4  ;;  %v6607_v35 = vadd.f32 %v4066_v46, %v6542_v58  ;;  %v6610_v28 = vadd.f32 %v4119_v48, %v6546_v15  ;;  %v4173_v45 = vmul.f32 %v4157_v47, %v6559_v9 }
 0xa21   :  { %v4177_v59 = vmul.f32 %v4161_v7, %v6562_v18  ;;  %v4150_v36 = vmul.f32 0.044715, %v6595_v11  ;;  %v4152_v62 = vmul.f32 0.044715, %v6600_v31  ;;  %v4165_v52 = vmul.f32 %v4149_v17, %v6592_v24 }
 0xa22   :  { %v4151_v60 = vmul.f32 0.044715, %v6607_v35  ;;  %v4153_v61 = vmul.f32 0.044715, %v6610_v28  ;;  %v4187_v58 = vadd.f32 %v4171_v41, %v6549_v1  ;;  %v4128_v34 = vmul.f32 0.5, %v6553_v13 }
 0xa23   :  { %v4178_v15 = vmul.f32 %v4162_v19, %v6575_v23  ;;  %v4164_v32 = vmul.f32 %v4148_v3, %v6581_v54  ;;  %v4191_v5 = vadd.f32 %v4175_v57, %v6556_v53  ;;  %v4179_v6 = vmul.f32 %v4163_v0, %v6586_v26 }
 0xa24   :  { %v4167_v39 = vmul.f32 %v4151_v60, %v6607_v35  ;;  %v4169_v8 = vmul.f32 %v4153_v61, %v6610_v28  ;;  %v4203_v44 = vmul.f32 0.7978846, %v4187_v58  ;;  %v4166_v37 = vmul.f32 %v4150_v36, %v6595_v11 }
 0xa25   :  { %v4207_v40 = vmul.f32 0.7978846, %v4191_v5  ;;  %v4189_v22 = vadd.f32 %v4173_v45, %v6559_v9  ;;  %v4193_v13 = vadd.f32 %v4177_v59, %v6562_v18  ;;  %v4181_v10 = vmul.f32 %v4165_v52, %v6592_v24 }
 0xa26   :  { %v4168_v43 = vmul.f32 %v4152_v62, %v6600_v31  ;;  %v4183_v42 = vmul.f32 %v4167_v39, %v6607_v35  ;;  %5288 = vtanh.f32 %v4203_v44  ;;  %v4180_v2 = vmul.f32 %v4164_v32, %v6581_v54 }
 0xa27   :  { %v5281_v30 = vpop.eup %5280  ;;  %5290 = vtanh.f32 %v4207_v40  ;;  %v4205_v20 = vmul.f32 0.7978846, %v4189_v22  ;;  %v4209_v51 = vmul.f32 0.7978846, %v4193_v13  ;;  %v4185_v49 = vmul.f32 %v4169_v8, %v6610_v28 }
 0xa28   :  { %v5283_v29 = vpop.eup %5282  ;;  %v4234_v46 = vadd.f32 1.0, %v5281_v30  ;;  %v4195_v38 = vadd.f32 %v4179_v6, %v6586_v26  ;;  %v4182_v47 = vmul.f32 %v4166_v37, %v6595_v11  ;;  %v4199_v7 = vadd.f32 %v4183_v42, %v6607_v35 }
 0xa29   :  { %v5285_v48 = vpop.eup %5284  ;;  %v4236_v14 = vadd.f32 1.0, %v5283_v29  ;;  %5292 = vtanh.f32 %v4205_v20  ;;  %v4184_v4 = vmul.f32 %v4168_v43, %v6600_v31  ;;  %v4197_v17 = vadd.f32 %v4181_v10, %v6592_v24 }
 0xa2a   :  { %v5287_v27 = vpop.eup %5286  ;;  %v4238_v50 = vadd.f32 1.0, %v5285_v48  ;;  %5294 = vtanh.f32 %v4209_v51  ;;  %v4211_v41 = vmul.f32 0.7978846, %v4195_v38  ;;  %v4250_v57 = vmul.f32 %v4234_v46, %v6564_v21 }
 0xa2b   :  { %v4240_v16 = vadd.f32 1.0, %v5287_v27  ;;  %v4215_v3 = vmul.f32 0.7978846, %v4199_v7  ;;  %v4252_v0 = vmul.f32 %v4236_v14, %v6569_v25  ;;  %v4201_v59 = vadd.f32 %v4185_v49, %v6610_v28 }
 0xa2c   :  { %v4254_v19 = vmul.f32 %v4238_v50, %v4126_v12  ;;  %5296 = vtanh.f32 %v4211_v41  ;;  %v4213_v62 = vmul.f32 0.7978846, %v4197_v17  ;;  %v4194_v61 = vadd.f32 %v4178_v15, %v6575_v23 }
 0xa2d   :  { %v4256_v45 = vmul.f32 %v4240_v16, %v4128_v34  ;;  %5298 = vtanh.f32 %v4215_v3  ;;  %v4217_v60 = vmul.f32 0.7978846, %v4201_v59  ;;  %v4198_v58 = vadd.f32 %v4182_v47, %v6595_v11 }
 0xa2e   :  { %v4266_v36 = vpack.c.bf16 %v4254_v19, %v4250_v57  ;;  %5300 = vtanh.f32 %v4213_v62  ;;  %v4196_v21 = vadd.f32 %v4180_v2, %v6581_v54  ;;  %v4210_v32 = vmul.f32 0.7978846, %v4194_v61 }
 0xa2f   :  { %v4268_v52 = vpack.c.bf16 %v4256_v45, %v4252_v0  ;;  %5302 = vtanh.f32 %v4217_v60  ;;  %v4214_v25 = vmul.f32 0.7978846, %v4198_v58  ;;  %v4200_v34 = vadd.f32 %v4184_v4, %v6600_v31 }
 0xa30   :  { %v5289_v12 = vpop.eup %5288  ;;  %v4123_v6 = vmul.f32 0.5, %v6549_v1  ;;  %v4212_v8 = vmul.f32 0.7978846, %v4196_v21  ;;  %v4127_v44 = vmul.f32 0.5, %v6556_v53  ;;  %5304 = vtanh.f32 %v4210_v32 }
 0xa31   :  { %v5291_v5 = vpop.eup %5290  ;;  %v4235_v39 = vadd.f32 1.0, %v5289_v12  ;;  %v4216_v15 = vmul.f32 0.7978846, %v4200_v34  ;;  %5306 = vtanh.f32 %v4214_v25  ;;  %v4125_v10 = vmul.f32 0.5, %v6559_v9 }
 0xa32   :  { %v4239_v30 = vadd.f32 1.0, %v5291_v5  ;;  %5308 = vtanh.f32 %v4212_v8  ;;  %v4129_v43 = vmul.f32 0.5, %v6562_v18  ;;  %v4131_v2 = vmul.f32 0.5, %v6586_v26 }
 0xa33   :  { %v5293_v37 = vpop.eup %5292  ;;  %v4251_v22 = vmul.f32 %v4235_v39, %v4123_v6  ;;  %5310 = vtanh.f32 %v4216_v15  ;;  %v4135_v49 = vmul.f32 0.5, %v6607_v35  ;;  %v4133_v7 = vmul.f32 0.5, %v6592_v24 }
 0xa34   :  { %v5295_v40 = vpop.eup %5294  ;;  %v4255_v13 = vmul.f32 %v4239_v30, %v4127_v44  ;;  %v4237_v29 = vadd.f32 1.0, %v5293_v37  ;;  %v4137_v4 = vmul.f32 0.5, %v6610_v28  ;;  %v4130_v0 = vmul.f32 0.5, %v6575_v23 }
 0xa35   :  { %v4241_v42 = vadd.f32 1.0, %v5295_v40  ;;  %v4134_v45 = vmul.f32 0.5, %v6595_v11  ;;  %v4132_v24 = vmul.f32 0.5, %v6581_v54  ;;  %v4780_v11 = vld [vmem:[%s6693_s12] ss:$0 sm:$0xff]  ;;  %s5524_s12 = smov [#allocation14]  }
 0xa36   :  { %v5297_v1 = vpop.eup %5296  ;;  %v4267_v20 = vpack.c.bf16 %v4255_v13, %v4251_v22  ;;  %v4253_v53 = vmul.f32 %v4237_v29, %v4125_v10  ;;  %s4648_s26 = sshll.u32 %s5524_s12, 4  ;;  %s4649_s26 = int_to_ptr.vmem [resolvable:$true] %s4648_s26 }
 0xa37   :  { %v5299_v51 = vpop.eup %5298  ;;  %v4257_v46 = vmul.f32 %v4241_v42, %v4129_v43  ;;  %v4243_v48 = vadd.f32 1.0, %v5297_v1  ;;  %s5470_s16 = scalar_lea.vmem %s4649_s26, 512  ;;  %p5475_p1 = scmp.lt.s32.totalorder %s4649_s26, %s4649_s26 }
 0xa38   :  { %4569 = vmatprep.mubr.bf16.mxu0 %v4267_v20  ;;  %v4247_v14 = vadd.f32 1.0, %v5299_v51  ;;  %v5301_v38 = vpop.eup %5300  ;;  %p5471_p0 = scmp.ne.s32.totalorder %s4649_s26, %s5470_s16  ;;  %p5476_p2 = scmp.lt.s32.totalorder %s5470_s16, %s5470_s16 }
 0xa39   :  { %v4269_v27 = vpack.c.bf16 %v4257_v46, %v4253_v53  ;;  %4570 = vmatmul.mubr.bf16.vlgmr.msra.gmra.mrb[52].mxu0 %v4266_v36  ;;  %v5303_v9 = vpop.eup %5302  ;;  %v4259_v47 = vmul.f32 %v4243_v48, %v4131_v2  ;;  %v4245_v50 = vadd.f32 1.0, %v5301_v38 }
 0xa3a   :  { %v4263_v18 = vmul.f32 %v4247_v14, %v4135_v49  ;;  %v4249_v16 = vadd.f32 1.0, %v5303_v9  ;;  %v5305_v41 = vpop.eup %5304  ;;  %p5477_p3 = por %p5476_p2, %p5475_p1 }
 0xa3b   :  { %4618 = vmatprep.mubr.bf16.mxu1 %v4269_v27  ;;  %v5307_v26 = vpop.eup %5306  ;;  %v4261_v19 = vmul.f32 %v4245_v50, %v4133_v7  ;;  %v4242_v3 = vadd.f32 1.0, %v5305_v41 }
 0xa3c   :  { %4619 = vmatmul.mubr.bf16.vlgmr.msra.gmra.mrb[44].mxu1 %v4268_v52  ;;  %v4271_v57 = vpack.c.bf16 %v4263_v18, %v4259_v47  ;;  %v4265_v35 = vmul.f32 %v4249_v16, %v4137_v4  ;;  %v5309_v17 = vpop.eup %5308  ;;  %v4246_v59 = vadd.f32 1.0, %v5307_v26  ;;  %v4136_v52 = vmul.f32 0.5, %v6600_v31  ;;  %p5478_p4 = pnand %p5477_p3, %p5471_p0 }
 0xa3d   :  { %v5311_v36 = vpop.eup %5310  ;;  %v4244_v28 = vadd.f32 1.0, %v5309_v17  ;;  %v4258_v60 = vmul.f32 %v4242_v3, %v4130_v0 }
 0xa3e   :  { %4577 = vmatprep.mubr.bf16.mxu0 %v4271_v57  ;;  %v4273_v62 = vpack.c.bf16 %v4265_v35, %v4261_v19  ;;  %v4262_v61 = vmul.f32 %v4246_v59, %v4134_v45  ;;  %v4248_v58 = vadd.f32 1.0, %v5311_v36 }
 0xa3f   :  { %v4260_v12 = vmul.f32 %v4244_v28, %v4132_v24 }
 0xa40   :  { %4626 = vmatprep.mubr.bf16.mxu1 %v4273_v62  ;;  %v4270_v21 = vpack.c.bf16 %v4262_v61, %v4258_v60  ;;  %v4264_v32 = vmul.f32 %v4248_v58, %v4136_v52 }
 0xa42   :  { %4578 = vmatmul.mubr.bf16.gmra.mrb[56].mxu0 %v4270_v21  ;;  %v4272_v25 = vpack.c.bf16 %v4264_v32, %v4260_v12 }
 0xa44   :  { %4627 = vmatmul.mubr.bf16.gmra.mrb[48].mxu1 %v4272_v25 }
 0xb0c   :  { %v4881_v23 = vpop.f32.mrb[52].mxu0 }
 0xb0d   :  { %v4882_v34 = vpop.f32.mrb[53].mxu0 }
 0xb0e   :  { %v4883_v54 = vadd.f32 %v4882_v34, %v4881_v23  ;;  %v4884_v5 = vpop.f32.mrb[54].mxu0 }
 0xb0f   :  { %v4909_v6 = vpop.f32.mrb[44].mxu1  ;;  %v4885_v39 = vpop.f32.mrb[55].mxu0 }
 0xb10   :  { %v4572_v8 = vadd.f32 %v4883_v54, %v4780_v11  ;;  %v4910_v31 = vpop.f32.mrb[45].mxu1  ;;  %v4886_v44 = vadd.f32 %v4885_v39, %v4884_v5 }
 0xb11   :  { %v4911_v30 = vadd.f32 %v4910_v31, %v4909_v6  ;;  %v4912_v15 = vpop.f32.mrb[46].mxu1 }
 0xb12   :  { %v4575_v37 = vadd.f32 %v4886_v44, %v4780_v11  ;;  %v4913_v40 = vpop.f32.mrb[47].mxu1 }
 0xb13   :  { %v4621_v22 = vadd.f32 %v4911_v30, %v4572_v8  ;;  %v4914_v13 = vadd.f32 %v4913_v40, %v4912_v15 }
 0xb15   :  { %v4635_v29 = vadd.f32 %v4621_v22, %v6484_v56  ;;  %v4624_v10 = vadd.f32 %v4914_v13, %v4575_v37  ;;  %v4887_v42 = vpop.f32.mrb[56].mxu0 }
 0xb16   :  { %v4888_v1 = vpop.f32.mrb[57].mxu0 }
 0xb17   :  { %4639 = vst [vmem:[#allocation14] sm:$0xff] %v4635_v29  ;;  %v4636_v43 = vadd.f32 %v4624_v10, %v6486_v55  ;;  %v4915_v20 = vpop.f32.mrb[48].mxu1  ;;  %v4889_v51 = vadd.f32 %v4888_v1, %v4887_v42  ;;  %v4890_v53 = vpop.f32.mrb[58].mxu0 }
 0xb18   :  { %v4916_v46 = vpop.f32.mrb[49].mxu1  ;;  %v4891_v48 = vpop.f32.mrb[59].mxu0 }
 0xb19   :  { %4640 = vst [vmem:[#allocation14 + $0x8] sm:$0xff] %v4636_v43  ;;  %v4580_v2 = vadd.f32 %v4889_v51, %v4780_v11  ;;  %v4917_v49 = vadd.f32 %v4916_v46, %v4915_v20  ;;  %v4918_v14 = vpop.f32.mrb[50].mxu1  ;;  %v4892_v38 = vadd.f32 %v4891_v48, %v4890_v53 }
 0xb1a   :  { %v4919_v27 = vpop.f32.mrb[51].mxu1 }
 0xb1b   :  { %v4629_v9 = vadd.f32 %v4917_v49, %v4580_v2  ;;  %v4583_v47 = vadd.f32 %v4892_v38, %v4780_v11  ;;  %v4920_v56 = vadd.f32 %v4919_v27, %v4918_v14 }
 0xb1d   :  { %v4637_v55 = vadd.f32 %v4629_v9, %v6489_v63  ;;  %v4632_v18 = vadd.f32 %v4920_v56, %v4583_v47 }
 0xb1f   :  { %4641 = vst [vmem:[#allocation14 + $0x10] sm:$0xff] %v4637_v55  ;;  %v4638_v50 = vadd.f32 %v4632_v18, %v6493_v33 }
 0xb21   :  { %4642 = vst [vmem:[#allocation14 + $0x18] sm:$0xff] %v4638_v50 }
 0xb22   :  { %5481 = shalt.err (!%p5478_p4)
}
 0xb23   :  { %s5482_s0 = scalar_lea.hbm %s6694_s13, 512 }
 0xb24   :  { %p5483_p5 = scmp.ne.s32.totalorder %s6694_s13, %s5482_s0  ;;  %p5486_p6 = scmp.lt.u32.totalorder %s5482_s0, %s6694_s13 }
 0xb26   :  { %p5488_p7 = pnand %p5486_p6, %p5483_p5 }
 0xb28   :  { %5491 = shalt.err (!%p5488_p7)
}
 0xb29   :  { %4654 = dma.vmem_to_hbm [thread:$0]  %s4649_s26, 512, %s6694_s13, [#allocation4], %s5510_s9, %s5510_s9, %s5511_s19  }
 0xb2a   :  { %5500 = dma.done.wait [#allocation4], 512  }
 0xb2b   :  { %5501 = vsyncadd [#allocation4], 4294966784 }
 0xb2c   :  { %4658 = vsyncpa [#allocation3], 1 }
 0xb2d   :  { %4659 = vsyncpa [#allocation6], 1 }
 0xb2e   :  { %4660 = vsyncpa [#allocation9], 1 }
 0xb2f   :  { %4661 = vsyncpa [#allocation12], 1 }
 0xb30   :  { %4662 = vsyncpa [#allocation4], 1 }

</bundles_post_ra>
